<compile_context>
chip_gen: v7x
topology: tpu7x:2x2x1
jax: 0.10.0
libtpu: 0.0.40
codegen_flags: <defaults>
</compile_context>

<pallas_src>
import jax
import jax.numpy as jnp
from jax import lax
from jax.experimental import pallas as pl
from jax.experimental.pallas import tpu as pltpu


def lstm_fc_kernel(x_ref, wih0_ref, wihr_ref, whh_ref, b_ref, wfc_ref, bfc_ref,
                   out_ref, hseq_ref, xproj_ref):
    """L stacked LSTM layers + final Linear on the last hidden state.

    x_ref     : (T, B, n_in)      time-major input (layer 0 input, unpadded)
    wih0_ref  : (n_in, 4*Hp)      layer-0 fused input->gate weights
    wihr_ref  : (max(L-1,1), Hp, 4*Hp)  layers 1..L-1 fused input->gate weights
    whh_ref   : (L, Hp, 4*Hp)     fused hidden->gate weights
    b_ref     : (L, 1, 4*Hp)      fused b_ih + b_hh
    wfc_ref   : (Hp, n_out)       fc weight (transposed, zero-padded rows)
    bfc_ref   : (1, n_out)        fc bias
    out_ref   : (B, n_out)
    hseq_ref  : (T, B, Hp)        VMEM scratch: current layer's output sequence
    xproj_ref : (T, B, 4*Hp)      VMEM scratch: hoisted input projections
    """
    T, B, Hp = hseq_ref.shape
    L = whh_ref.shape[0]

    h_last = jnp.zeros((B, Hp), jnp.float32)

    for l in range(L):  # static unroll over layers
        # ---- hoisted input projection (+ bias), off the recurrent critical path ----
        w_in = wih0_ref[...] if l == 0 else wihr_ref[l - 1]   # (in_dim, 4*Hp)
        bias = b_ref[l]                                        # (1, 4*Hp)
        for t in range(T):  # static: T independent matmuls, MXU pipelines them
            xt = x_ref[t] if l == 0 else hseq_ref[t]
            xproj_ref[t] = (jnp.dot(xt, w_in, preferred_element_type=jnp.float32)
                            + bias)

        whh_l = whh_ref[l]            # (Hp, 4*Hp), loop-invariant
        write_seq = (l < L - 1)       # last layer's sequence is never consumed

        def step(t, carry, whh_l=whh_l, write_seq=write_seq):
            h, c = carry
            # single fused matmul on the serial critical path
            gates = xproj_ref[t] + jnp.dot(h, whh_l,
                                           preferred_element_type=jnp.float32)
            # PyTorch gate order i, f, g, o; each gate is a 32-lane-aligned slice.
            i_g = jax.nn.sigmoid(gates[:, 0 * Hp:1 * Hp])
            f_g = jax.nn.sigmoid(gates[:, 1 * Hp:2 * Hp])
            g_g = jnp.tanh(gates[:, 2 * Hp:3 * Hp])
            o_g = jax.nn.sigmoid(gates[:, 3 * Hp:4 * Hp])
            c_new = f_g * c + i_g * g_g
            h_new = o_g * jnp.tanh(c_new)
            if write_seq:
                hseq_ref[t] = h_new   # next layer's input at step t
            return (h_new, c_new)

        h0 = jnp.zeros((B, Hp), jnp.float32)
        c0 = jnp.zeros((B, Hp), jnp.float32)
        h_last, _ = lax.fori_loop(0, T, step, (h0, c0), unroll=True)

    # fc(x[:, -1]) -- last timestep hidden of the last layer.
    out_ref[...] = (jnp.dot(h_last, wfc_ref[...],
                            preferred_element_type=jnp.float32)
                    + bfc_ref[...])


def init_params(key, n_in=40, n_out=10, n_hidden=20, num_layers=4):
    """Synthetic parameters matching torch.nn.LSTM/Linear shapes.

    Returns (packed, raw):
      packed -- gate-fused, lane-aligned (Hp = ceil(H/32)*32) weights for the kernel.
      raw    -- the original torch-layout tensors, for an independent reference.
    """
    H = n_hidden
    Hp = ((H + 31) // 32) * 32          # per-gate lane padding -> 4*Hp multiple of 128
    G = 4 * Hp
    stdv = 1.0 / (H ** 0.5)
    keys = jax.random.split(key, num_layers * 4 + 2)

    def fuse_gates(w, in_dim, in_pad):
        # w: (4H, in_dim), torch rows [i; f; g; o] -> (in_pad, 4*Hp),
        # gate g occupying columns [g*Hp, (g+1)*Hp); padded rows/cols are zero.
        w4 = jnp.transpose(w.reshape(4, H, in_dim), (0, 2, 1))            # (4, in_dim, H)
        w4 = jnp.pad(w4, ((0, 0), (0, in_pad - in_dim), (0, Hp - H)))     # (4, in_pad, Hp)
        return jnp.transpose(w4, (1, 0, 2)).reshape(in_pad, G)            # (in_pad, 4*Hp)

    raw_layers = []
    wih0 = None
    wihr_list, whh_list, b_list = [], [], []
    ki = 0
    for l in range(num_layers):
        in_l = n_in if l == 0 else H
        w_ih = jax.random.uniform(keys[ki], (4 * H, in_l), jnp.float32, -stdv, stdv); ki += 1
        w_hh = jax.random.uniform(keys[ki], (4 * H, H), jnp.float32, -stdv, stdv); ki += 1
        b_ih = jax.random.uniform(keys[ki], (4 * H,), jnp.float32, -stdv, stdv); ki += 1
        b_hh = jax.random.uniform(keys[ki], (4 * H,), jnp.float32, -stdv, stdv); ki += 1
        raw_layers.append((w_ih, w_hh, b_ih, b_hh))

        if l == 0:
            wih0 = fuse_gates(w_ih, n_in, n_in)          # (n_in, 4*Hp)
        else:
            wihr_list.append(fuse_gates(w_ih, H, Hp))    # (Hp, 4*Hp)
        whh_list.append(fuse_gates(w_hh, H, Hp))         # (Hp, 4*Hp)
        b_pad = jnp.pad((b_ih + b_hh).reshape(4, H), ((0, 0), (0, Hp - H)))
        b_list.append(b_pad.reshape(1, G))               # (1, 4*Hp)

    wihr = (jnp.stack(wihr_list) if wihr_list
            else jnp.zeros((1, Hp, G), jnp.float32))     # dummy, never read if L == 1
    whh = jnp.stack(whh_list)                            # (L, Hp, 4*Hp)
    b = jnp.stack(b_list)                                # (L, 1, 4*Hp)

    w_fc = jax.random.uniform(keys[ki], (n_out, H), jnp.float32, -stdv, stdv); ki += 1
    b_fc = jax.random.uniform(keys[ki], (n_out,), jnp.float32, -stdv, stdv)
    wfc_t = jnp.pad(w_fc.T, ((0, Hp - H), (0, 0)))       # (Hp, n_out), padded rows zero

    packed = (wih0, wihr, whh, b, wfc_t, b_fc.reshape(1, n_out))
    raw = (raw_layers, (w_fc, b_fc))
    return packed, raw


def model_lstm_forward(x, packed):
    """x: (B, T, n_in) batch_first, like the PyTorch module. Returns (B, n_out)."""
    wih0, wihr, whh, b, wfc_t, bfc = packed
    B, T, n_in = x.shape
    L, Hp, G = whh.shape
    n_out = wfc_t.shape[1]

    x_tm = jnp.transpose(x, (1, 0, 2)).astype(jnp.float32)  # (T, B, n_in) time-major

    # Advisory cost hint for the XLA scheduler (tiny, latency-dominated call).
    flops = 2 * T * B * G * (n_in + (L - 1) * Hp + L * Hp) + 2 * B * Hp * n_out
    transc = L * T * B * 5 * Hp
    bytes_accessed = 4 * (x_tm.size + wih0.size + wihr.size + whh.size + b.size
                          + wfc_t.size + bfc.size + B * n_out)

    vmem = pl.BlockSpec(memory_space=pltpu.MemorySpace.VMEM)
    return pl.pallas_call(
        lstm_fc_kernel,
        out_shape=jax.ShapeDtypeStruct((B, n_out), jnp.float32),
        in_specs=[vmem] * 7,
        out_specs=vmem,
        scratch_shapes=[pltpu.VMEM((T, B, Hp), jnp.float32),   # layer output sequence
                        pltpu.VMEM((T, B, G), jnp.float32)],   # hoisted input projections
        cost_estimate=pl.CostEstimate(flops=flops,
                                      transcendentals=transc,
                                      bytes_accessed=bytes_accessed),
    )(x_tm, wih0, wihr, whh, b, wfc_t, bfc)


def reference_forward(x, raw):
    """Pure-JAX reference using the raw torch-layout weights (validates packing too)."""
    layers, (w_fc, b_fc) = raw
    B, T, _ = x.shape
    seq = jnp.transpose(x, (1, 0, 2)).astype(jnp.float32)  # (T, B, n_in)
    h = None
    for (w_ih, w_hh, b_ih, b_hh) in layers:
        H = w_hh.shape[1]
        h = jnp.zeros((B, H), jnp.float32)
        c = jnp.zeros((B, H), jnp.float32)
        outs = []
        for t in range(T):
            g = seq[t] @ w_ih.T + h @ w_hh.T + b_ih + b_hh   # (B, 4H), torch gate order
            i_g = jax.nn.sigmoid(g[:, 0 * H:1 * H])
            f_g = jax.nn.sigmoid(g[:, 1 * H:2 * H])
            g_g = jnp.tanh(g[:, 2 * H:3 * H])
            o_g = jax.nn.sigmoid(g[:, 3 * H:4 * H])
            c = f_g * c + i_g * g_g
            h = o_g * jnp.tanh(c)
            outs.append(h)
        seq = jnp.stack(outs)
    return h @ w_fc.T + b_fc


if __name__ == "__main__":
    key = jax.random.PRNGKey(0)
    k_param, k_x = jax.random.split(key)

    n_in, n_out, n_hidden, num_layers = 40, 10, 20, 4
    batch, seq_len = 2, 8

    packed, raw = init_params(k_param, n_in=n_in, n_out=n_out,
                              n_hidden=n_hidden, num_layers=num_layers)
    x = jax.random.normal(k_x, (batch, seq_len, n_in), dtype=jnp.float32)

    out = jax.block_until_ready(model_lstm_forward(x, packed))
    ref = jax.block_until_ready(reference_forward(x, raw))

    assert out.shape == (batch, n_out)
    assert jnp.allclose(out, ref, rtol=1e-4, atol=1e-4), "mismatch vs JAX reference"

    print("KERNEL_OK")
</pallas_src>

<mosaic_0001>
module attributes {stable_mosaic.version = 11 : i64} {
  func.func @lstm_fc_kernel(%arg0: memref<8x2x40xf32, #tpu.memory_space<vmem>>, %arg1: memref<40x128xf32, #tpu.memory_space<vmem>>, %arg2: memref<3x32x128xf32, #tpu.memory_space<vmem>>, %arg3: memref<4x32x128xf32, #tpu.memory_space<vmem>>, %arg4: memref<4x1x128xf32, #tpu.memory_space<vmem>>, %arg5: memref<32x10xf32, #tpu.memory_space<vmem>>, %arg6: memref<1x10xf32, #tpu.memory_space<vmem>>, %arg7: memref<2x10xf32, #tpu.memory_space<vmem>>, %arg8: memref<8x2x32xf32, #tpu.memory_space<vmem>>, %arg9: memref<8x2x128xf32, #tpu.memory_space<vmem>>) attributes {dimension_semantics = [], scalar_prefetch = 0 : i64, scratch_operands = 2 : i64, tpu.core_type = #tpu.core_type<tc>} {
    %c0 = arith.constant 0 : index
    %c0_0 = arith.constant 0 : index
    %0 = vector.load %arg1[%c0, %c0_0] : memref<40x128xf32, #tpu.memory_space<vmem>>, vector<40x128xf32>
    %c0_1 = arith.constant 0 : index
    %c0_2 = arith.constant 0 : index
    %c0_3 = arith.constant 0 : index
    %1 = vector.load %arg4[%c0_1, %c0_2, %c0_3] : memref<4x1x128xf32, #tpu.memory_space<vmem>>, vector<1x1x128xf32>
    %2 = vector.shape_cast %1 : vector<1x1x128xf32> to vector<1x128xf32>
    %c0_4 = arith.constant 0 : index
    %c0_5 = arith.constant 0 : index
    %c0_6 = arith.constant 0 : index
    %3 = vector.load %arg0[%c0_4, %c0_5, %c0_6] : memref<8x2x40xf32, #tpu.memory_space<vmem>>, vector<1x2x40xf32>
    %4 = vector.shape_cast %3 : vector<1x2x40xf32> to vector<2x40xf32>
    %cst = arith.constant dense<0.000000e+00> : vector<2x128xf32>
    %5 = tpu.matmul %4, %0, %cst {dimension_numbers = #tpu.dot_dimension_numbers<[1], [0], [0], [1], [0, 0, 1, 1], [], []>} : vector<2x40xf32>, vector<40x128xf32>, vector<2x128xf32> -> vector<2x128xf32>
    %6 = vector.broadcast %2 : vector<1x128xf32> to vector<2x128xf32>
    %7 = arith.addf %5, %6 : vector<2x128xf32>
    %c0_7 = arith.constant 0 : index
    %c0_8 = arith.constant 0 : index
    %c0_9 = arith.constant 0 : index
    %8 = vector.load %arg9[%c0_7, %c0_8, %c0_9] : memref<8x2x128xf32, #tpu.memory_space<vmem>>, vector<1x2x128xf32>
    %9 = vector.shape_cast %8 : vector<1x2x128xf32> to vector<2x128xf32>
    %10 = vector.shape_cast %7 : vector<2x128xf32> to vector<1x2x128xf32>
    tpu.vector_store %arg9[%c0_7, %c0_8, %c0_9], %10 {strides = array<i32>} : memref<8x2x128xf32, #tpu.memory_space<vmem>>, vector<1x2x128xf32>,
    %c1 = arith.constant 1 : index
    %c0_10 = arith.constant 0 : index
    %c0_11 = arith.constant 0 : index
    %11 = vector.load %arg0[%c1, %c0_10, %c0_11] : memref<8x2x40xf32, #tpu.memory_space<vmem>>, vector<1x2x40xf32>
    %12 = vector.shape_cast %11 : vector<1x2x40xf32> to vector<2x40xf32>
    %cst_12 = arith.constant dense<0.000000e+00> : vector<2x128xf32>
    %13 = tpu.matmul %12, %0, %cst_12 {dimension_numbers = #tpu.dot_dimension_numbers<[1], [0], [0], [1], [0, 0, 1, 1], [], []>} : vector<2x40xf32>, vector<40x128xf32>, vector<2x128xf32> -> vector<2x128xf32>
    %14 = vector.broadcast %2 : vector<1x128xf32> to vector<2x128xf32>
    %15 = arith.addf %13, %14 : vector<2x128xf32>
    %c1_13 = arith.constant 1 : index
    %c0_14 = arith.constant 0 : index
    %c0_15 = arith.constant 0 : index
    %16 = vector.load %arg9[%c1_13, %c0_14, %c0_15] : memref<8x2x128xf32, #tpu.memory_space<vmem>>, vector<1x2x128xf32>
    %17 = vector.shape_cast %16 : vector<1x2x128xf32> to vector<2x128xf32>
    %18 = vector.shape_cast %15 : vector<2x128xf32> to vector<1x2x128xf32>
    tpu.vector_store %arg9[%c1_13, %c0_14, %c0_15], %18 {strides = array<i32>} : memref<8x2x128xf32, #tpu.memory_space<vmem>>, vector<1x2x128xf32>,
    %c2 = arith.constant 2 : index
    %c0_16 = arith.constant 0 : index
    %c0_17 = arith.constant 0 : index
    %19 = vector.load %arg0[%c2, %c0_16, %c0_17] : memref<8x2x40xf32, #tpu.memory_space<vmem>>, vector<1x2x40xf32>
    %20 = vector.shape_cast %19 : vector<1x2x40xf32> to vector<2x40xf32>
    %cst_18 = arith.constant dense<0.000000e+00> : vector<2x128xf32>
    %21 = tpu.matmul %20, %0, %cst_18 {dimension_numbers = #tpu.dot_dimension_numbers<[1], [0], [0], [1], [0, 0, 1, 1], [], []>} : vector<2x40xf32>, vector<40x128xf32>, vector<2x128xf32> -> vector<2x128xf32>
    %22 = vector.broadcast %2 : vector<1x128xf32> to vector<2x128xf32>
    %23 = arith.addf %21, %22 : vector<2x128xf32>
    %c2_19 = arith.constant 2 : index
    %c0_20 = arith.constant 0 : index
    %c0_21 = arith.constant 0 : index
    %24 = vector.load %arg9[%c2_19, %c0_20, %c0_21] : memref<8x2x128xf32, #tpu.memory_space<vmem>>, vector<1x2x128xf32>
    %25 = vector.shape_cast %24 : vector<1x2x128xf32> to vector<2x128xf32>
    %26 = vector.shape_cast %23 : vector<2x128xf32> to vector<1x2x128xf32>
    tpu.vector_store %arg9[%c2_19, %c0_20, %c0_21], %26 {strides = array<i32>} : memref<8x2x128xf32, #tpu.memory_space<vmem>>, vector<1x2x128xf32>,
    %c3 = arith.constant 3 : index
    %c0_22 = arith.constant 0 : index
    %c0_23 = arith.constant 0 : index
    %27 = vector.load %arg0[%c3, %c0_22, %c0_23] : memref<8x2x40xf32, #tpu.memory_space<vmem>>, vector<1x2x40xf32>
    %28 = vector.shape_cast %27 : vector<1x2x40xf32> to vector<2x40xf32>
    %cst_24 = arith.constant dense<0.000000e+00> : vector<2x128xf32>
    %29 = tpu.matmul %28, %0, %cst_24 {dimension_numbers = #tpu.dot_dimension_numbers<[1], [0], [0], [1], [0, 0, 1, 1], [], []>} : vector<2x40xf32>, vector<40x128xf32>, vector<2x128xf32> -> vector<2x128xf32>
    %30 = vector.broadcast %2 : vector<1x128xf32> to vector<2x128xf32>
    %31 = arith.addf %29, %30 : vector<2x128xf32>
    %c3_25 = arith.constant 3 : index
    %c0_26 = arith.constant 0 : index
    %c0_27 = arith.constant 0 : index
    %32 = vector.load %arg9[%c3_25, %c0_26, %c0_27] : memref<8x2x128xf32, #tpu.memory_space<vmem>>, vector<1x2x128xf32>
    %33 = vector.shape_cast %32 : vector<1x2x128xf32> to vector<2x128xf32>
    %34 = vector.shape_cast %31 : vector<2x128xf32> to vector<1x2x128xf32>
    tpu.vector_store %arg9[%c3_25, %c0_26, %c0_27], %34 {strides = array<i32>} : memref<8x2x128xf32, #tpu.memory_space<vmem>>, vector<1x2x128xf32>,
    %c4 = arith.constant 4 : index
    %c0_28 = arith.constant 0 : index
    %c0_29 = arith.constant 0 : index
    %35 = vector.load %arg0[%c4, %c0_28, %c0_29] : memref<8x2x40xf32, #tpu.memory_space<vmem>>, vector<1x2x40xf32>
    %36 = vector.shape_cast %35 : vector<1x2x40xf32> to vector<2x40xf32>
    %cst_30 = arith.constant dense<0.000000e+00> : vector<2x128xf32>
    %37 = tpu.matmul %36, %0, %cst_30 {dimension_numbers = #tpu.dot_dimension_numbers<[1], [0], [0], [1], [0, 0, 1, 1], [], []>} : vector<2x40xf32>, vector<40x128xf32>, vector<2x128xf32> -> vector<2x128xf32>
    %38 = vector.broadcast %2 : vector<1x128xf32> to vector<2x128xf32>
    %39 = arith.addf %37, %38 : vector<2x128xf32>
    %c4_31 = arith.constant 4 : index
    %c0_32 = arith.constant 0 : index
    %c0_33 = arith.constant 0 : index
    %40 = vector.load %arg9[%c4_31, %c0_32, %c0_33] : memref<8x2x128xf32, #tpu.memory_space<vmem>>, vector<1x2x128xf32>
    %41 = vector.shape_cast %40 : vector<1x2x128xf32> to vector<2x128xf32>
    %42 = vector.shape_cast %39 : vector<2x128xf32> to vector<1x2x128xf32>
    tpu.vector_store %arg9[%c4_31, %c0_32, %c0_33], %42 {strides = array<i32>} : memref<8x2x128xf32, #tpu.memory_space<vmem>>, vector<1x2x128xf32>,
    %c5 = arith.constant 5 : index
    %c0_34 = arith.constant 0 : index
    %c0_35 = arith.constant 0 : index
    %43 = vector.load %arg0[%c5, %c0_34, %c0_35] : memref<8x2x40xf32, #tpu.memory_space<vmem>>, vector<1x2x40xf32>
    %44 = vector.shape_cast %43 : vector<1x2x40xf32> to vector<2x40xf32>
    %cst_36 = arith.constant dense<0.000000e+00> : vector<2x128xf32>
    %45 = tpu.matmul %44, %0, %cst_36 {dimension_numbers = #tpu.dot_dimension_numbers<[1], [0], [0], [1], [0, 0, 1, 1], [], []>} : vector<2x40xf32>, vector<40x128xf32>, vector<2x128xf32> -> vector<2x128xf32>
    %46 = vector.broadcast %2 : vector<1x128xf32> to vector<2x128xf32>
    %47 = arith.addf %45, %46 : vector<2x128xf32>
    %c5_37 = arith.constant 5 : index
    %c0_38 = arith.constant 0 : index
    %c0_39 = arith.constant 0 : index
    %48 = vector.load %arg9[%c5_37, %c0_38, %c0_39] : memref<8x2x128xf32, #tpu.memory_space<vmem>>, vector<1x2x128xf32>
    %49 = vector.shape_cast %48 : vector<1x2x128xf32> to vector<2x128xf32>
    %50 = vector.shape_cast %47 : vector<2x128xf32> to vector<1x2x128xf32>
    tpu.vector_store %arg9[%c5_37, %c0_38, %c0_39], %50 {strides = array<i32>} : memref<8x2x128xf32, #tpu.memory_space<vmem>>, vector<1x2x128xf32>,
    %c6 = arith.constant 6 : index
    %c0_40 = arith.constant 0 : index
    %c0_41 = arith.constant 0 : index
    %51 = vector.load %arg0[%c6, %c0_40, %c0_41] : memref<8x2x40xf32, #tpu.memory_space<vmem>>, vector<1x2x40xf32>
    %52 = vector.shape_cast %51 : vector<1x2x40xf32> to vector<2x40xf32>
    %cst_42 = arith.constant dense<0.000000e+00> : vector<2x128xf32>
    %53 = tpu.matmul %52, %0, %cst_42 {dimension_numbers = #tpu.dot_dimension_numbers<[1], [0], [0], [1], [0, 0, 1, 1], [], []>} : vector<2x40xf32>, vector<40x128xf32>, vector<2x128xf32> -> vector<2x128xf32>
    %54 = vector.broadcast %2 : vector<1x128xf32> to vector<2x128xf32>
    %55 = arith.addf %53, %54 : vector<2x128xf32>
    %c6_43 = arith.constant 6 : index
    %c0_44 = arith.constant 0 : index
    %c0_45 = arith.constant 0 : index
    %56 = vector.load %arg9[%c6_43, %c0_44, %c0_45] : memref<8x2x128xf32, #tpu.memory_space<vmem>>, vector<1x2x128xf32>
    %57 = vector.shape_cast %56 : vector<1x2x128xf32> to vector<2x128xf32>
    %58 = vector.shape_cast %55 : vector<2x128xf32> to vector<1x2x128xf32>
    tpu.vector_store %arg9[%c6_43, %c0_44, %c0_45], %58 {strides = array<i32>} : memref<8x2x128xf32, #tpu.memory_space<vmem>>, vector<1x2x128xf32>,
    %c7 = arith.constant 7 : index
    %c0_46 = arith.constant 0 : index
    %c0_47 = arith.constant 0 : index
    %59 = vector.load %arg0[%c7, %c0_46, %c0_47] : memref<8x2x40xf32, #tpu.memory_space<vmem>>, vector<1x2x40xf32>
    %60 = vector.shape_cast %59 : vector<1x2x40xf32> to vector<2x40xf32>
    %cst_48 = arith.constant dense<0.000000e+00> : vector<2x128xf32>
    %61 = tpu.matmul %60, %0, %cst_48 {dimension_numbers = #tpu.dot_dimension_numbers<[1], [0], [0], [1], [0, 0, 1, 1], [], []>} : vector<2x40xf32>, vector<40x128xf32>, vector<2x128xf32> -> vector<2x128xf32>
    %62 = vector.broadcast %2 : vector<1x128xf32> to vector<2x128xf32>
    %63 = arith.addf %61, %62 : vector<2x128xf32>
    %c7_49 = arith.constant 7 : index
    %c0_50 = arith.constant 0 : index
    %c0_51 = arith.constant 0 : index
    %64 = vector.load %arg9[%c7_49, %c0_50, %c0_51] : memref<8x2x128xf32, #tpu.memory_space<vmem>>, vector<1x2x128xf32>
    %65 = vector.shape_cast %64 : vector<1x2x128xf32> to vector<2x128xf32>
    %66 = vector.shape_cast %63 : vector<2x128xf32> to vector<1x2x128xf32>
    tpu.vector_store %arg9[%c7_49, %c0_50, %c0_51], %66 {strides = array<i32>} : memref<8x2x128xf32, #tpu.memory_space<vmem>>, vector<1x2x128xf32>,
    %c0_52 = arith.constant 0 : index
    %c0_53 = arith.constant 0 : index
    %c0_54 = arith.constant 0 : index
    %67 = vector.load %arg3[%c0_52, %c0_53, %c0_54] : memref<4x32x128xf32, #tpu.memory_space<vmem>>, vector<1x32x128xf32>
    %68 = vector.shape_cast %67 : vector<1x32x128xf32> to vector<32x128xf32>
    %cst_55 = arith.constant 0.000000e+00 : f32
    %69 = vector.broadcast %cst_55 : f32 to vector<2x32xf32>
    %cst_56 = arith.constant 0.000000e+00 : f32
    %70 = vector.broadcast %cst_56 : f32 to vector<2x32xf32>
    %c0_i32 = arith.constant 0 : i32
    %71 = arith.index_cast %c0_i32 : i32 to index
    %c0_57 = arith.constant 0 : index
    %c0_58 = arith.constant 0 : index
    %72 = vector.load %arg9[%71, %c0_57, %c0_58] : memref<8x2x128xf32, #tpu.memory_space<vmem>>, vector<1x2x128xf32>
    %73 = vector.shape_cast %72 : vector<1x2x128xf32> to vector<2x128xf32>
    %cst_59 = arith.constant dense<0.000000e+00> : vector<2x128xf32>
    %74 = tpu.matmul %69, %68, %cst_59 {dimension_numbers = #tpu.dot_dimension_numbers<[1], [0], [0], [1], [0, 0, 1, 1], [], []>} : vector<2x32xf32>, vector<32x128xf32>, vector<2x128xf32> -> vector<2x128xf32>
    %75 = arith.addf %73, %74 : vector<2x128xf32>
    %76 = vector.extract_strided_slice %75 {offsets = [0, 0], sizes = [2, 32], strides = [1, 1]} : vector<2x128xf32> to vector<2x32xf32>
    %77 = arith.negf %76 : vector<2x32xf32>
    %78 = math.exp %77 : vector<2x32xf32>
    %cst_60 = arith.constant 1.000000e+00 : f32
    %79 = vector.broadcast %cst_60 : f32 to vector<2x32xf32>
    %80 = arith.addf %79, %78 : vector<2x32xf32>
    %81 = arith.divf %79, %80 : vector<2x32xf32>
    %82 = vector.extract_strided_slice %75 {offsets = [0, 32], sizes = [2, 32], strides = [1, 1]} : vector<2x128xf32> to vector<2x32xf32>
    %83 = arith.negf %82 : vector<2x32xf32>
    %84 = math.exp %83 : vector<2x32xf32>
    %cst_61 = arith.constant 1.000000e+00 : f32
    %85 = vector.broadcast %cst_61 : f32 to vector<2x32xf32>
    %86 = arith.addf %85, %84 : vector<2x32xf32>
    %87 = arith.divf %85, %86 : vector<2x32xf32>
    %88 = vector.extract_strided_slice %75 {offsets = [0, 64], sizes = [2, 32], strides = [1, 1]} : vector<2x128xf32> to vector<2x32xf32>
    %89 = math.tanh %88 : vector<2x32xf32>
    %90 = vector.extract_strided_slice %75 {offsets = [0, 96], sizes = [2, 32], strides = [1, 1]} : vector<2x128xf32> to vector<2x32xf32>
    %91 = arith.negf %90 : vector<2x32xf32>
    %92 = math.exp %91 : vector<2x32xf32>
    %cst_62 = arith.constant 1.000000e+00 : f32
    %93 = vector.broadcast %cst_62 : f32 to vector<2x32xf32>
    %94 = arith.addf %93, %92 : vector<2x32xf32>
    %95 = arith.divf %93, %94 : vector<2x32xf32>
    %96 = arith.mulf %87, %70 : vector<2x32xf32>
    %97 = arith.mulf %81, %89 : vector<2x32xf32>
    %98 = arith.addf %96, %97 : vector<2x32xf32>
    %99 = math.tanh %98 : vector<2x32xf32>
    %100 = arith.mulf %95, %99 : vector<2x32xf32>
    %101 = arith.index_cast %c0_i32 : i32 to index
    %c0_63 = arith.constant 0 : index
    %c0_64 = arith.constant 0 : index
    %102 = vector.load %arg8[%101, %c0_63, %c0_64] : memref<8x2x32xf32, #tpu.memory_space<vmem>>, vector<1x2x32xf32>
    %103 = vector.shape_cast %102 : vector<1x2x32xf32> to vector<2x32xf32>
    %104 = vector.shape_cast %100 : vector<2x32xf32> to vector<1x2x32xf32>
    tpu.vector_store %arg8[%101, %c0_63, %c0_64], %104 {strides = array<i32>} : memref<8x2x32xf32, #tpu.memory_space<vmem>>, vector<1x2x32xf32>,
    %c1_i32 = arith.constant 1 : i32
    %105 = arith.index_cast %c1_i32 : i32 to index
    %c0_65 = arith.constant 0 : index
    %c0_66 = arith.constant 0 : index
    %106 = vector.load %arg9[%105, %c0_65, %c0_66] : memref<8x2x128xf32, #tpu.memory_space<vmem>>, vector<1x2x128xf32>
    %107 = vector.shape_cast %106 : vector<1x2x128xf32> to vector<2x128xf32>
    %cst_67 = arith.constant dense<0.000000e+00> : vector<2x128xf32>
    %108 = tpu.matmul %100, %68, %cst_67 {dimension_numbers = #tpu.dot_dimension_numbers<[1], [0], [0], [1], [0, 0, 1, 1], [], []>} : vector<2x32xf32>, vector<32x128xf32>, vector<2x128xf32> -> vector<2x128xf32>
    %109 = arith.addf %107, %108 : vector<2x128xf32>
    %110 = vector.extract_strided_slice %109 {offsets = [0, 0], sizes = [2, 32], strides = [1, 1]} : vector<2x128xf32> to vector<2x32xf32>
    %111 = arith.negf %110 : vector<2x32xf32>
    %112 = math.exp %111 : vector<2x32xf32>
    %cst_68 = arith.constant 1.000000e+00 : f32
    %113 = vector.broadcast %cst_68 : f32 to vector<2x32xf32>
    %114 = arith.addf %113, %112 : vector<2x32xf32>
    %115 = arith.divf %113, %114 : vector<2x32xf32>
    %116 = vector.extract_strided_slice %109 {offsets = [0, 32], sizes = [2, 32], strides = [1, 1]} : vector<2x128xf32> to vector<2x32xf32>
    %117 = arith.negf %116 : vector<2x32xf32>
    %118 = math.exp %117 : vector<2x32xf32>
    %cst_69 = arith.constant 1.000000e+00 : f32
    %119 = vector.broadcast %cst_69 : f32 to vector<2x32xf32>
    %120 = arith.addf %119, %118 : vector<2x32xf32>
    %121 = arith.divf %119, %120 : vector<2x32xf32>
    %122 = vector.extract_strided_slice %109 {offsets = [0, 64], sizes = [2, 32], strides = [1, 1]} : vector<2x128xf32> to vector<2x32xf32>
    %123 = math.tanh %122 : vector<2x32xf32>
    %124 = vector.extract_strided_slice %109 {offsets = [0, 96], sizes = [2, 32], strides = [1, 1]} : vector<2x128xf32> to vector<2x32xf32>
    %125 = arith.negf %124 : vector<2x32xf32>
    %126 = math.exp %125 : vector<2x32xf32>
    %cst_70 = arith.constant 1.000000e+00 : f32
    %127 = vector.broadcast %cst_70 : f32 to vector<2x32xf32>
    %128 = arith.addf %127, %126 : vector<2x32xf32>
    %129 = arith.divf %127, %128 : vector<2x32xf32>
    %130 = arith.mulf %121, %98 : vector<2x32xf32>
    %131 = arith.mulf %115, %123 : vector<2x32xf32>
    %132 = arith.addf %130, %131 : vector<2x32xf32>
    %133 = math.tanh %132 : vector<2x32xf32>
    %134 = arith.mulf %129, %133 : vector<2x32xf32>
    %135 = arith.index_cast %c1_i32 : i32 to index
    %c0_71 = arith.constant 0 : index
    %c0_72 = arith.constant 0 : index
    %136 = vector.load %arg8[%135, %c0_71, %c0_72] : memref<8x2x32xf32, #tpu.memory_space<vmem>>, vector<1x2x32xf32>
    %137 = vector.shape_cast %136 : vector<1x2x32xf32> to vector<2x32xf32>
    %138 = vector.shape_cast %134 : vector<2x32xf32> to vector<1x2x32xf32>
    tpu.vector_store %arg8[%135, %c0_71, %c0_72], %138 {strides = array<i32>} : memref<8x2x32xf32, #tpu.memory_space<vmem>>, vector<1x2x32xf32>,
    %c2_i32 = arith.constant 2 : i32
    %139 = arith.index_cast %c2_i32 : i32 to index
    %c0_73 = arith.constant 0 : index
    %c0_74 = arith.constant 0 : index
    %140 = vector.load %arg9[%139, %c0_73, %c0_74] : memref<8x2x128xf32, #tpu.memory_space<vmem>>, vector<1x2x128xf32>
    %141 = vector.shape_cast %140 : vector<1x2x128xf32> to vector<2x128xf32>
    %cst_75 = arith.constant dense<0.000000e+00> : vector<2x128xf32>
    %142 = tpu.matmul %134, %68, %cst_75 {dimension_numbers = #tpu.dot_dimension_numbers<[1], [0], [0], [1], [0, 0, 1, 1], [], []>} : vector<2x32xf32>, vector<32x128xf32>, vector<2x128xf32> -> vector<2x128xf32>
    %143 = arith.addf %141, %142 : vector<2x128xf32>
    %144 = vector.extract_strided_slice %143 {offsets = [0, 0], sizes = [2, 32], strides = [1, 1]} : vector<2x128xf32> to vector<2x32xf32>
    %145 = arith.negf %144 : vector<2x32xf32>
    %146 = math.exp %145 : vector<2x32xf32>
    %cst_76 = arith.constant 1.000000e+00 : f32
    %147 = vector.broadcast %cst_76 : f32 to vector<2x32xf32>
    %148 = arith.addf %147, %146 : vector<2x32xf32>
    %149 = arith.divf %147, %148 : vector<2x32xf32>
    %150 = vector.extract_strided_slice %143 {offsets = [0, 32], sizes = [2, 32], strides = [1, 1]} : vector<2x128xf32> to vector<2x32xf32>
    %151 = arith.negf %150 : vector<2x32xf32>
    %152 = math.exp %151 : vector<2x32xf32>
    %cst_77 = arith.constant 1.000000e+00 : f32
    %153 = vector.broadcast %cst_77 : f32 to vector<2x32xf32>
    %154 = arith.addf %153, %152 : vector<2x32xf32>
    %155 = arith.divf %153, %154 : vector<2x32xf32>
    %156 = vector.extract_strided_slice %143 {offsets = [0, 64], sizes = [2, 32], strides = [1, 1]} : vector<2x128xf32> to vector<2x32xf32>
    %157 = math.tanh %156 : vector<2x32xf32>
    %158 = vector.extract_strided_slice %143 {offsets = [0, 96], sizes = [2, 32], strides = [1, 1]} : vector<2x128xf32> to vector<2x32xf32>
    %159 = arith.negf %158 : vector<2x32xf32>
    %160 = math.exp %159 : vector<2x32xf32>
    %cst_78 = arith.constant 1.000000e+00 : f32
    %161 = vector.broadcast %cst_78 : f32 to vector<2x32xf32>
    %162 = arith.addf %161, %160 : vector<2x32xf32>
    %163 = arith.divf %161, %162 : vector<2x32xf32>
    %164 = arith.mulf %155, %132 : vector<2x32xf32>
    %165 = arith.mulf %149, %157 : vector<2x32xf32>
    %166 = arith.addf %164, %165 : vector<2x32xf32>
    %167 = math.tanh %166 : vector<2x32xf32>
    %168 = arith.mulf %163, %167 : vector<2x32xf32>
    %169 = arith.index_cast %c2_i32 : i32 to index
    %c0_79 = arith.constant 0 : index
    %c0_80 = arith.constant 0 : index
    %170 = vector.load %arg8[%169, %c0_79, %c0_80] : memref<8x2x32xf32, #tpu.memory_space<vmem>>, vector<1x2x32xf32>
    %171 = vector.shape_cast %170 : vector<1x2x32xf32> to vector<2x32xf32>
    %172 = vector.shape_cast %168 : vector<2x32xf32> to vector<1x2x32xf32>
    tpu.vector_store %arg8[%169, %c0_79, %c0_80], %172 {strides = array<i32>} : memref<8x2x32xf32, #tpu.memory_space<vmem>>, vector<1x2x32xf32>,
    %c3_i32 = arith.constant 3 : i32
    %173 = arith.index_cast %c3_i32 : i32 to index
    %c0_81 = arith.constant 0 : index
    %c0_82 = arith.constant 0 : index
    %174 = vector.load %arg9[%173, %c0_81, %c0_82] : memref<8x2x128xf32, #tpu.memory_space<vmem>>, vector<1x2x128xf32>
    %175 = vector.shape_cast %174 : vector<1x2x128xf32> to vector<2x128xf32>
    %cst_83 = arith.constant dense<0.000000e+00> : vector<2x128xf32>
    %176 = tpu.matmul %168, %68, %cst_83 {dimension_numbers = #tpu.dot_dimension_numbers<[1], [0], [0], [1], [0, 0, 1, 1], [], []>} : vector<2x32xf32>, vector<32x128xf32>, vector<2x128xf32> -> vector<2x128xf32>
    %177 = arith.addf %175, %176 : vector<2x128xf32>
    %178 = vector.extract_strided_slice %177 {offsets = [0, 0], sizes = [2, 32], strides = [1, 1]} : vector<2x128xf32> to vector<2x32xf32>
    %179 = arith.negf %178 : vector<2x32xf32>
    %180 = math.exp %179 : vector<2x32xf32>
    %cst_84 = arith.constant 1.000000e+00 : f32
    %181 = vector.broadcast %cst_84 : f32 to vector<2x32xf32>
    %182 = arith.addf %181, %180 : vector<2x32xf32>
    %183 = arith.divf %181, %182 : vector<2x32xf32>
    %184 = vector.extract_strided_slice %177 {offsets = [0, 32], sizes = [2, 32], strides = [1, 1]} : vector<2x128xf32> to vector<2x32xf32>
    %185 = arith.negf %184 : vector<2x32xf32>
    %186 = math.exp %185 : vector<2x32xf32>
    %cst_85 = arith.constant 1.000000e+00 : f32
    %187 = vector.broadcast %cst_85 : f32 to vector<2x32xf32>
    %188 = arith.addf %187, %186 : vector<2x32xf32>
    %189 = arith.divf %187, %188 : vector<2x32xf32>
    %190 = vector.extract_strided_slice %177 {offsets = [0, 64], sizes = [2, 32], strides = [1, 1]} : vector<2x128xf32> to vector<2x32xf32>
    %191 = math.tanh %190 : vector<2x32xf32>
    %192 = vector.extract_strided_slice %177 {offsets = [0, 96], sizes = [2, 32], strides = [1, 1]} : vector<2x128xf32> to vector<2x32xf32>
    %193 = arith.negf %192 : vector<2x32xf32>
    %194 = math.exp %193 : vector<2x32xf32>
    %cst_86 = arith.constant 1.000000e+00 : f32
    %195 = vector.broadcast %cst_86 : f32 to vector<2x32xf32>
    %196 = arith.addf %195, %194 : vector<2x32xf32>
    %197 = arith.divf %195, %196 : vector<2x32xf32>
    %198 = arith.mulf %189, %166 : vector<2x32xf32>
    %199 = arith.mulf %183, %191 : vector<2x32xf32>
    %200 = arith.addf %198, %199 : vector<2x32xf32>
    %201 = math.tanh %200 : vector<2x32xf32>
    %202 = arith.mulf %197, %201 : vector<2x32xf32>
    %203 = arith.index_cast %c3_i32 : i32 to index
    %c0_87 = arith.constant 0 : index
    %c0_88 = arith.constant 0 : index
    %204 = vector.load %arg8[%203, %c0_87, %c0_88] : memref<8x2x32xf32, #tpu.memory_space<vmem>>, vector<1x2x32xf32>
    %205 = vector.shape_cast %204 : vector<1x2x32xf32> to vector<2x32xf32>
    %206 = vector.shape_cast %202 : vector<2x32xf32> to vector<1x2x32xf32>
    tpu.vector_store %arg8[%203, %c0_87, %c0_88], %206 {strides = array<i32>} : memref<8x2x32xf32, #tpu.memory_space<vmem>>, vector<1x2x32xf32>,
    %c4_i32 = arith.constant 4 : i32
    %207 = arith.index_cast %c4_i32 : i32 to index
    %c0_89 = arith.constant 0 : index
    %c0_90 = arith.constant 0 : index
    %208 = vector.load %arg9[%207, %c0_89, %c0_90] : memref<8x2x128xf32, #tpu.memory_space<vmem>>, vector<1x2x128xf32>
    %209 = vector.shape_cast %208 : vector<1x2x128xf32> to vector<2x128xf32>
    %cst_91 = arith.constant dense<0.000000e+00> : vector<2x128xf32>
    %210 = tpu.matmul %202, %68, %cst_91 {dimension_numbers = #tpu.dot_dimension_numbers<[1], [0], [0], [1], [0, 0, 1, 1], [], []>} : vector<2x32xf32>, vector<32x128xf32>, vector<2x128xf32> -> vector<2x128xf32>
    %211 = arith.addf %209, %210 : vector<2x128xf32>
    %212 = vector.extract_strided_slice %211 {offsets = [0, 0], sizes = [2, 32], strides = [1, 1]} : vector<2x128xf32> to vector<2x32xf32>
    %213 = arith.negf %212 : vector<2x32xf32>
    %214 = math.exp %213 : vector<2x32xf32>
    %cst_92 = arith.constant 1.000000e+00 : f32
    %215 = vector.broadcast %cst_92 : f32 to vector<2x32xf32>
    %216 = arith.addf %215, %214 : vector<2x32xf32>
    %217 = arith.divf %215, %216 : vector<2x32xf32>
    %218 = vector.extract_strided_slice %211 {offsets = [0, 32], sizes = [2, 32], strides = [1, 1]} : vector<2x128xf32> to vector<2x32xf32>
    %219 = arith.negf %218 : vector<2x32xf32>
    %220 = math.exp %219 : vector<2x32xf32>
    %cst_93 = arith.constant 1.000000e+00 : f32
    %221 = vector.broadcast %cst_93 : f32 to vector<2x32xf32>
    %222 = arith.addf %221, %220 : vector<2x32xf32>
    %223 = arith.divf %221, %222 : vector<2x32xf32>
    %224 = vector.extract_strided_slice %211 {offsets = [0, 64], sizes = [2, 32], strides = [1, 1]} : vector<2x128xf32> to vector<2x32xf32>
    %225 = math.tanh %224 : vector<2x32xf32>
    %226 = vector.extract_strided_slice %211 {offsets = [0, 96], sizes = [2, 32], strides = [1, 1]} : vector<2x128xf32> to vector<2x32xf32>
    %227 = arith.negf %226 : vector<2x32xf32>
    %228 = math.exp %227 : vector<2x32xf32>
    %cst_94 = arith.constant 1.000000e+00 : f32
    %229 = vector.broadcast %cst_94 : f32 to vector<2x32xf32>
    %230 = arith.addf %229, %228 : vector<2x32xf32>
    %231 = arith.divf %229, %230 : vector<2x32xf32>
    %232 = arith.mulf %223, %200 : vector<2x32xf32>
    %233 = arith.mulf %217, %225 : vector<2x32xf32>
    %234 = arith.addf %232, %233 : vector<2x32xf32>
    %235 = math.tanh %234 : vector<2x32xf32>
    %236 = arith.mulf %231, %235 : vector<2x32xf32>
    %237 = arith.index_cast %c4_i32 : i32 to index
    %c0_95 = arith.constant 0 : index
    %c0_96 = arith.constant 0 : index
    %238 = vector.load %arg8[%237, %c0_95, %c0_96] : memref<8x2x32xf32, #tpu.memory_space<vmem>>, vector<1x2x32xf32>
    %239 = vector.shape_cast %238 : vector<1x2x32xf32> to vector<2x32xf32>
    %240 = vector.shape_cast %236 : vector<2x32xf32> to vector<1x2x32xf32>
    tpu.vector_store %arg8[%237, %c0_95, %c0_96], %240 {strides = array<i32>} : memref<8x2x32xf32, #tpu.memory_space<vmem>>, vector<1x2x32xf32>,
    %c5_i32 = arith.constant 5 : i32
    %241 = arith.index_cast %c5_i32 : i32 to index
    %c0_97 = arith.constant 0 : index
    %c0_98 = arith.constant 0 : index
    %242 = vector.load %arg9[%241, %c0_97, %c0_98] : memref<8x2x128xf32, #tpu.memory_space<vmem>>, vector<1x2x128xf32>
    %243 = vector.shape_cast %242 : vector<1x2x128xf32> to vector<2x128xf32>
    %cst_99 = arith.constant dense<0.000000e+00> : vector<2x128xf32>
    %244 = tpu.matmul %236, %68, %cst_99 {dimension_numbers = #tpu.dot_dimension_numbers<[1], [0], [0], [1], [0, 0, 1, 1], [], []>} : vector<2x32xf32>, vector<32x128xf32>, vector<2x128xf32> -> vector<2x128xf32>
    %245 = arith.addf %243, %244 : vector<2x128xf32>
    %246 = vector.extract_strided_slice %245 {offsets = [0, 0], sizes = [2, 32], strides = [1, 1]} : vector<2x128xf32> to vector<2x32xf32>
    %247 = arith.negf %246 : vector<2x32xf32>
    %248 = math.exp %247 : vector<2x32xf32>
    %cst_100 = arith.constant 1.000000e+00 : f32
    %249 = vector.broadcast %cst_100 : f32 to vector<2x32xf32>
    %250 = arith.addf %249, %248 : vector<2x32xf32>
    %251 = arith.divf %249, %250 : vector<2x32xf32>
    %252 = vector.extract_strided_slice %245 {offsets = [0, 32], sizes = [2, 32], strides = [1, 1]} : vector<2x128xf32> to vector<2x32xf32>
    %253 = arith.negf %252 : vector<2x32xf32>
    %254 = math.exp %253 : vector<2x32xf32>
    %cst_101 = arith.constant 1.000000e+00 : f32
    %255 = vector.broadcast %cst_101 : f32 to vector<2x32xf32>
    %256 = arith.addf %255, %254 : vector<2x32xf32>
    %257 = arith.divf %255, %256 : vector<2x32xf32>
    %258 = vector.extract_strided_slice %245 {offsets = [0, 64], sizes = [2, 32], strides = [1, 1]} : vector<2x128xf32> to vector<2x32xf32>
    %259 = math.tanh %258 : vector<2x32xf32>
    %260 = vector.extract_strided_slice %245 {offsets = [0, 96], sizes = [2, 32], strides = [1, 1]} : vector<2x128xf32> to vector<2x32xf32>
    %261 = arith.negf %260 : vector<2x32xf32>
    %262 = math.exp %261 : vector<2x32xf32>
    %cst_102 = arith.constant 1.000000e+00 : f32
    %263 = vector.broadcast %cst_102 : f32 to vector<2x32xf32>
    %264 = arith.addf %263, %262 : vector<2x32xf32>
    %265 = arith.divf %263, %264 : vector<2x32xf32>
    %266 = arith.mulf %257, %234 : vector<2x32xf32>
    %267 = arith.mulf %251, %259 : vector<2x32xf32>
    %268 = arith.addf %266, %267 : vector<2x32xf32>
    %269 = math.tanh %268 : vector<2x32xf32>
    %270 = arith.mulf %265, %269 : vector<2x32xf32>
    %271 = arith.index_cast %c5_i32 : i32 to index
    %c0_103 = arith.constant 0 : index
    %c0_104 = arith.constant 0 : index
    %272 = vector.load %arg8[%271, %c0_103, %c0_104] : memref<8x2x32xf32, #tpu.memory_space<vmem>>, vector<1x2x32xf32>
    %273 = vector.shape_cast %272 : vector<1x2x32xf32> to vector<2x32xf32>
    %274 = vector.shape_cast %270 : vector<2x32xf32> to vector<1x2x32xf32>
    tpu.vector_store %arg8[%271, %c0_103, %c0_104], %274 {strides = array<i32>} : memref<8x2x32xf32, #tpu.memory_space<vmem>>, vector<1x2x32xf32>,
    %c6_i32 = arith.constant 6 : i32
    %275 = arith.index_cast %c6_i32 : i32 to index
    %c0_105 = arith.constant 0 : index
    %c0_106 = arith.constant 0 : index
    %276 = vector.load %arg9[%275, %c0_105, %c0_106] : memref<8x2x128xf32, #tpu.memory_space<vmem>>, vector<1x2x128xf32>
    %277 = vector.shape_cast %276 : vector<1x2x128xf32> to vector<2x128xf32>
    %cst_107 = arith.constant dense<0.000000e+00> : vector<2x128xf32>
    %278 = tpu.matmul %270, %68, %cst_107 {dimension_numbers = #tpu.dot_dimension_numbers<[1], [0], [0], [1], [0, 0, 1, 1], [], []>} : vector<2x32xf32>, vector<32x128xf32>, vector<2x128xf32> -> vector<2x128xf32>
    %279 = arith.addf %277, %278 : vector<2x128xf32>
    %280 = vector.extract_strided_slice %279 {offsets = [0, 0], sizes = [2, 32], strides = [1, 1]} : vector<2x128xf32> to vector<2x32xf32>
    %281 = arith.negf %280 : vector<2x32xf32>
    %282 = math.exp %281 : vector<2x32xf32>
    %cst_108 = arith.constant 1.000000e+00 : f32
    %283 = vector.broadcast %cst_108 : f32 to vector<2x32xf32>
    %284 = arith.addf %283, %282 : vector<2x32xf32>
    %285 = arith.divf %283, %284 : vector<2x32xf32>
    %286 = vector.extract_strided_slice %279 {offsets = [0, 32], sizes = [2, 32], strides = [1, 1]} : vector<2x128xf32> to vector<2x32xf32>
    %287 = arith.negf %286 : vector<2x32xf32>
    %288 = math.exp %287 : vector<2x32xf32>
    %cst_109 = arith.constant 1.000000e+00 : f32
    %289 = vector.broadcast %cst_109 : f32 to vector<2x32xf32>
    %290 = arith.addf %289, %288 : vector<2x32xf32>
    %291 = arith.divf %289, %290 : vector<2x32xf32>
    %292 = vector.extract_strided_slice %279 {offsets = [0, 64], sizes = [2, 32], strides = [1, 1]} : vector<2x128xf32> to vector<2x32xf32>
    %293 = math.tanh %292 : vector<2x32xf32>
    %294 = vector.extract_strided_slice %279 {offsets = [0, 96], sizes = [2, 32], strides = [1, 1]} : vector<2x128xf32> to vector<2x32xf32>
    %295 = arith.negf %294 : vector<2x32xf32>
    %296 = math.exp %295 : vector<2x32xf32>
    %cst_110 = arith.constant 1.000000e+00 : f32
    %297 = vector.broadcast %cst_110 : f32 to vector<2x32xf32>
    %298 = arith.addf %297, %296 : vector<2x32xf32>
    %299 = arith.divf %297, %298 : vector<2x32xf32>
    %300 = arith.mulf %291, %268 : vector<2x32xf32>
    %301 = arith.mulf %285, %293 : vector<2x32xf32>
    %302 = arith.addf %300, %301 : vector<2x32xf32>
    %303 = math.tanh %302 : vector<2x32xf32>
    %304 = arith.mulf %299, %303 : vector<2x32xf32>
    %305 = arith.index_cast %c6_i32 : i32 to index
    %c0_111 = arith.constant 0 : index
    %c0_112 = arith.constant 0 : index
    %306 = vector.load %arg8[%305, %c0_111, %c0_112] : memref<8x2x32xf32, #tpu.memory_space<vmem>>, vector<1x2x32xf32>
    %307 = vector.shape_cast %306 : vector<1x2x32xf32> to vector<2x32xf32>
    %308 = vector.shape_cast %304 : vector<2x32xf32> to vector<1x2x32xf32>
    tpu.vector_store %arg8[%305, %c0_111, %c0_112], %308 {strides = array<i32>} : memref<8x2x32xf32, #tpu.memory_space<vmem>>, vector<1x2x32xf32>,
    %c7_i32 = arith.constant 7 : i32
    %309 = arith.index_cast %c7_i32 : i32 to index
    %c0_113 = arith.constant 0 : index
    %c0_114 = arith.constant 0 : index
    %310 = vector.load %arg9[%309, %c0_113, %c0_114] : memref<8x2x128xf32, #tpu.memory_space<vmem>>, vector<1x2x128xf32>
    %311 = vector.shape_cast %310 : vector<1x2x128xf32> to vector<2x128xf32>
    %cst_115 = arith.constant dense<0.000000e+00> : vector<2x128xf32>
    %312 = tpu.matmul %304, %68, %cst_115 {dimension_numbers = #tpu.dot_dimension_numbers<[1], [0], [0], [1], [0, 0, 1, 1], [], []>} : vector<2x32xf32>, vector<32x128xf32>, vector<2x128xf32> -> vector<2x128xf32>
    %313 = arith.addf %311, %312 : vector<2x128xf32>
    %314 = vector.extract_strided_slice %313 {offsets = [0, 0], sizes = [2, 32], strides = [1, 1]} : vector<2x128xf32> to vector<2x32xf32>
    %315 = arith.negf %314 : vector<2x32xf32>
    %316 = math.exp %315 : vector<2x32xf32>
    %cst_116 = arith.constant 1.000000e+00 : f32
    %317 = vector.broadcast %cst_116 : f32 to vector<2x32xf32>
    %318 = arith.addf %317, %316 : vector<2x32xf32>
    %319 = arith.divf %317, %318 : vector<2x32xf32>
    %320 = vector.extract_strided_slice %313 {offsets = [0, 32], sizes = [2, 32], strides = [1, 1]} : vector<2x128xf32> to vector<2x32xf32>
    %321 = arith.negf %320 : vector<2x32xf32>
    %322 = math.exp %321 : vector<2x32xf32>
    %cst_117 = arith.constant 1.000000e+00 : f32
    %323 = vector.broadcast %cst_117 : f32 to vector<2x32xf32>
    %324 = arith.addf %323, %322 : vector<2x32xf32>
    %325 = arith.divf %323, %324 : vector<2x32xf32>
    %326 = vector.extract_strided_slice %313 {offsets = [0, 64], sizes = [2, 32], strides = [1, 1]} : vector<2x128xf32> to vector<2x32xf32>
    %327 = math.tanh %326 : vector<2x32xf32>
    %328 = vector.extract_strided_slice %313 {offsets = [0, 96], sizes = [2, 32], strides = [1, 1]} : vector<2x128xf32> to vector<2x32xf32>
    %329 = arith.negf %328 : vector<2x32xf32>
    %330 = math.exp %329 : vector<2x32xf32>
    %cst_118 = arith.constant 1.000000e+00 : f32
    %331 = vector.broadcast %cst_118 : f32 to vector<2x32xf32>
    %332 = arith.addf %331, %330 : vector<2x32xf32>
    %333 = arith.divf %331, %332 : vector<2x32xf32>
    %334 = arith.mulf %325, %302 : vector<2x32xf32>
    %335 = arith.mulf %319, %327 : vector<2x32xf32>
    %336 = arith.addf %334, %335 : vector<2x32xf32>
    %337 = math.tanh %336 : vector<2x32xf32>
    %338 = arith.mulf %333, %337 : vector<2x32xf32>
    %339 = arith.index_cast %c7_i32 : i32 to index
    %c0_119 = arith.constant 0 : index
    %c0_120 = arith.constant 0 : index
    %340 = vector.load %arg8[%339, %c0_119, %c0_120] : memref<8x2x32xf32, #tpu.memory_space<vmem>>, vector<1x2x32xf32>
    %341 = vector.shape_cast %340 : vector<1x2x32xf32> to vector<2x32xf32>
    %342 = vector.shape_cast %338 : vector<2x32xf32> to vector<1x2x32xf32>
    tpu.vector_store %arg8[%339, %c0_119, %c0_120], %342 {strides = array<i32>} : memref<8x2x32xf32, #tpu.memory_space<vmem>>, vector<1x2x32xf32>,
    %c8_i32 = arith.constant 8 : i32
    %c0_121 = arith.constant 0 : index
    %c0_122 = arith.constant 0 : index
    %c0_123 = arith.constant 0 : index
    %343 = vector.load %arg2[%c0_121, %c0_122, %c0_123] : memref<3x32x128xf32, #tpu.memory_space<vmem>>, vector<1x32x128xf32>
    %344 = vector.shape_cast %343 : vector<1x32x128xf32> to vector<32x128xf32>
    %c1_124 = arith.constant 1 : index
    %c0_125 = arith.constant 0 : index
    %c0_126 = arith.constant 0 : index
    %345 = vector.load %arg4[%c1_124, %c0_125, %c0_126] : memref<4x1x128xf32, #tpu.memory_space<vmem>>, vector<1x1x128xf32>
    %346 = vector.shape_cast %345 : vector<1x1x128xf32> to vector<1x128xf32>
    %c0_127 = arith.constant 0 : index
    %c0_128 = arith.constant 0 : index
    %c0_129 = arith.constant 0 : index
    %347 = vector.load %arg8[%c0_127, %c0_128, %c0_129] : memref<8x2x32xf32, #tpu.memory_space<vmem>>, vector<1x2x32xf32>
    %348 = vector.shape_cast %347 : vector<1x2x32xf32> to vector<2x32xf32>
    %cst_130 = arith.constant dense<0.000000e+00> : vector<2x128xf32>
    %349 = tpu.matmul %348, %344, %cst_130 {dimension_numbers = #tpu.dot_dimension_numbers<[1], [0], [0], [1], [0, 0, 1, 1], [], []>} : vector<2x32xf32>, vector<32x128xf32>, vector<2x128xf32> -> vector<2x128xf32>
    %350 = vector.broadcast %346 : vector<1x128xf32> to vector<2x128xf32>
    %351 = arith.addf %349, %350 : vector<2x128xf32>
    %c0_131 = arith.constant 0 : index
    %c0_132 = arith.constant 0 : index
    %c0_133 = arith.constant 0 : index
    %352 = vector.load %arg9[%c0_131, %c0_132, %c0_133] : memref<8x2x128xf32, #tpu.memory_space<vmem>>, vector<1x2x128xf32>
    %353 = vector.shape_cast %352 : vector<1x2x128xf32> to vector<2x128xf32>
    %354 = vector.shape_cast %351 : vector<2x128xf32> to vector<1x2x128xf32>
    tpu.vector_store %arg9[%c0_131, %c0_132, %c0_133], %354 {strides = array<i32>} : memref<8x2x128xf32, #tpu.memory_space<vmem>>, vector<1x2x128xf32>,
    %c1_134 = arith.constant 1 : index
    %c0_135 = arith.constant 0 : index
    %c0_136 = arith.constant 0 : index
    %355 = vector.load %arg8[%c1_134, %c0_135, %c0_136] : memref<8x2x32xf32, #tpu.memory_space<vmem>>, vector<1x2x32xf32>
    %356 = vector.shape_cast %355 : vector<1x2x32xf32> to vector<2x32xf32>
    %cst_137 = arith.constant dense<0.000000e+00> : vector<2x128xf32>
    %357 = tpu.matmul %356, %344, %cst_137 {dimension_numbers = #tpu.dot_dimension_numbers<[1], [0], [0], [1], [0, 0, 1, 1], [], []>} : vector<2x32xf32>, vector<32x128xf32>, vector<2x128xf32> -> vector<2x128xf32>
    %358 = vector.broadcast %346 : vector<1x128xf32> to vector<2x128xf32>
    %359 = arith.addf %357, %358 : vector<2x128xf32>
    %c1_138 = arith.constant 1 : index
    %c0_139 = arith.constant 0 : index
    %c0_140 = arith.constant 0 : index
    %360 = vector.load %arg9[%c1_138, %c0_139, %c0_140] : memref<8x2x128xf32, #tpu.memory_space<vmem>>, vector<1x2x128xf32>
    %361 = vector.shape_cast %360 : vector<1x2x128xf32> to vector<2x128xf32>
    %362 = vector.shape_cast %359 : vector<2x128xf32> to vector<1x2x128xf32>
    tpu.vector_store %arg9[%c1_138, %c0_139, %c0_140], %362 {strides = array<i32>} : memref<8x2x128xf32, #tpu.memory_space<vmem>>, vector<1x2x128xf32>,
    %c2_141 = arith.constant 2 : index
    %c0_142 = arith.constant 0 : index
    %c0_143 = arith.constant 0 : index
    %363 = vector.load %arg8[%c2_141, %c0_142, %c0_143] : memref<8x2x32xf32, #tpu.memory_space<vmem>>, vector<1x2x32xf32>
    %364 = vector.shape_cast %363 : vector<1x2x32xf32> to vector<2x32xf32>
    %cst_144 = arith.constant dense<0.000000e+00> : vector<2x128xf32>
    %365 = tpu.matmul %364, %344, %cst_144 {dimension_numbers = #tpu.dot_dimension_numbers<[1], [0], [0], [1], [0, 0, 1, 1], [], []>} : vector<2x32xf32>, vector<32x128xf32>, vector<2x128xf32> -> vector<2x128xf32>
    %366 = vector.broadcast %346 : vector<1x128xf32> to vector<2x128xf32>
    %367 = arith.addf %365, %366 : vector<2x128xf32>
    %c2_145 = arith.constant 2 : index
    %c0_146 = arith.constant 0 : index
    %c0_147 = arith.constant 0 : index
    %368 = vector.load %arg9[%c2_145, %c0_146, %c0_147] : memref<8x2x128xf32, #tpu.memory_space<vmem>>, vector<1x2x128xf32>
    %369 = vector.shape_cast %368 : vector<1x2x128xf32> to vector<2x128xf32>
    %370 = vector.shape_cast %367 : vector<2x128xf32> to vector<1x2x128xf32>
    tpu.vector_store %arg9[%c2_145, %c0_146, %c0_147], %370 {strides = array<i32>} : memref<8x2x128xf32, #tpu.memory_space<vmem>>, vector<1x2x128xf32>,
    %c3_148 = arith.constant 3 : index
    %c0_149 = arith.constant 0 : index
    %c0_150 = arith.constant 0 : index
    %371 = vector.load %arg8[%c3_148, %c0_149, %c0_150] : memref<8x2x32xf32, #tpu.memory_space<vmem>>, vector<1x2x32xf32>
    %372 = vector.shape_cast %371 : vector<1x2x32xf32> to vector<2x32xf32>
    %cst_151 = arith.constant dense<0.000000e+00> : vector<2x128xf32>
    %373 = tpu.matmul %372, %344, %cst_151 {dimension_numbers = #tpu.dot_dimension_numbers<[1], [0], [0], [1], [0, 0, 1, 1], [], []>} : vector<2x32xf32>, vector<32x128xf32>, vector<2x128xf32> -> vector<2x128xf32>
    %374 = vector.broadcast %346 : vector<1x128xf32> to vector<2x128xf32>
    %375 = arith.addf %373, %374 : vector<2x128xf32>
    %c3_152 = arith.constant 3 : index
    %c0_153 = arith.constant 0 : index
    %c0_154 = arith.constant 0 : index
    %376 = vector.load %arg9[%c3_152, %c0_153, %c0_154] : memref<8x2x128xf32, #tpu.memory_space<vmem>>, vector<1x2x128xf32>
    %377 = vector.shape_cast %376 : vector<1x2x128xf32> to vector<2x128xf32>
    %378 = vector.shape_cast %375 : vector<2x128xf32> to vector<1x2x128xf32>
    tpu.vector_store %arg9[%c3_152, %c0_153, %c0_154], %378 {strides = array<i32>} : memref<8x2x128xf32, #tpu.memory_space<vmem>>, vector<1x2x128xf32>,
    %c4_155 = arith.constant 4 : index
    %c0_156 = arith.constant 0 : index
    %c0_157 = arith.constant 0 : index
    %379 = vector.load %arg8[%c4_155, %c0_156, %c0_157] : memref<8x2x32xf32, #tpu.memory_space<vmem>>, vector<1x2x32xf32>
    %380 = vector.shape_cast %379 : vector<1x2x32xf32> to vector<2x32xf32>
    %cst_158 = arith.constant dense<0.000000e+00> : vector<2x128xf32>
    %381 = tpu.matmul %380, %344, %cst_158 {dimension_numbers = #tpu.dot_dimension_numbers<[1], [0], [0], [1], [0, 0, 1, 1], [], []>} : vector<2x32xf32>, vector<32x128xf32>, vector<2x128xf32> -> vector<2x128xf32>
    %382 = vector.broadcast %346 : vector<1x128xf32> to vector<2x128xf32>
    %383 = arith.addf %381, %382 : vector<2x128xf32>
    %c4_159 = arith.constant 4 : index
    %c0_160 = arith.constant 0 : index
    %c0_161 = arith.constant 0 : index
    %384 = vector.load %arg9[%c4_159, %c0_160, %c0_161] : memref<8x2x128xf32, #tpu.memory_space<vmem>>, vector<1x2x128xf32>
    %385 = vector.shape_cast %384 : vector<1x2x128xf32> to vector<2x128xf32>
    %386 = vector.shape_cast %383 : vector<2x128xf32> to vector<1x2x128xf32>
    tpu.vector_store %arg9[%c4_159, %c0_160, %c0_161], %386 {strides = array<i32>} : memref<8x2x128xf32, #tpu.memory_space<vmem>>, vector<1x2x128xf32>,
    %c5_162 = arith.constant 5 : index
    %c0_163 = arith.constant 0 : index
    %c0_164 = arith.constant 0 : index
    %387 = vector.load %arg8[%c5_162, %c0_163, %c0_164] : memref<8x2x32xf32, #tpu.memory_space<vmem>>, vector<1x2x32xf32>
    %388 = vector.shape_cast %387 : vector<1x2x32xf32> to vector<2x32xf32>
    %cst_165 = arith.constant dense<0.000000e+00> : vector<2x128xf32>
    %389 = tpu.matmul %388, %344, %cst_165 {dimension_numbers = #tpu.dot_dimension_numbers<[1], [0], [0], [1], [0, 0, 1, 1], [], []>} : vector<2x32xf32>, vector<32x128xf32>, vector<2x128xf32> -> vector<2x128xf32>
    %390 = vector.broadcast %346 : vector<1x128xf32> to vector<2x128xf32>
    %391 = arith.addf %389, %390 : vector<2x128xf32>
    %c5_166 = arith.constant 5 : index
    %c0_167 = arith.constant 0 : index
    %c0_168 = arith.constant 0 : index
    %392 = vector.load %arg9[%c5_166, %c0_167, %c0_168] : memref<8x2x128xf32, #tpu.memory_space<vmem>>, vector<1x2x128xf32>
    %393 = vector.shape_cast %392 : vector<1x2x128xf32> to vector<2x128xf32>
    %394 = vector.shape_cast %391 : vector<2x128xf32> to vector<1x2x128xf32>
    tpu.vector_store %arg9[%c5_166, %c0_167, %c0_168], %394 {strides = array<i32>} : memref<8x2x128xf32, #tpu.memory_space<vmem>>, vector<1x2x128xf32>,
    %c6_169 = arith.constant 6 : index
    %c0_170 = arith.constant 0 : index
    %c0_171 = arith.constant 0 : index
    %395 = vector.load %arg8[%c6_169, %c0_170, %c0_171] : memref<8x2x32xf32, #tpu.memory_space<vmem>>, vector<1x2x32xf32>
    %396 = vector.shape_cast %395 : vector<1x2x32xf32> to vector<2x32xf32>
    %cst_172 = arith.constant dense<0.000000e+00> : vector<2x128xf32>
    %397 = tpu.matmul %396, %344, %cst_172 {dimension_numbers = #tpu.dot_dimension_numbers<[1], [0], [0], [1], [0, 0, 1, 1], [], []>} : vector<2x32xf32>, vector<32x128xf32>, vector<2x128xf32> -> vector<2x128xf32>
    %398 = vector.broadcast %346 : vector<1x128xf32> to vector<2x128xf32>
    %399 = arith.addf %397, %398 : vector<2x128xf32>
    %c6_173 = arith.constant 6 : index
    %c0_174 = arith.constant 0 : index
    %c0_175 = arith.constant 0 : index
    %400 = vector.load %arg9[%c6_173, %c0_174, %c0_175] : memref<8x2x128xf32, #tpu.memory_space<vmem>>, vector<1x2x128xf32>
    %401 = vector.shape_cast %400 : vector<1x2x128xf32> to vector<2x128xf32>
    %402 = vector.shape_cast %399 : vector<2x128xf32> to vector<1x2x128xf32>
    tpu.vector_store %arg9[%c6_173, %c0_174, %c0_175], %402 {strides = array<i32>} : memref<8x2x128xf32, #tpu.memory_space<vmem>>, vector<1x2x128xf32>,
    %c7_176 = arith.constant 7 : index
    %c0_177 = arith.constant 0 : index
    %c0_178 = arith.constant 0 : index
    %403 = vector.load %arg8[%c7_176, %c0_177, %c0_178] : memref<8x2x32xf32, #tpu.memory_space<vmem>>, vector<1x2x32xf32>
    %404 = vector.shape_cast %403 : vector<1x2x32xf32> to vector<2x32xf32>
    %cst_179 = arith.constant dense<0.000000e+00> : vector<2x128xf32>
    %405 = tpu.matmul %404, %344, %cst_179 {dimension_numbers = #tpu.dot_dimension_numbers<[1], [0], [0], [1], [0, 0, 1, 1], [], []>} : vector<2x32xf32>, vector<32x128xf32>, vector<2x128xf32> -> vector<2x128xf32>
    %406 = vector.broadcast %346 : vector<1x128xf32> to vector<2x128xf32>
    %407 = arith.addf %405, %406 : vector<2x128xf32>
    %c7_180 = arith.constant 7 : index
    %c0_181 = arith.constant 0 : index
    %c0_182 = arith.constant 0 : index
    %408 = vector.load %arg9[%c7_180, %c0_181, %c0_182] : memref<8x2x128xf32, #tpu.memory_space<vmem>>, vector<1x2x128xf32>
    %409 = vector.shape_cast %408 : vector<1x2x128xf32> to vector<2x128xf32>
    %410 = vector.shape_cast %407 : vector<2x128xf32> to vector<1x2x128xf32>
    tpu.vector_store %arg9[%c7_180, %c0_181, %c0_182], %410 {strides = array<i32>} : memref<8x2x128xf32, #tpu.memory_space<vmem>>, vector<1x2x128xf32>,
    %c1_183 = arith.constant 1 : index
    %c0_184 = arith.constant 0 : index
    %c0_185 = arith.constant 0 : index
    %411 = vector.load %arg3[%c1_183, %c0_184, %c0_185] : memref<4x32x128xf32, #tpu.memory_space<vmem>>, vector<1x32x128xf32>
    %412 = vector.shape_cast %411 : vector<1x32x128xf32> to vector<32x128xf32>
    %cst_186 = arith.constant 0.000000e+00 : f32
    %413 = vector.broadcast %cst_186 : f32 to vector<2x32xf32>
    %cst_187 = arith.constant 0.000000e+00 : f32
    %414 = vector.broadcast %cst_187 : f32 to vector<2x32xf32>
    %c0_i32_188 = arith.constant 0 : i32
    %415 = arith.index_cast %c0_i32_188 : i32 to index
    %c0_189 = arith.constant 0 : index
    %c0_190 = arith.constant 0 : index
    %416 = vector.load %arg9[%415, %c0_189, %c0_190] : memref<8x2x128xf32, #tpu.memory_space<vmem>>, vector<1x2x128xf32>
    %417 = vector.shape_cast %416 : vector<1x2x128xf32> to vector<2x128xf32>
    %cst_191 = arith.constant dense<0.000000e+00> : vector<2x128xf32>
    %418 = tpu.matmul %413, %412, %cst_191 {dimension_numbers = #tpu.dot_dimension_numbers<[1], [0], [0], [1], [0, 0, 1, 1], [], []>} : vector<2x32xf32>, vector<32x128xf32>, vector<2x128xf32> -> vector<2x128xf32>
    %419 = arith.addf %417, %418 : vector<2x128xf32>
    %420 = vector.extract_strided_slice %419 {offsets = [0, 0], sizes = [2, 32], strides = [1, 1]} : vector<2x128xf32> to vector<2x32xf32>
    %421 = arith.negf %420 : vector<2x32xf32>
    %422 = math.exp %421 : vector<2x32xf32>
    %cst_192 = arith.constant 1.000000e+00 : f32
    %423 = vector.broadcast %cst_192 : f32 to vector<2x32xf32>
    %424 = arith.addf %423, %422 : vector<2x32xf32>
    %425 = arith.divf %423, %424 : vector<2x32xf32>
    %426 = vector.extract_strided_slice %419 {offsets = [0, 32], sizes = [2, 32], strides = [1, 1]} : vector<2x128xf32> to vector<2x32xf32>
    %427 = arith.negf %426 : vector<2x32xf32>
    %428 = math.exp %427 : vector<2x32xf32>
    %cst_193 = arith.constant 1.000000e+00 : f32
    %429 = vector.broadcast %cst_193 : f32 to vector<2x32xf32>
    %430 = arith.addf %429, %428 : vector<2x32xf32>
    %431 = arith.divf %429, %430 : vector<2x32xf32>
    %432 = vector.extract_strided_slice %419 {offsets = [0, 64], sizes = [2, 32], strides = [1, 1]} : vector<2x128xf32> to vector<2x32xf32>
    %433 = math.tanh %432 : vector<2x32xf32>
    %434 = vector.extract_strided_slice %419 {offsets = [0, 96], sizes = [2, 32], strides = [1, 1]} : vector<2x128xf32> to vector<2x32xf32>
    %435 = arith.negf %434 : vector<2x32xf32>
    %436 = math.exp %435 : vector<2x32xf32>
    %cst_194 = arith.constant 1.000000e+00 : f32
    %437 = vector.broadcast %cst_194 : f32 to vector<2x32xf32>
    %438 = arith.addf %437, %436 : vector<2x32xf32>
    %439 = arith.divf %437, %438 : vector<2x32xf32>
    %440 = arith.mulf %431, %414 : vector<2x32xf32>
    %441 = arith.mulf %425, %433 : vector<2x32xf32>
    %442 = arith.addf %440, %441 : vector<2x32xf32>
    %443 = math.tanh %442 : vector<2x32xf32>
    %444 = arith.mulf %439, %443 : vector<2x32xf32>
    %445 = arith.index_cast %c0_i32_188 : i32 to index
    %c0_195 = arith.constant 0 : index
    %c0_196 = arith.constant 0 : index
    %446 = vector.load %arg8[%445, %c0_195, %c0_196] : memref<8x2x32xf32, #tpu.memory_space<vmem>>, vector<1x2x32xf32>
    %447 = vector.shape_cast %446 : vector<1x2x32xf32> to vector<2x32xf32>
    %448 = vector.shape_cast %444 : vector<2x32xf32> to vector<1x2x32xf32>
    tpu.vector_store %arg8[%445, %c0_195, %c0_196], %448 {strides = array<i32>} : memref<8x2x32xf32, #tpu.memory_space<vmem>>, vector<1x2x32xf32>,
    %c1_i32_197 = arith.constant 1 : i32
    %449 = arith.index_cast %c1_i32_197 : i32 to index
    %c0_198 = arith.constant 0 : index
    %c0_199 = arith.constant 0 : index
    %450 = vector.load %arg9[%449, %c0_198, %c0_199] : memref<8x2x128xf32, #tpu.memory_space<vmem>>, vector<1x2x128xf32>
    %451 = vector.shape_cast %450 : vector<1x2x128xf32> to vector<2x128xf32>
    %cst_200 = arith.constant dense<0.000000e+00> : vector<2x128xf32>
    %452 = tpu.matmul %444, %412, %cst_200 {dimension_numbers = #tpu.dot_dimension_numbers<[1], [0], [0], [1], [0, 0, 1, 1], [], []>} : vector<2x32xf32>, vector<32x128xf32>, vector<2x128xf32> -> vector<2x128xf32>
    %453 = arith.addf %451, %452 : vector<2x128xf32>
    %454 = vector.extract_strided_slice %453 {offsets = [0, 0], sizes = [2, 32], strides = [1, 1]} : vector<2x128xf32> to vector<2x32xf32>
    %455 = arith.negf %454 : vector<2x32xf32>
    %456 = math.exp %455 : vector<2x32xf32>
    %cst_201 = arith.constant 1.000000e+00 : f32
    %457 = vector.broadcast %cst_201 : f32 to vector<2x32xf32>
    %458 = arith.addf %457, %456 : vector<2x32xf32>
    %459 = arith.divf %457, %458 : vector<2x32xf32>
    %460 = vector.extract_strided_slice %453 {offsets = [0, 32], sizes = [2, 32], strides = [1, 1]} : vector<2x128xf32> to vector<2x32xf32>
    %461 = arith.negf %460 : vector<2x32xf32>
    %462 = math.exp %461 : vector<2x32xf32>
    %cst_202 = arith.constant 1.000000e+00 : f32
    %463 = vector.broadcast %cst_202 : f32 to vector<2x32xf32>
    %464 = arith.addf %463, %462 : vector<2x32xf32>
    %465 = arith.divf %463, %464 : vector<2x32xf32>
    %466 = vector.extract_strided_slice %453 {offsets = [0, 64], sizes = [2, 32], strides = [1, 1]} : vector<2x128xf32> to vector<2x32xf32>
    %467 = math.tanh %466 : vector<2x32xf32>
    %468 = vector.extract_strided_slice %453 {offsets = [0, 96], sizes = [2, 32], strides = [1, 1]} : vector<2x128xf32> to vector<2x32xf32>
    %469 = arith.negf %468 : vector<2x32xf32>
    %470 = math.exp %469 : vector<2x32xf32>
    %cst_203 = arith.constant 1.000000e+00 : f32
    %471 = vector.broadcast %cst_203 : f32 to vector<2x32xf32>
    %472 = arith.addf %471, %470 : vector<2x32xf32>
    %473 = arith.divf %471, %472 : vector<2x32xf32>
    %474 = arith.mulf %465, %442 : vector<2x32xf32>
    %475 = arith.mulf %459, %467 : vector<2x32xf32>
    %476 = arith.addf %474, %475 : vector<2x32xf32>
    %477 = math.tanh %476 : vector<2x32xf32>
    %478 = arith.mulf %473, %477 : vector<2x32xf32>
    %479 = arith.index_cast %c1_i32_197 : i32 to index
    %c0_204 = arith.constant 0 : index
    %c0_205 = arith.constant 0 : index
    %480 = vector.load %arg8[%479, %c0_204, %c0_205] : memref<8x2x32xf32, #tpu.memory_space<vmem>>, vector<1x2x32xf32>
    %481 = vector.shape_cast %480 : vector<1x2x32xf32> to vector<2x32xf32>
    %482 = vector.shape_cast %478 : vector<2x32xf32> to vector<1x2x32xf32>
    tpu.vector_store %arg8[%479, %c0_204, %c0_205], %482 {strides = array<i32>} : memref<8x2x32xf32, #tpu.memory_space<vmem>>, vector<1x2x32xf32>,
    %c2_i32_206 = arith.constant 2 : i32
    %483 = arith.index_cast %c2_i32_206 : i32 to index
    %c0_207 = arith.constant 0 : index
    %c0_208 = arith.constant 0 : index
    %484 = vector.load %arg9[%483, %c0_207, %c0_208] : memref<8x2x128xf32, #tpu.memory_space<vmem>>, vector<1x2x128xf32>
    %485 = vector.shape_cast %484 : vector<1x2x128xf32> to vector<2x128xf32>
    %cst_209 = arith.constant dense<0.000000e+00> : vector<2x128xf32>
    %486 = tpu.matmul %478, %412, %cst_209 {dimension_numbers = #tpu.dot_dimension_numbers<[1], [0], [0], [1], [0, 0, 1, 1], [], []>} : vector<2x32xf32>, vector<32x128xf32>, vector<2x128xf32> -> vector<2x128xf32>
    %487 = arith.addf %485, %486 : vector<2x128xf32>
    %488 = vector.extract_strided_slice %487 {offsets = [0, 0], sizes = [2, 32], strides = [1, 1]} : vector<2x128xf32> to vector<2x32xf32>
    %489 = arith.negf %488 : vector<2x32xf32>
    %490 = math.exp %489 : vector<2x32xf32>
    %cst_210 = arith.constant 1.000000e+00 : f32
    %491 = vector.broadcast %cst_210 : f32 to vector<2x32xf32>
    %492 = arith.addf %491, %490 : vector<2x32xf32>
    %493 = arith.divf %491, %492 : vector<2x32xf32>
    %494 = vector.extract_strided_slice %487 {offsets = [0, 32], sizes = [2, 32], strides = [1, 1]} : vector<2x128xf32> to vector<2x32xf32>
    %495 = arith.negf %494 : vector<2x32xf32>
    %496 = math.exp %495 : vector<2x32xf32>
    %cst_211 = arith.constant 1.000000e+00 : f32
    %497 = vector.broadcast %cst_211 : f32 to vector<2x32xf32>
    %498 = arith.addf %497, %496 : vector<2x32xf32>
    %499 = arith.divf %497, %498 : vector<2x32xf32>
    %500 = vector.extract_strided_slice %487 {offsets = [0, 64], sizes = [2, 32], strides = [1, 1]} : vector<2x128xf32> to vector<2x32xf32>
    %501 = math.tanh %500 : vector<2x32xf32>
    %502 = vector.extract_strided_slice %487 {offsets = [0, 96], sizes = [2, 32], strides = [1, 1]} : vector<2x128xf32> to vector<2x32xf32>
    %503 = arith.negf %502 : vector<2x32xf32>
    %504 = math.exp %503 : vector<2x32xf32>
    %cst_212 = arith.constant 1.000000e+00 : f32
    %505 = vector.broadcast %cst_212 : f32 to vector<2x32xf32>
    %506 = arith.addf %505, %504 : vector<2x32xf32>
    %507 = arith.divf %505, %506 : vector<2x32xf32>
    %508 = arith.mulf %499, %476 : vector<2x32xf32>
    %509 = arith.mulf %493, %501 : vector<2x32xf32>
    %510 = arith.addf %508, %509 : vector<2x32xf32>
    %511 = math.tanh %510 : vector<2x32xf32>
    %512 = arith.mulf %507, %511 : vector<2x32xf32>
    %513 = arith.index_cast %c2_i32_206 : i32 to index
    %c0_213 = arith.constant 0 : index
    %c0_214 = arith.constant 0 : index
    %514 = vector.load %arg8[%513, %c0_213, %c0_214] : memref<8x2x32xf32, #tpu.memory_space<vmem>>, vector<1x2x32xf32>
    %515 = vector.shape_cast %514 : vector<1x2x32xf32> to vector<2x32xf32>
    %516 = vector.shape_cast %512 : vector<2x32xf32> to vector<1x2x32xf32>
    tpu.vector_store %arg8[%513, %c0_213, %c0_214], %516 {strides = array<i32>} : memref<8x2x32xf32, #tpu.memory_space<vmem>>, vector<1x2x32xf32>,
    %c3_i32_215 = arith.constant 3 : i32
    %517 = arith.index_cast %c3_i32_215 : i32 to index
    %c0_216 = arith.constant 0 : index
    %c0_217 = arith.constant 0 : index
    %518 = vector.load %arg9[%517, %c0_216, %c0_217] : memref<8x2x128xf32, #tpu.memory_space<vmem>>, vector<1x2x128xf32>
    %519 = vector.shape_cast %518 : vector<1x2x128xf32> to vector<2x128xf32>
    %cst_218 = arith.constant dense<0.000000e+00> : vector<2x128xf32>
    %520 = tpu.matmul %512, %412, %cst_218 {dimension_numbers = #tpu.dot_dimension_numbers<[1], [0], [0], [1], [0, 0, 1, 1], [], []>} : vector<2x32xf32>, vector<32x128xf32>, vector<2x128xf32> -> vector<2x128xf32>
    %521 = arith.addf %519, %520 : vector<2x128xf32>
    %522 = vector.extract_strided_slice %521 {offsets = [0, 0], sizes = [2, 32], strides = [1, 1]} : vector<2x128xf32> to vector<2x32xf32>
    %523 = arith.negf %522 : vector<2x32xf32>
    %524 = math.exp %523 : vector<2x32xf32>
    %cst_219 = arith.constant 1.000000e+00 : f32
    %525 = vector.broadcast %cst_219 : f32 to vector<2x32xf32>
    %526 = arith.addf %525, %524 : vector<2x32xf32>
    %527 = arith.divf %525, %526 : vector<2x32xf32>
    %528 = vector.extract_strided_slice %521 {offsets = [0, 32], sizes = [2, 32], strides = [1, 1]} : vector<2x128xf32> to vector<2x32xf32>
    %529 = arith.negf %528 : vector<2x32xf32>
    %530 = math.exp %529 : vector<2x32xf32>
    %cst_220 = arith.constant 1.000000e+00 : f32
    %531 = vector.broadcast %cst_220 : f32 to vector<2x32xf32>
    %532 = arith.addf %531, %530 : vector<2x32xf32>
    %533 = arith.divf %531, %532 : vector<2x32xf32>
    %534 = vector.extract_strided_slice %521 {offsets = [0, 64], sizes = [2, 32], strides = [1, 1]} : vector<2x128xf32> to vector<2x32xf32>
    %535 = math.tanh %534 : vector<2x32xf32>
    %536 = vector.extract_strided_slice %521 {offsets = [0, 96], sizes = [2, 32], strides = [1, 1]} : vector<2x128xf32> to vector<2x32xf32>
    %537 = arith.negf %536 : vector<2x32xf32>
    %538 = math.exp %537 : vector<2x32xf32>
    %cst_221 = arith.constant 1.000000e+00 : f32
    %539 = vector.broadcast %cst_221 : f32 to vector<2x32xf32>
    %540 = arith.addf %539, %538 : vector<2x32xf32>
    %541 = arith.divf %539, %540 : vector<2x32xf32>
    %542 = arith.mulf %533, %510 : vector<2x32xf32>
    %543 = arith.mulf %527, %535 : vector<2x32xf32>
    %544 = arith.addf %542, %543 : vector<2x32xf32>
    %545 = math.tanh %544 : vector<2x32xf32>
    %546 = arith.mulf %541, %545 : vector<2x32xf32>
    %547 = arith.index_cast %c3_i32_215 : i32 to index
    %c0_222 = arith.constant 0 : index
    %c0_223 = arith.constant 0 : index
    %548 = vector.load %arg8[%547, %c0_222, %c0_223] : memref<8x2x32xf32, #tpu.memory_space<vmem>>, vector<1x2x32xf32>
    %549 = vector.shape_cast %548 : vector<1x2x32xf32> to vector<2x32xf32>
    %550 = vector.shape_cast %546 : vector<2x32xf32> to vector<1x2x32xf32>
    tpu.vector_store %arg8[%547, %c0_222, %c0_223], %550 {strides = array<i32>} : memref<8x2x32xf32, #tpu.memory_space<vmem>>, vector<1x2x32xf32>,
    %c4_i32_224 = arith.constant 4 : i32
    %551 = arith.index_cast %c4_i32_224 : i32 to index
    %c0_225 = arith.constant 0 : index
    %c0_226 = arith.constant 0 : index
    %552 = vector.load %arg9[%551, %c0_225, %c0_226] : memref<8x2x128xf32, #tpu.memory_space<vmem>>, vector<1x2x128xf32>
    %553 = vector.shape_cast %552 : vector<1x2x128xf32> to vector<2x128xf32>
    %cst_227 = arith.constant dense<0.000000e+00> : vector<2x128xf32>
    %554 = tpu.matmul %546, %412, %cst_227 {dimension_numbers = #tpu.dot_dimension_numbers<[1], [0], [0], [1], [0, 0, 1, 1], [], []>} : vector<2x32xf32>, vector<32x128xf32>, vector<2x128xf32> -> vector<2x128xf32>
    %555 = arith.addf %553, %554 : vector<2x128xf32>
    %556 = vector.extract_strided_slice %555 {offsets = [0, 0], sizes = [2, 32], strides = [1, 1]} : vector<2x128xf32> to vector<2x32xf32>
    %557 = arith.negf %556 : vector<2x32xf32>
    %558 = math.exp %557 : vector<2x32xf32>
    %cst_228 = arith.constant 1.000000e+00 : f32
    %559 = vector.broadcast %cst_228 : f32 to vector<2x32xf32>
    %560 = arith.addf %559, %558 : vector<2x32xf32>
    %561 = arith.divf %559, %560 : vector<2x32xf32>
    %562 = vector.extract_strided_slice %555 {offsets = [0, 32], sizes = [2, 32], strides = [1, 1]} : vector<2x128xf32> to vector<2x32xf32>
    %563 = arith.negf %562 : vector<2x32xf32>
    %564 = math.exp %563 : vector<2x32xf32>
    %cst_229 = arith.constant 1.000000e+00 : f32
    %565 = vector.broadcast %cst_229 : f32 to vector<2x32xf32>
    %566 = arith.addf %565, %564 : vector<2x32xf32>
    %567 = arith.divf %565, %566 : vector<2x32xf32>
    %568 = vector.extract_strided_slice %555 {offsets = [0, 64], sizes = [2, 32], strides = [1, 1]} : vector<2x128xf32> to vector<2x32xf32>
    %569 = math.tanh %568 : vector<2x32xf32>
    %570 = vector.extract_strided_slice %555 {offsets = [0, 96], sizes = [2, 32], strides = [1, 1]} : vector<2x128xf32> to vector<2x32xf32>
    %571 = arith.negf %570 : vector<2x32xf32>
    %572 = math.exp %571 : vector<2x32xf32>
    %cst_230 = arith.constant 1.000000e+00 : f32
    %573 = vector.broadcast %cst_230 : f32 to vector<2x32xf32>
    %574 = arith.addf %573, %572 : vector<2x32xf32>
    %575 = arith.divf %573, %574 : vector<2x32xf32>
    %576 = arith.mulf %567, %544 : vector<2x32xf32>
    %577 = arith.mulf %561, %569 : vector<2x32xf32>
    %578 = arith.addf %576, %577 : vector<2x32xf32>
    %579 = math.tanh %578 : vector<2x32xf32>
    %580 = arith.mulf %575, %579 : vector<2x32xf32>
    %581 = arith.index_cast %c4_i32_224 : i32 to index
    %c0_231 = arith.constant 0 : index
    %c0_232 = arith.constant 0 : index
    %582 = vector.load %arg8[%581, %c0_231, %c0_232] : memref<8x2x32xf32, #tpu.memory_space<vmem>>, vector<1x2x32xf32>
    %583 = vector.shape_cast %582 : vector<1x2x32xf32> to vector<2x32xf32>
    %584 = vector.shape_cast %580 : vector<2x32xf32> to vector<1x2x32xf32>
    tpu.vector_store %arg8[%581, %c0_231, %c0_232], %584 {strides = array<i32>} : memref<8x2x32xf32, #tpu.memory_space<vmem>>, vector<1x2x32xf32>,
    %c5_i32_233 = arith.constant 5 : i32
    %585 = arith.index_cast %c5_i32_233 : i32 to index
    %c0_234 = arith.constant 0 : index
    %c0_235 = arith.constant 0 : index
    %586 = vector.load %arg9[%585, %c0_234, %c0_235] : memref<8x2x128xf32, #tpu.memory_space<vmem>>, vector<1x2x128xf32>
    %587 = vector.shape_cast %586 : vector<1x2x128xf32> to vector<2x128xf32>
    %cst_236 = arith.constant dense<0.000000e+00> : vector<2x128xf32>
    %588 = tpu.matmul %580, %412, %cst_236 {dimension_numbers = #tpu.dot_dimension_numbers<[1], [0], [0], [1], [0, 0, 1, 1], [], []>} : vector<2x32xf32>, vector<32x128xf32>, vector<2x128xf32> -> vector<2x128xf32>
    %589 = arith.addf %587, %588 : vector<2x128xf32>
    %590 = vector.extract_strided_slice %589 {offsets = [0, 0], sizes = [2, 32], strides = [1, 1]} : vector<2x128xf32> to vector<2x32xf32>
    %591 = arith.negf %590 : vector<2x32xf32>
    %592 = math.exp %591 : vector<2x32xf32>
    %cst_237 = arith.constant 1.000000e+00 : f32
    %593 = vector.broadcast %cst_237 : f32 to vector<2x32xf32>
    %594 = arith.addf %593, %592 : vector<2x32xf32>
    %595 = arith.divf %593, %594 : vector<2x32xf32>
    %596 = vector.extract_strided_slice %589 {offsets = [0, 32], sizes = [2, 32], strides = [1, 1]} : vector<2x128xf32> to vector<2x32xf32>
    %597 = arith.negf %596 : vector<2x32xf32>
    %598 = math.exp %597 : vector<2x32xf32>
    %cst_238 = arith.constant 1.000000e+00 : f32
    %599 = vector.broadcast %cst_238 : f32 to vector<2x32xf32>
    %600 = arith.addf %599, %598 : vector<2x32xf32>
    %601 = arith.divf %599, %600 : vector<2x32xf32>
    %602 = vector.extract_strided_slice %589 {offsets = [0, 64], sizes = [2, 32], strides = [1, 1]} : vector<2x128xf32> to vector<2x32xf32>
    %603 = math.tanh %602 : vector<2x32xf32>
    %604 = vector.extract_strided_slice %589 {offsets = [0, 96], sizes = [2, 32], strides = [1, 1]} : vector<2x128xf32> to vector<2x32xf32>
    %605 = arith.negf %604 : vector<2x32xf32>
    %606 = math.exp %605 : vector<2x32xf32>
    %cst_239 = arith.constant 1.000000e+00 : f32
    %607 = vector.broadcast %cst_239 : f32 to vector<2x32xf32>
    %608 = arith.addf %607, %606 : vector<2x32xf32>
    %609 = arith.divf %607, %608 : vector<2x32xf32>
    %610 = arith.mulf %601, %578 : vector<2x32xf32>
    %611 = arith.mulf %595, %603 : vector<2x32xf32>
    %612 = arith.addf %610, %611 : vector<2x32xf32>
    %613 = math.tanh %612 : vector<2x32xf32>
    %614 = arith.mulf %609, %613 : vector<2x32xf32>
    %615 = arith.index_cast %c5_i32_233 : i32 to index
    %c0_240 = arith.constant 0 : index
    %c0_241 = arith.constant 0 : index
    %616 = vector.load %arg8[%615, %c0_240, %c0_241] : memref<8x2x32xf32, #tpu.memory_space<vmem>>, vector<1x2x32xf32>
    %617 = vector.shape_cast %616 : vector<1x2x32xf32> to vector<2x32xf32>
    %618 = vector.shape_cast %614 : vector<2x32xf32> to vector<1x2x32xf32>
    tpu.vector_store %arg8[%615, %c0_240, %c0_241], %618 {strides = array<i32>} : memref<8x2x32xf32, #tpu.memory_space<vmem>>, vector<1x2x32xf32>,
    %c6_i32_242 = arith.constant 6 : i32
    %619 = arith.index_cast %c6_i32_242 : i32 to index
    %c0_243 = arith.constant 0 : index
    %c0_244 = arith.constant 0 : index
    %620 = vector.load %arg9[%619, %c0_243, %c0_244] : memref<8x2x128xf32, #tpu.memory_space<vmem>>, vector<1x2x128xf32>
    %621 = vector.shape_cast %620 : vector<1x2x128xf32> to vector<2x128xf32>
    %cst_245 = arith.constant dense<0.000000e+00> : vector<2x128xf32>
    %622 = tpu.matmul %614, %412, %cst_245 {dimension_numbers = #tpu.dot_dimension_numbers<[1], [0], [0], [1], [0, 0, 1, 1], [], []>} : vector<2x32xf32>, vector<32x128xf32>, vector<2x128xf32> -> vector<2x128xf32>
    %623 = arith.addf %621, %622 : vector<2x128xf32>
    %624 = vector.extract_strided_slice %623 {offsets = [0, 0], sizes = [2, 32], strides = [1, 1]} : vector<2x128xf32> to vector<2x32xf32>
    %625 = arith.negf %624 : vector<2x32xf32>
    %626 = math.exp %625 : vector<2x32xf32>
    %cst_246 = arith.constant 1.000000e+00 : f32
    %627 = vector.broadcast %cst_246 : f32 to vector<2x32xf32>
    %628 = arith.addf %627, %626 : vector<2x32xf32>
    %629 = arith.divf %627, %628 : vector<2x32xf32>
    %630 = vector.extract_strided_slice %623 {offsets = [0, 32], sizes = [2, 32], strides = [1, 1]} : vector<2x128xf32> to vector<2x32xf32>
    %631 = arith.negf %630 : vector<2x32xf32>
    %632 = math.exp %631 : vector<2x32xf32>
    %cst_247 = arith.constant 1.000000e+00 : f32
    %633 = vector.broadcast %cst_247 : f32 to vector<2x32xf32>
    %634 = arith.addf %633, %632 : vector<2x32xf32>
    %635 = arith.divf %633, %634 : vector<2x32xf32>
    %636 = vector.extract_strided_slice %623 {offsets = [0, 64], sizes = [2, 32], strides = [1, 1]} : vector<2x128xf32> to vector<2x32xf32>
    %637 = math.tanh %636 : vector<2x32xf32>
    %638 = vector.extract_strided_slice %623 {offsets = [0, 96], sizes = [2, 32], strides = [1, 1]} : vector<2x128xf32> to vector<2x32xf32>
    %639 = arith.negf %638 : vector<2x32xf32>
    %640 = math.exp %639 : vector<2x32xf32>
    %cst_248 = arith.constant 1.000000e+00 : f32
    %641 = vector.broadcast %cst_248 : f32 to vector<2x32xf32>
    %642 = arith.addf %641, %640 : vector<2x32xf32>
    %643 = arith.divf %641, %642 : vector<2x32xf32>
    %644 = arith.mulf %635, %612 : vector<2x32xf32>
    %645 = arith.mulf %629, %637 : vector<2x32xf32>
    %646 = arith.addf %644, %645 : vector<2x32xf32>
    %647 = math.tanh %646 : vector<2x32xf32>
    %648 = arith.mulf %643, %647 : vector<2x32xf32>
    %649 = arith.index_cast %c6_i32_242 : i32 to index
    %c0_249 = arith.constant 0 : index
    %c0_250 = arith.constant 0 : index
    %650 = vector.load %arg8[%649, %c0_249, %c0_250] : memref<8x2x32xf32, #tpu.memory_space<vmem>>, vector<1x2x32xf32>
    %651 = vector.shape_cast %650 : vector<1x2x32xf32> to vector<2x32xf32>
    %652 = vector.shape_cast %648 : vector<2x32xf32> to vector<1x2x32xf32>
    tpu.vector_store %arg8[%649, %c0_249, %c0_250], %652 {strides = array<i32>} : memref<8x2x32xf32, #tpu.memory_space<vmem>>, vector<1x2x32xf32>,
    %c7_i32_251 = arith.constant 7 : i32
    %653 = arith.index_cast %c7_i32_251 : i32 to index
    %c0_252 = arith.constant 0 : index
    %c0_253 = arith.constant 0 : index
    %654 = vector.load %arg9[%653, %c0_252, %c0_253] : memref<8x2x128xf32, #tpu.memory_space<vmem>>, vector<1x2x128xf32>
    %655 = vector.shape_cast %654 : vector<1x2x128xf32> to vector<2x128xf32>
    %cst_254 = arith.constant dense<0.000000e+00> : vector<2x128xf32>
    %656 = tpu.matmul %648, %412, %cst_254 {dimension_numbers = #tpu.dot_dimension_numbers<[1], [0], [0], [1], [0, 0, 1, 1], [], []>} : vector<2x32xf32>, vector<32x128xf32>, vector<2x128xf32> -> vector<2x128xf32>
    %657 = arith.addf %655, %656 : vector<2x128xf32>
    %658 = vector.extract_strided_slice %657 {offsets = [0, 0], sizes = [2, 32], strides = [1, 1]} : vector<2x128xf32> to vector<2x32xf32>
    %659 = arith.negf %658 : vector<2x32xf32>
    %660 = math.exp %659 : vector<2x32xf32>
    %cst_255 = arith.constant 1.000000e+00 : f32
    %661 = vector.broadcast %cst_255 : f32 to vector<2x32xf32>
    %662 = arith.addf %661, %660 : vector<2x32xf32>
    %663 = arith.divf %661, %662 : vector<2x32xf32>
    %664 = vector.extract_strided_slice %657 {offsets = [0, 32], sizes = [2, 32], strides = [1, 1]} : vector<2x128xf32> to vector<2x32xf32>
    %665 = arith.negf %664 : vector<2x32xf32>
    %666 = math.exp %665 : vector<2x32xf32>
    %cst_256 = arith.constant 1.000000e+00 : f32
    %667 = vector.broadcast %cst_256 : f32 to vector<2x32xf32>
    %668 = arith.addf %667, %666 : vector<2x32xf32>
    %669 = arith.divf %667, %668 : vector<2x32xf32>
    %670 = vector.extract_strided_slice %657 {offsets = [0, 64], sizes = [2, 32], strides = [1, 1]} : vector<2x128xf32> to vector<2x32xf32>
    %671 = math.tanh %670 : vector<2x32xf32>
    %672 = vector.extract_strided_slice %657 {offsets = [0, 96], sizes = [2, 32], strides = [1, 1]} : vector<2x128xf32> to vector<2x32xf32>
    %673 = arith.negf %672 : vector<2x32xf32>
    %674 = math.exp %673 : vector<2x32xf32>
    %cst_257 = arith.constant 1.000000e+00 : f32
    %675 = vector.broadcast %cst_257 : f32 to vector<2x32xf32>
    %676 = arith.addf %675, %674 : vector<2x32xf32>
    %677 = arith.divf %675, %676 : vector<2x32xf32>
    %678 = arith.mulf %669, %646 : vector<2x32xf32>
    %679 = arith.mulf %663, %671 : vector<2x32xf32>
    %680 = arith.addf %678, %679 : vector<2x32xf32>
    %681 = math.tanh %680 : vector<2x32xf32>
    %682 = arith.mulf %677, %681 : vector<2x32xf32>
    %683 = arith.index_cast %c7_i32_251 : i32 to index
    %c0_258 = arith.constant 0 : index
    %c0_259 = arith.constant 0 : index
    %684 = vector.load %arg8[%683, %c0_258, %c0_259] : memref<8x2x32xf32, #tpu.memory_space<vmem>>, vector<1x2x32xf32>
    %685 = vector.shape_cast %684 : vector<1x2x32xf32> to vector<2x32xf32>
    %686 = vector.shape_cast %682 : vector<2x32xf32> to vector<1x2x32xf32>
    tpu.vector_store %arg8[%683, %c0_258, %c0_259], %686 {strides = array<i32>} : memref<8x2x32xf32, #tpu.memory_space<vmem>>, vector<1x2x32xf32>,
    %c8_i32_260 = arith.constant 8 : i32
    %c1_261 = arith.constant 1 : index
    %c0_262 = arith.constant 0 : index
    %c0_263 = arith.constant 0 : index
    %687 = vector.load %arg2[%c1_261, %c0_262, %c0_263] : memref<3x32x128xf32, #tpu.memory_space<vmem>>, vector<1x32x128xf32>
    %688 = vector.shape_cast %687 : vector<1x32x128xf32> to vector<32x128xf32>
    %c2_264 = arith.constant 2 : index
    %c0_265 = arith.constant 0 : index
    %c0_266 = arith.constant 0 : index
    %689 = vector.load %arg4[%c2_264, %c0_265, %c0_266] : memref<4x1x128xf32, #tpu.memory_space<vmem>>, vector<1x1x128xf32>
    %690 = vector.shape_cast %689 : vector<1x1x128xf32> to vector<1x128xf32>
    %c0_267 = arith.constant 0 : index
    %c0_268 = arith.constant 0 : index
    %c0_269 = arith.constant 0 : index
    %691 = vector.load %arg8[%c0_267, %c0_268, %c0_269] : memref<8x2x32xf32, #tpu.memory_space<vmem>>, vector<1x2x32xf32>
    %692 = vector.shape_cast %691 : vector<1x2x32xf32> to vector<2x32xf32>
    %cst_270 = arith.constant dense<0.000000e+00> : vector<2x128xf32>
    %693 = tpu.matmul %692, %688, %cst_270 {dimension_numbers = #tpu.dot_dimension_numbers<[1], [0], [0], [1], [0, 0, 1, 1], [], []>} : vector<2x32xf32>, vector<32x128xf32>, vector<2x128xf32> -> vector<2x128xf32>
    %694 = vector.broadcast %690 : vector<1x128xf32> to vector<2x128xf32>
    %695 = arith.addf %693, %694 : vector<2x128xf32>
    %c0_271 = arith.constant 0 : index
    %c0_272 = arith.constant 0 : index
    %c0_273 = arith.constant 0 : index
    %696 = vector.load %arg9[%c0_271, %c0_272, %c0_273] : memref<8x2x128xf32, #tpu.memory_space<vmem>>, vector<1x2x128xf32>
    %697 = vector.shape_cast %696 : vector<1x2x128xf32> to vector<2x128xf32>
    %698 = vector.shape_cast %695 : vector<2x128xf32> to vector<1x2x128xf32>
    tpu.vector_store %arg9[%c0_271, %c0_272, %c0_273], %698 {strides = array<i32>} : memref<8x2x128xf32, #tpu.memory_space<vmem>>, vector<1x2x128xf32>,
    %c1_274 = arith.constant 1 : index
    %c0_275 = arith.constant 0 : index
    %c0_276 = arith.constant 0 : index
    %699 = vector.load %arg8[%c1_274, %c0_275, %c0_276] : memref<8x2x32xf32, #tpu.memory_space<vmem>>, vector<1x2x32xf32>
    %700 = vector.shape_cast %699 : vector<1x2x32xf32> to vector<2x32xf32>
    %cst_277 = arith.constant dense<0.000000e+00> : vector<2x128xf32>
    %701 = tpu.matmul %700, %688, %cst_277 {dimension_numbers = #tpu.dot_dimension_numbers<[1], [0], [0], [1], [0, 0, 1, 1], [], []>} : vector<2x32xf32>, vector<32x128xf32>, vector<2x128xf32> -> vector<2x128xf32>
    %702 = vector.broadcast %690 : vector<1x128xf32> to vector<2x128xf32>
    %703 = arith.addf %701, %702 : vector<2x128xf32>
    %c1_278 = arith.constant 1 : index
    %c0_279 = arith.constant 0 : index
    %c0_280 = arith.constant 0 : index
    %704 = vector.load %arg9[%c1_278, %c0_279, %c0_280] : memref<8x2x128xf32, #tpu.memory_space<vmem>>, vector<1x2x128xf32>
    %705 = vector.shape_cast %704 : vector<1x2x128xf32> to vector<2x128xf32>
    %706 = vector.shape_cast %703 : vector<2x128xf32> to vector<1x2x128xf32>
    tpu.vector_store %arg9[%c1_278, %c0_279, %c0_280], %706 {strides = array<i32>} : memref<8x2x128xf32, #tpu.memory_space<vmem>>, vector<1x2x128xf32>,
    %c2_281 = arith.constant 2 : index
    %c0_282 = arith.constant 0 : index
    %c0_283 = arith.constant 0 : index
    %707 = vector.load %arg8[%c2_281, %c0_282, %c0_283] : memref<8x2x32xf32, #tpu.memory_space<vmem>>, vector<1x2x32xf32>
    %708 = vector.shape_cast %707 : vector<1x2x32xf32> to vector<2x32xf32>
    %cst_284 = arith.constant dense<0.000000e+00> : vector<2x128xf32>
    %709 = tpu.matmul %708, %688, %cst_284 {dimension_numbers = #tpu.dot_dimension_numbers<[1], [0], [0], [1], [0, 0, 1, 1], [], []>} : vector<2x32xf32>, vector<32x128xf32>, vector<2x128xf32> -> vector<2x128xf32>
    %710 = vector.broadcast %690 : vector<1x128xf32> to vector<2x128xf32>
    %711 = arith.addf %709, %710 : vector<2x128xf32>
    %c2_285 = arith.constant 2 : index
    %c0_286 = arith.constant 0 : index
    %c0_287 = arith.constant 0 : index
    %712 = vector.load %arg9[%c2_285, %c0_286, %c0_287] : memref<8x2x128xf32, #tpu.memory_space<vmem>>, vector<1x2x128xf32>
    %713 = vector.shape_cast %712 : vector<1x2x128xf32> to vector<2x128xf32>
    %714 = vector.shape_cast %711 : vector<2x128xf32> to vector<1x2x128xf32>
    tpu.vector_store %arg9[%c2_285, %c0_286, %c0_287], %714 {strides = array<i32>} : memref<8x2x128xf32, #tpu.memory_space<vmem>>, vector<1x2x128xf32>,
    %c3_288 = arith.constant 3 : index
    %c0_289 = arith.constant 0 : index
    %c0_290 = arith.constant 0 : index
    %715 = vector.load %arg8[%c3_288, %c0_289, %c0_290] : memref<8x2x32xf32, #tpu.memory_space<vmem>>, vector<1x2x32xf32>
    %716 = vector.shape_cast %715 : vector<1x2x32xf32> to vector<2x32xf32>
    %cst_291 = arith.constant dense<0.000000e+00> : vector<2x128xf32>
    %717 = tpu.matmul %716, %688, %cst_291 {dimension_numbers = #tpu.dot_dimension_numbers<[1], [0], [0], [1], [0, 0, 1, 1], [], []>} : vector<2x32xf32>, vector<32x128xf32>, vector<2x128xf32> -> vector<2x128xf32>
    %718 = vector.broadcast %690 : vector<1x128xf32> to vector<2x128xf32>
    %719 = arith.addf %717, %718 : vector<2x128xf32>
    %c3_292 = arith.constant 3 : index
    %c0_293 = arith.constant 0 : index
    %c0_294 = arith.constant 0 : index
    %720 = vector.load %arg9[%c3_292, %c0_293, %c0_294] : memref<8x2x128xf32, #tpu.memory_space<vmem>>, vector<1x2x128xf32>
    %721 = vector.shape_cast %720 : vector<1x2x128xf32> to vector<2x128xf32>
    %722 = vector.shape_cast %719 : vector<2x128xf32> to vector<1x2x128xf32>
    tpu.vector_store %arg9[%c3_292, %c0_293, %c0_294], %722 {strides = array<i32>} : memref<8x2x128xf32, #tpu.memory_space<vmem>>, vector<1x2x128xf32>,
    %c4_295 = arith.constant 4 : index
    %c0_296 = arith.constant 0 : index
    %c0_297 = arith.constant 0 : index
    %723 = vector.load %arg8[%c4_295, %c0_296, %c0_297] : memref<8x2x32xf32, #tpu.memory_space<vmem>>, vector<1x2x32xf32>
    %724 = vector.shape_cast %723 : vector<1x2x32xf32> to vector<2x32xf32>
    %cst_298 = arith.constant dense<0.000000e+00> : vector<2x128xf32>
    %725 = tpu.matmul %724, %688, %cst_298 {dimension_numbers = #tpu.dot_dimension_numbers<[1], [0], [0], [1], [0, 0, 1, 1], [], []>} : vector<2x32xf32>, vector<32x128xf32>, vector<2x128xf32> -> vector<2x128xf32>
    %726 = vector.broadcast %690 : vector<1x128xf32> to vector<2x128xf32>
    %727 = arith.addf %725, %726 : vector<2x128xf32>
    %c4_299 = arith.constant 4 : index
    %c0_300 = arith.constant 0 : index
    %c0_301 = arith.constant 0 : index
    %728 = vector.load %arg9[%c4_299, %c0_300, %c0_301] : memref<8x2x128xf32, #tpu.memory_space<vmem>>, vector<1x2x128xf32>
    %729 = vector.shape_cast %728 : vector<1x2x128xf32> to vector<2x128xf32>
    %730 = vector.shape_cast %727 : vector<2x128xf32> to vector<1x2x128xf32>
    tpu.vector_store %arg9[%c4_299, %c0_300, %c0_301], %730 {strides = array<i32>} : memref<8x2x128xf32, #tpu.memory_space<vmem>>, vector<1x2x128xf32>,
    %c5_302 = arith.constant 5 : index
    %c0_303 = arith.constant 0 : index
    %c0_304 = arith.constant 0 : index
    %731 = vector.load %arg8[%c5_302, %c0_303, %c0_304] : memref<8x2x32xf32, #tpu.memory_space<vmem>>, vector<1x2x32xf32>
    %732 = vector.shape_cast %731 : vector<1x2x32xf32> to vector<2x32xf32>
    %cst_305 = arith.constant dense<0.000000e+00> : vector<2x128xf32>
    %733 = tpu.matmul %732, %688, %cst_305 {dimension_numbers = #tpu.dot_dimension_numbers<[1], [0], [0], [1], [0, 0, 1, 1], [], []>} : vector<2x32xf32>, vector<32x128xf32>, vector<2x128xf32> -> vector<2x128xf32>
    %734 = vector.broadcast %690 : vector<1x128xf32> to vector<2x128xf32>
    %735 = arith.addf %733, %734 : vector<2x128xf32>
    %c5_306 = arith.constant 5 : index
    %c0_307 = arith.constant 0 : index
    %c0_308 = arith.constant 0 : index
    %736 = vector.load %arg9[%c5_306, %c0_307, %c0_308] : memref<8x2x128xf32, #tpu.memory_space<vmem>>, vector<1x2x128xf32>
    %737 = vector.shape_cast %736 : vector<1x2x128xf32> to vector<2x128xf32>
    %738 = vector.shape_cast %735 : vector<2x128xf32> to vector<1x2x128xf32>
    tpu.vector_store %arg9[%c5_306, %c0_307, %c0_308], %738 {strides = array<i32>} : memref<8x2x128xf32, #tpu.memory_space<vmem>>, vector<1x2x128xf32>,
    %c6_309 = arith.constant 6 : index
    %c0_310 = arith.constant 0 : index
    %c0_311 = arith.constant 0 : index
    %739 = vector.load %arg8[%c6_309, %c0_310, %c0_311] : memref<8x2x32xf32, #tpu.memory_space<vmem>>, vector<1x2x32xf32>
    %740 = vector.shape_cast %739 : vector<1x2x32xf32> to vector<2x32xf32>
    %cst_312 = arith.constant dense<0.000000e+00> : vector<2x128xf32>
    %741 = tpu.matmul %740, %688, %cst_312 {dimension_numbers = #tpu.dot_dimension_numbers<[1], [0], [0], [1], [0, 0, 1, 1], [], []>} : vector<2x32xf32>, vector<32x128xf32>, vector<2x128xf32> -> vector<2x128xf32>
    %742 = vector.broadcast %690 : vector<1x128xf32> to vector<2x128xf32>
    %743 = arith.addf %741, %742 : vector<2x128xf32>
    %c6_313 = arith.constant 6 : index
    %c0_314 = arith.constant 0 : index
    %c0_315 = arith.constant 0 : index
    %744 = vector.load %arg9[%c6_313, %c0_314, %c0_315] : memref<8x2x128xf32, #tpu.memory_space<vmem>>, vector<1x2x128xf32>
    %745 = vector.shape_cast %744 : vector<1x2x128xf32> to vector<2x128xf32>
    %746 = vector.shape_cast %743 : vector<2x128xf32> to vector<1x2x128xf32>
    tpu.vector_store %arg9[%c6_313, %c0_314, %c0_315], %746 {strides = array<i32>} : memref<8x2x128xf32, #tpu.memory_space<vmem>>, vector<1x2x128xf32>,
    %c7_316 = arith.constant 7 : index
    %c0_317 = arith.constant 0 : index
    %c0_318 = arith.constant 0 : index
    %747 = vector.load %arg8[%c7_316, %c0_317, %c0_318] : memref<8x2x32xf32, #tpu.memory_space<vmem>>, vector<1x2x32xf32>
    %748 = vector.shape_cast %747 : vector<1x2x32xf32> to vector<2x32xf32>
    %cst_319 = arith.constant dense<0.000000e+00> : vector<2x128xf32>
    %749 = tpu.matmul %748, %688, %cst_319 {dimension_numbers = #tpu.dot_dimension_numbers<[1], [0], [0], [1], [0, 0, 1, 1], [], []>} : vector<2x32xf32>, vector<32x128xf32>, vector<2x128xf32> -> vector<2x128xf32>
    %750 = vector.broadcast %690 : vector<1x128xf32> to vector<2x128xf32>
    %751 = arith.addf %749, %750 : vector<2x128xf32>
    %c7_320 = arith.constant 7 : index
    %c0_321 = arith.constant 0 : index
    %c0_322 = arith.constant 0 : index
    %752 = vector.load %arg9[%c7_320, %c0_321, %c0_322] : memref<8x2x128xf32, #tpu.memory_space<vmem>>, vector<1x2x128xf32>
    %753 = vector.shape_cast %752 : vector<1x2x128xf32> to vector<2x128xf32>
    %754 = vector.shape_cast %751 : vector<2x128xf32> to vector<1x2x128xf32>
    tpu.vector_store %arg9[%c7_320, %c0_321, %c0_322], %754 {strides = array<i32>} : memref<8x2x128xf32, #tpu.memory_space<vmem>>, vector<1x2x128xf32>,
    %c2_323 = arith.constant 2 : index
    %c0_324 = arith.constant 0 : index
    %c0_325 = arith.constant 0 : index
    %755 = vector.load %arg3[%c2_323, %c0_324, %c0_325] : memref<4x32x128xf32, #tpu.memory_space<vmem>>, vector<1x32x128xf32>
    %756 = vector.shape_cast %755 : vector<1x32x128xf32> to vector<32x128xf32>
    %cst_326 = arith.constant 0.000000e+00 : f32
    %757 = vector.broadcast %cst_326 : f32 to vector<2x32xf32>
    %cst_327 = arith.constant 0.000000e+00 : f32
    %758 = vector.broadcast %cst_327 : f32 to vector<2x32xf32>
    %c0_i32_328 = arith.constant 0 : i32
    %759 = arith.index_cast %c0_i32_328 : i32 to index
    %c0_329 = arith.constant 0 : index
    %c0_330 = arith.constant 0 : index
    %760 = vector.load %arg9[%759, %c0_329, %c0_330] : memref<8x2x128xf32, #tpu.memory_space<vmem>>, vector<1x2x128xf32>
    %761 = vector.shape_cast %760 : vector<1x2x128xf32> to vector<2x128xf32>
    %cst_331 = arith.constant dense<0.000000e+00> : vector<2x128xf32>
    %762 = tpu.matmul %757, %756, %cst_331 {dimension_numbers = #tpu.dot_dimension_numbers<[1], [0], [0], [1], [0, 0, 1, 1], [], []>} : vector<2x32xf32>, vector<32x128xf32>, vector<2x128xf32> -> vector<2x128xf32>
    %763 = arith.addf %761, %762 : vector<2x128xf32>
    %764 = vector.extract_strided_slice %763 {offsets = [0, 0], sizes = [2, 32], strides = [1, 1]} : vector<2x128xf32> to vector<2x32xf32>
    %765 = arith.negf %764 : vector<2x32xf32>
    %766 = math.exp %765 : vector<2x32xf32>
    %cst_332 = arith.constant 1.000000e+00 : f32
    %767 = vector.broadcast %cst_332 : f32 to vector<2x32xf32>
    %768 = arith.addf %767, %766 : vector<2x32xf32>
    %769 = arith.divf %767, %768 : vector<2x32xf32>
    %770 = vector.extract_strided_slice %763 {offsets = [0, 32], sizes = [2, 32], strides = [1, 1]} : vector<2x128xf32> to vector<2x32xf32>
    %771 = arith.negf %770 : vector<2x32xf32>
    %772 = math.exp %771 : vector<2x32xf32>
    %cst_333 = arith.constant 1.000000e+00 : f32
    %773 = vector.broadcast %cst_333 : f32 to vector<2x32xf32>
    %774 = arith.addf %773, %772 : vector<2x32xf32>
    %775 = arith.divf %773, %774 : vector<2x32xf32>
    %776 = vector.extract_strided_slice %763 {offsets = [0, 64], sizes = [2, 32], strides = [1, 1]} : vector<2x128xf32> to vector<2x32xf32>
    %777 = math.tanh %776 : vector<2x32xf32>
    %778 = vector.extract_strided_slice %763 {offsets = [0, 96], sizes = [2, 32], strides = [1, 1]} : vector<2x128xf32> to vector<2x32xf32>
    %779 = arith.negf %778 : vector<2x32xf32>
    %780 = math.exp %779 : vector<2x32xf32>
    %cst_334 = arith.constant 1.000000e+00 : f32
    %781 = vector.broadcast %cst_334 : f32 to vector<2x32xf32>
    %782 = arith.addf %781, %780 : vector<2x32xf32>
    %783 = arith.divf %781, %782 : vector<2x32xf32>
    %784 = arith.mulf %775, %758 : vector<2x32xf32>
    %785 = arith.mulf %769, %777 : vector<2x32xf32>
    %786 = arith.addf %784, %785 : vector<2x32xf32>
    %787 = math.tanh %786 : vector<2x32xf32>
    %788 = arith.mulf %783, %787 : vector<2x32xf32>
    %789 = arith.index_cast %c0_i32_328 : i32 to index
    %c0_335 = arith.constant 0 : index
    %c0_336 = arith.constant 0 : index
    %790 = vector.load %arg8[%789, %c0_335, %c0_336] : memref<8x2x32xf32, #tpu.memory_space<vmem>>, vector<1x2x32xf32>
    %791 = vector.shape_cast %790 : vector<1x2x32xf32> to vector<2x32xf32>
    %792 = vector.shape_cast %788 : vector<2x32xf32> to vector<1x2x32xf32>
    tpu.vector_store %arg8[%789, %c0_335, %c0_336], %792 {strides = array<i32>} : memref<8x2x32xf32, #tpu.memory_space<vmem>>, vector<1x2x32xf32>,
    %c1_i32_337 = arith.constant 1 : i32
    %793 = arith.index_cast %c1_i32_337 : i32 to index
    %c0_338 = arith.constant 0 : index
    %c0_339 = arith.constant 0 : index
    %794 = vector.load %arg9[%793, %c0_338, %c0_339] : memref<8x2x128xf32, #tpu.memory_space<vmem>>, vector<1x2x128xf32>
    %795 = vector.shape_cast %794 : vector<1x2x128xf32> to vector<2x128xf32>
    %cst_340 = arith.constant dense<0.000000e+00> : vector<2x128xf32>
    %796 = tpu.matmul %788, %756, %cst_340 {dimension_numbers = #tpu.dot_dimension_numbers<[1], [0], [0], [1], [0, 0, 1, 1], [], []>} : vector<2x32xf32>, vector<32x128xf32>, vector<2x128xf32> -> vector<2x128xf32>
    %797 = arith.addf %795, %796 : vector<2x128xf32>
    %798 = vector.extract_strided_slice %797 {offsets = [0, 0], sizes = [2, 32], strides = [1, 1]} : vector<2x128xf32> to vector<2x32xf32>
    %799 = arith.negf %798 : vector<2x32xf32>
    %800 = math.exp %799 : vector<2x32xf32>
    %cst_341 = arith.constant 1.000000e+00 : f32
    %801 = vector.broadcast %cst_341 : f32 to vector<2x32xf32>
    %802 = arith.addf %801, %800 : vector<2x32xf32>
    %803 = arith.divf %801, %802 : vector<2x32xf32>
    %804 = vector.extract_strided_slice %797 {offsets = [0, 32], sizes = [2, 32], strides = [1, 1]} : vector<2x128xf32> to vector<2x32xf32>
    %805 = arith.negf %804 : vector<2x32xf32>
    %806 = math.exp %805 : vector<2x32xf32>
    %cst_342 = arith.constant 1.000000e+00 : f32
    %807 = vector.broadcast %cst_342 : f32 to vector<2x32xf32>
    %808 = arith.addf %807, %806 : vector<2x32xf32>
    %809 = arith.divf %807, %808 : vector<2x32xf32>
    %810 = vector.extract_strided_slice %797 {offsets = [0, 64], sizes = [2, 32], strides = [1, 1]} : vector<2x128xf32> to vector<2x32xf32>
    %811 = math.tanh %810 : vector<2x32xf32>
    %812 = vector.extract_strided_slice %797 {offsets = [0, 96], sizes = [2, 32], strides = [1, 1]} : vector<2x128xf32> to vector<2x32xf32>
    %813 = arith.negf %812 : vector<2x32xf32>
    %814 = math.exp %813 : vector<2x32xf32>
    %cst_343 = arith.constant 1.000000e+00 : f32
    %815 = vector.broadcast %cst_343 : f32 to vector<2x32xf32>
    %816 = arith.addf %815, %814 : vector<2x32xf32>
    %817 = arith.divf %815, %816 : vector<2x32xf32>
    %818 = arith.mulf %809, %786 : vector<2x32xf32>
    %819 = arith.mulf %803, %811 : vector<2x32xf32>
    %820 = arith.addf %818, %819 : vector<2x32xf32>
    %821 = math.tanh %820 : vector<2x32xf32>
    %822 = arith.mulf %817, %821 : vector<2x32xf32>
    %823 = arith.index_cast %c1_i32_337 : i32 to index
    %c0_344 = arith.constant 0 : index
    %c0_345 = arith.constant 0 : index
    %824 = vector.load %arg8[%823, %c0_344, %c0_345] : memref<8x2x32xf32, #tpu.memory_space<vmem>>, vector<1x2x32xf32>
    %825 = vector.shape_cast %824 : vector<1x2x32xf32> to vector<2x32xf32>
    %826 = vector.shape_cast %822 : vector<2x32xf32> to vector<1x2x32xf32>
    tpu.vector_store %arg8[%823, %c0_344, %c0_345], %826 {strides = array<i32>} : memref<8x2x32xf32, #tpu.memory_space<vmem>>, vector<1x2x32xf32>,
    %c2_i32_346 = arith.constant 2 : i32
    %827 = arith.index_cast %c2_i32_346 : i32 to index
    %c0_347 = arith.constant 0 : index
    %c0_348 = arith.constant 0 : index
    %828 = vector.load %arg9[%827, %c0_347, %c0_348] : memref<8x2x128xf32, #tpu.memory_space<vmem>>, vector<1x2x128xf32>
    %829 = vector.shape_cast %828 : vector<1x2x128xf32> to vector<2x128xf32>
    %cst_349 = arith.constant dense<0.000000e+00> : vector<2x128xf32>
    %830 = tpu.matmul %822, %756, %cst_349 {dimension_numbers = #tpu.dot_dimension_numbers<[1], [0], [0], [1], [0, 0, 1, 1], [], []>} : vector<2x32xf32>, vector<32x128xf32>, vector<2x128xf32> -> vector<2x128xf32>
    %831 = arith.addf %829, %830 : vector<2x128xf32>
    %832 = vector.extract_strided_slice %831 {offsets = [0, 0], sizes = [2, 32], strides = [1, 1]} : vector<2x128xf32> to vector<2x32xf32>
    %833 = arith.negf %832 : vector<2x32xf32>
    %834 = math.exp %833 : vector<2x32xf32>
    %cst_350 = arith.constant 1.000000e+00 : f32
    %835 = vector.broadcast %cst_350 : f32 to vector<2x32xf32>
    %836 = arith.addf %835, %834 : vector<2x32xf32>
    %837 = arith.divf %835, %836 : vector<2x32xf32>
    %838 = vector.extract_strided_slice %831 {offsets = [0, 32], sizes = [2, 32], strides = [1, 1]} : vector<2x128xf32> to vector<2x32xf32>
    %839 = arith.negf %838 : vector<2x32xf32>
    %840 = math.exp %839 : vector<2x32xf32>
    %cst_351 = arith.constant 1.000000e+00 : f32
    %841 = vector.broadcast %cst_351 : f32 to vector<2x32xf32>
    %842 = arith.addf %841, %840 : vector<2x32xf32>
    %843 = arith.divf %841, %842 : vector<2x32xf32>
    %844 = vector.extract_strided_slice %831 {offsets = [0, 64], sizes = [2, 32], strides = [1, 1]} : vector<2x128xf32> to vector<2x32xf32>
    %845 = math.tanh %844 : vector<2x32xf32>
    %846 = vector.extract_strided_slice %831 {offsets = [0, 96], sizes = [2, 32], strides = [1, 1]} : vector<2x128xf32> to vector<2x32xf32>
    %847 = arith.negf %846 : vector<2x32xf32>
    %848 = math.exp %847 : vector<2x32xf32>
    %cst_352 = arith.constant 1.000000e+00 : f32
    %849 = vector.broadcast %cst_352 : f32 to vector<2x32xf32>
    %850 = arith.addf %849, %848 : vector<2x32xf32>
    %851 = arith.divf %849, %850 : vector<2x32xf32>
    %852 = arith.mulf %843, %820 : vector<2x32xf32>
    %853 = arith.mulf %837, %845 : vector<2x32xf32>
    %854 = arith.addf %852, %853 : vector<2x32xf32>
    %855 = math.tanh %854 : vector<2x32xf32>
    %856 = arith.mulf %851, %855 : vector<2x32xf32>
    %857 = arith.index_cast %c2_i32_346 : i32 to index
    %c0_353 = arith.constant 0 : index
    %c0_354 = arith.constant 0 : index
    %858 = vector.load %arg8[%857, %c0_353, %c0_354] : memref<8x2x32xf32, #tpu.memory_space<vmem>>, vector<1x2x32xf32>
    %859 = vector.shape_cast %858 : vector<1x2x32xf32> to vector<2x32xf32>
    %860 = vector.shape_cast %856 : vector<2x32xf32> to vector<1x2x32xf32>
    tpu.vector_store %arg8[%857, %c0_353, %c0_354], %860 {strides = array<i32>} : memref<8x2x32xf32, #tpu.memory_space<vmem>>, vector<1x2x32xf32>,
    %c3_i32_355 = arith.constant 3 : i32
    %861 = arith.index_cast %c3_i32_355 : i32 to index
    %c0_356 = arith.constant 0 : index
    %c0_357 = arith.constant 0 : index
    %862 = vector.load %arg9[%861, %c0_356, %c0_357] : memref<8x2x128xf32, #tpu.memory_space<vmem>>, vector<1x2x128xf32>
    %863 = vector.shape_cast %862 : vector<1x2x128xf32> to vector<2x128xf32>
    %cst_358 = arith.constant dense<0.000000e+00> : vector<2x128xf32>
    %864 = tpu.matmul %856, %756, %cst_358 {dimension_numbers = #tpu.dot_dimension_numbers<[1], [0], [0], [1], [0, 0, 1, 1], [], []>} : vector<2x32xf32>, vector<32x128xf32>, vector<2x128xf32> -> vector<2x128xf32>
    %865 = arith.addf %863, %864 : vector<2x128xf32>
    %866 = vector.extract_strided_slice %865 {offsets = [0, 0], sizes = [2, 32], strides = [1, 1]} : vector<2x128xf32> to vector<2x32xf32>
    %867 = arith.negf %866 : vector<2x32xf32>
    %868 = math.exp %867 : vector<2x32xf32>
    %cst_359 = arith.constant 1.000000e+00 : f32
    %869 = vector.broadcast %cst_359 : f32 to vector<2x32xf32>
    %870 = arith.addf %869, %868 : vector<2x32xf32>
    %871 = arith.divf %869, %870 : vector<2x32xf32>
    %872 = vector.extract_strided_slice %865 {offsets = [0, 32], sizes = [2, 32], strides = [1, 1]} : vector<2x128xf32> to vector<2x32xf32>
    %873 = arith.negf %872 : vector<2x32xf32>
    %874 = math.exp %873 : vector<2x32xf32>
    %cst_360 = arith.constant 1.000000e+00 : f32
    %875 = vector.broadcast %cst_360 : f32 to vector<2x32xf32>
    %876 = arith.addf %875, %874 : vector<2x32xf32>
    %877 = arith.divf %875, %876 : vector<2x32xf32>
    %878 = vector.extract_strided_slice %865 {offsets = [0, 64], sizes = [2, 32], strides = [1, 1]} : vector<2x128xf32> to vector<2x32xf32>
    %879 = math.tanh %878 : vector<2x32xf32>
    %880 = vector.extract_strided_slice %865 {offsets = [0, 96], sizes = [2, 32], strides = [1, 1]} : vector<2x128xf32> to vector<2x32xf32>
    %881 = arith.negf %880 : vector<2x32xf32>
    %882 = math.exp %881 : vector<2x32xf32>
    %cst_361 = arith.constant 1.000000e+00 : f32
    %883 = vector.broadcast %cst_361 : f32 to vector<2x32xf32>
    %884 = arith.addf %883, %882 : vector<2x32xf32>
    %885 = arith.divf %883, %884 : vector<2x32xf32>
    %886 = arith.mulf %877, %854 : vector<2x32xf32>
    %887 = arith.mulf %871, %879 : vector<2x32xf32>
    %888 = arith.addf %886, %887 : vector<2x32xf32>
    %889 = math.tanh %888 : vector<2x32xf32>
    %890 = arith.mulf %885, %889 : vector<2x32xf32>
    %891 = arith.index_cast %c3_i32_355 : i32 to index
    %c0_362 = arith.constant 0 : index
    %c0_363 = arith.constant 0 : index
    %892 = vector.load %arg8[%891, %c0_362, %c0_363] : memref<8x2x32xf32, #tpu.memory_space<vmem>>, vector<1x2x32xf32>
    %893 = vector.shape_cast %892 : vector<1x2x32xf32> to vector<2x32xf32>
    %894 = vector.shape_cast %890 : vector<2x32xf32> to vector<1x2x32xf32>
    tpu.vector_store %arg8[%891, %c0_362, %c0_363], %894 {strides = array<i32>} : memref<8x2x32xf32, #tpu.memory_space<vmem>>, vector<1x2x32xf32>,
    %c4_i32_364 = arith.constant 4 : i32
    %895 = arith.index_cast %c4_i32_364 : i32 to index
    %c0_365 = arith.constant 0 : index
    %c0_366 = arith.constant 0 : index
    %896 = vector.load %arg9[%895, %c0_365, %c0_366] : memref<8x2x128xf32, #tpu.memory_space<vmem>>, vector<1x2x128xf32>
    %897 = vector.shape_cast %896 : vector<1x2x128xf32> to vector<2x128xf32>
    %cst_367 = arith.constant dense<0.000000e+00> : vector<2x128xf32>
    %898 = tpu.matmul %890, %756, %cst_367 {dimension_numbers = #tpu.dot_dimension_numbers<[1], [0], [0], [1], [0, 0, 1, 1], [], []>} : vector<2x32xf32>, vector<32x128xf32>, vector<2x128xf32> -> vector<2x128xf32>
    %899 = arith.addf %897, %898 : vector<2x128xf32>
    %900 = vector.extract_strided_slice %899 {offsets = [0, 0], sizes = [2, 32], strides = [1, 1]} : vector<2x128xf32> to vector<2x32xf32>
    %901 = arith.negf %900 : vector<2x32xf32>
    %902 = math.exp %901 : vector<2x32xf32>
    %cst_368 = arith.constant 1.000000e+00 : f32
    %903 = vector.broadcast %cst_368 : f32 to vector<2x32xf32>
    %904 = arith.addf %903, %902 : vector<2x32xf32>
    %905 = arith.divf %903, %904 : vector<2x32xf32>
    %906 = vector.extract_strided_slice %899 {offsets = [0, 32], sizes = [2, 32], strides = [1, 1]} : vector<2x128xf32> to vector<2x32xf32>
    %907 = arith.negf %906 : vector<2x32xf32>
    %908 = math.exp %907 : vector<2x32xf32>
    %cst_369 = arith.constant 1.000000e+00 : f32
    %909 = vector.broadcast %cst_369 : f32 to vector<2x32xf32>
    %910 = arith.addf %909, %908 : vector<2x32xf32>
    %911 = arith.divf %909, %910 : vector<2x32xf32>
    %912 = vector.extract_strided_slice %899 {offsets = [0, 64], sizes = [2, 32], strides = [1, 1]} : vector<2x128xf32> to vector<2x32xf32>
    %913 = math.tanh %912 : vector<2x32xf32>
    %914 = vector.extract_strided_slice %899 {offsets = [0, 96], sizes = [2, 32], strides = [1, 1]} : vector<2x128xf32> to vector<2x32xf32>
    %915 = arith.negf %914 : vector<2x32xf32>
    %916 = math.exp %915 : vector<2x32xf32>
    %cst_370 = arith.constant 1.000000e+00 : f32
    %917 = vector.broadcast %cst_370 : f32 to vector<2x32xf32>
    %918 = arith.addf %917, %916 : vector<2x32xf32>
    %919 = arith.divf %917, %918 : vector<2x32xf32>
    %920 = arith.mulf %911, %888 : vector<2x32xf32>
    %921 = arith.mulf %905, %913 : vector<2x32xf32>
    %922 = arith.addf %920, %921 : vector<2x32xf32>
    %923 = math.tanh %922 : vector<2x32xf32>
    %924 = arith.mulf %919, %923 : vector<2x32xf32>
    %925 = arith.index_cast %c4_i32_364 : i32 to index
    %c0_371 = arith.constant 0 : index
    %c0_372 = arith.constant 0 : index
    %926 = vector.load %arg8[%925, %c0_371, %c0_372] : memref<8x2x32xf32, #tpu.memory_space<vmem>>, vector<1x2x32xf32>
    %927 = vector.shape_cast %926 : vector<1x2x32xf32> to vector<2x32xf32>
    %928 = vector.shape_cast %924 : vector<2x32xf32> to vector<1x2x32xf32>
    tpu.vector_store %arg8[%925, %c0_371, %c0_372], %928 {strides = array<i32>} : memref<8x2x32xf32, #tpu.memory_space<vmem>>, vector<1x2x32xf32>,
    %c5_i32_373 = arith.constant 5 : i32
    %929 = arith.index_cast %c5_i32_373 : i32 to index
    %c0_374 = arith.constant 0 : index
    %c0_375 = arith.constant 0 : index
    %930 = vector.load %arg9[%929, %c0_374, %c0_375] : memref<8x2x128xf32, #tpu.memory_space<vmem>>, vector<1x2x128xf32>
    %931 = vector.shape_cast %930 : vector<1x2x128xf32> to vector<2x128xf32>
    %cst_376 = arith.constant dense<0.000000e+00> : vector<2x128xf32>
    %932 = tpu.matmul %924, %756, %cst_376 {dimension_numbers = #tpu.dot_dimension_numbers<[1], [0], [0], [1], [0, 0, 1, 1], [], []>} : vector<2x32xf32>, vector<32x128xf32>, vector<2x128xf32> -> vector<2x128xf32>
    %933 = arith.addf %931, %932 : vector<2x128xf32>
    %934 = vector.extract_strided_slice %933 {offsets = [0, 0], sizes = [2, 32], strides = [1, 1]} : vector<2x128xf32> to vector<2x32xf32>
    %935 = arith.negf %934 : vector<2x32xf32>
    %936 = math.exp %935 : vector<2x32xf32>
    %cst_377 = arith.constant 1.000000e+00 : f32
    %937 = vector.broadcast %cst_377 : f32 to vector<2x32xf32>
    %938 = arith.addf %937, %936 : vector<2x32xf32>
    %939 = arith.divf %937, %938 : vector<2x32xf32>
    %940 = vector.extract_strided_slice %933 {offsets = [0, 32], sizes = [2, 32], strides = [1, 1]} : vector<2x128xf32> to vector<2x32xf32>
    %941 = arith.negf %940 : vector<2x32xf32>
    %942 = math.exp %941 : vector<2x32xf32>
    %cst_378 = arith.constant 1.000000e+00 : f32
    %943 = vector.broadcast %cst_378 : f32 to vector<2x32xf32>
    %944 = arith.addf %943, %942 : vector<2x32xf32>
    %945 = arith.divf %943, %944 : vector<2x32xf32>
    %946 = vector.extract_strided_slice %933 {offsets = [0, 64], sizes = [2, 32], strides = [1, 1]} : vector<2x128xf32> to vector<2x32xf32>
    %947 = math.tanh %946 : vector<2x32xf32>
    %948 = vector.extract_strided_slice %933 {offsets = [0, 96], sizes = [2, 32], strides = [1, 1]} : vector<2x128xf32> to vector<2x32xf32>
    %949 = arith.negf %948 : vector<2x32xf32>
    %950 = math.exp %949 : vector<2x32xf32>
    %cst_379 = arith.constant 1.000000e+00 : f32
    %951 = vector.broadcast %cst_379 : f32 to vector<2x32xf32>
    %952 = arith.addf %951, %950 : vector<2x32xf32>
    %953 = arith.divf %951, %952 : vector<2x32xf32>
    %954 = arith.mulf %945, %922 : vector<2x32xf32>
    %955 = arith.mulf %939, %947 : vector<2x32xf32>
    %956 = arith.addf %954, %955 : vector<2x32xf32>
    %957 = math.tanh %956 : vector<2x32xf32>
    %958 = arith.mulf %953, %957 : vector<2x32xf32>
    %959 = arith.index_cast %c5_i32_373 : i32 to index
    %c0_380 = arith.constant 0 : index
    %c0_381 = arith.constant 0 : index
    %960 = vector.load %arg8[%959, %c0_380, %c0_381] : memref<8x2x32xf32, #tpu.memory_space<vmem>>, vector<1x2x32xf32>
    %961 = vector.shape_cast %960 : vector<1x2x32xf32> to vector<2x32xf32>
    %962 = vector.shape_cast %958 : vector<2x32xf32> to vector<1x2x32xf32>
    tpu.vector_store %arg8[%959, %c0_380, %c0_381], %962 {strides = array<i32>} : memref<8x2x32xf32, #tpu.memory_space<vmem>>, vector<1x2x32xf32>,
    %c6_i32_382 = arith.constant 6 : i32
    %963 = arith.index_cast %c6_i32_382 : i32 to index
    %c0_383 = arith.constant 0 : index
    %c0_384 = arith.constant 0 : index
    %964 = vector.load %arg9[%963, %c0_383, %c0_384] : memref<8x2x128xf32, #tpu.memory_space<vmem>>, vector<1x2x128xf32>
    %965 = vector.shape_cast %964 : vector<1x2x128xf32> to vector<2x128xf32>
    %cst_385 = arith.constant dense<0.000000e+00> : vector<2x128xf32>
    %966 = tpu.matmul %958, %756, %cst_385 {dimension_numbers = #tpu.dot_dimension_numbers<[1], [0], [0], [1], [0, 0, 1, 1], [], []>} : vector<2x32xf32>, vector<32x128xf32>, vector<2x128xf32> -> vector<2x128xf32>
    %967 = arith.addf %965, %966 : vector<2x128xf32>
    %968 = vector.extract_strided_slice %967 {offsets = [0, 0], sizes = [2, 32], strides = [1, 1]} : vector<2x128xf32> to vector<2x32xf32>
    %969 = arith.negf %968 : vector<2x32xf32>
    %970 = math.exp %969 : vector<2x32xf32>
    %cst_386 = arith.constant 1.000000e+00 : f32
    %971 = vector.broadcast %cst_386 : f32 to vector<2x32xf32>
    %972 = arith.addf %971, %970 : vector<2x32xf32>
    %973 = arith.divf %971, %972 : vector<2x32xf32>
    %974 = vector.extract_strided_slice %967 {offsets = [0, 32], sizes = [2, 32], strides = [1, 1]} : vector<2x128xf32> to vector<2x32xf32>
    %975 = arith.negf %974 : vector<2x32xf32>
    %976 = math.exp %975 : vector<2x32xf32>
    %cst_387 = arith.constant 1.000000e+00 : f32
    %977 = vector.broadcast %cst_387 : f32 to vector<2x32xf32>
    %978 = arith.addf %977, %976 : vector<2x32xf32>
    %979 = arith.divf %977, %978 : vector<2x32xf32>
    %980 = vector.extract_strided_slice %967 {offsets = [0, 64], sizes = [2, 32], strides = [1, 1]} : vector<2x128xf32> to vector<2x32xf32>
    %981 = math.tanh %980 : vector<2x32xf32>
    %982 = vector.extract_strided_slice %967 {offsets = [0, 96], sizes = [2, 32], strides = [1, 1]} : vector<2x128xf32> to vector<2x32xf32>
    %983 = arith.negf %982 : vector<2x32xf32>
    %984 = math.exp %983 : vector<2x32xf32>
    %cst_388 = arith.constant 1.000000e+00 : f32
    %985 = vector.broadcast %cst_388 : f32 to vector<2x32xf32>
    %986 = arith.addf %985, %984 : vector<2x32xf32>
    %987 = arith.divf %985, %986 : vector<2x32xf32>
    %988 = arith.mulf %979, %956 : vector<2x32xf32>
    %989 = arith.mulf %973, %981 : vector<2x32xf32>
    %990 = arith.addf %988, %989 : vector<2x32xf32>
    %991 = math.tanh %990 : vector<2x32xf32>
    %992 = arith.mulf %987, %991 : vector<2x32xf32>
    %993 = arith.index_cast %c6_i32_382 : i32 to index
    %c0_389 = arith.constant 0 : index
    %c0_390 = arith.constant 0 : index
    %994 = vector.load %arg8[%993, %c0_389, %c0_390] : memref<8x2x32xf32, #tpu.memory_space<vmem>>, vector<1x2x32xf32>
    %995 = vector.shape_cast %994 : vector<1x2x32xf32> to vector<2x32xf32>
    %996 = vector.shape_cast %992 : vector<2x32xf32> to vector<1x2x32xf32>
    tpu.vector_store %arg8[%993, %c0_389, %c0_390], %996 {strides = array<i32>} : memref<8x2x32xf32, #tpu.memory_space<vmem>>, vector<1x2x32xf32>,
    %c7_i32_391 = arith.constant 7 : i32
    %997 = arith.index_cast %c7_i32_391 : i32 to index
    %c0_392 = arith.constant 0 : index
    %c0_393 = arith.constant 0 : index
    %998 = vector.load %arg9[%997, %c0_392, %c0_393] : memref<8x2x128xf32, #tpu.memory_space<vmem>>, vector<1x2x128xf32>
    %999 = vector.shape_cast %998 : vector<1x2x128xf32> to vector<2x128xf32>
    %cst_394 = arith.constant dense<0.000000e+00> : vector<2x128xf32>
    %1000 = tpu.matmul %992, %756, %cst_394 {dimension_numbers = #tpu.dot_dimension_numbers<[1], [0], [0], [1], [0, 0, 1, 1], [], []>} : vector<2x32xf32>, vector<32x128xf32>, vector<2x128xf32> -> vector<2x128xf32>
    %1001 = arith.addf %999, %1000 : vector<2x128xf32>
    %1002 = vector.extract_strided_slice %1001 {offsets = [0, 0], sizes = [2, 32], strides = [1, 1]} : vector<2x128xf32> to vector<2x32xf32>
    %1003 = arith.negf %1002 : vector<2x32xf32>
    %1004 = math.exp %1003 : vector<2x32xf32>
    %cst_395 = arith.constant 1.000000e+00 : f32
    %1005 = vector.broadcast %cst_395 : f32 to vector<2x32xf32>
    %1006 = arith.addf %1005, %1004 : vector<2x32xf32>
    %1007 = arith.divf %1005, %1006 : vector<2x32xf32>
    %1008 = vector.extract_strided_slice %1001 {offsets = [0, 32], sizes = [2, 32], strides = [1, 1]} : vector<2x128xf32> to vector<2x32xf32>
    %1009 = arith.negf %1008 : vector<2x32xf32>
    %1010 = math.exp %1009 : vector<2x32xf32>
    %cst_396 = arith.constant 1.000000e+00 : f32
    %1011 = vector.broadcast %cst_396 : f32 to vector<2x32xf32>
    %1012 = arith.addf %1011, %1010 : vector<2x32xf32>
    %1013 = arith.divf %1011, %1012 : vector<2x32xf32>
    %1014 = vector.extract_strided_slice %1001 {offsets = [0, 64], sizes = [2, 32], strides = [1, 1]} : vector<2x128xf32> to vector<2x32xf32>
    %1015 = math.tanh %1014 : vector<2x32xf32>
    %1016 = vector.extract_strided_slice %1001 {offsets = [0, 96], sizes = [2, 32], strides = [1, 1]} : vector<2x128xf32> to vector<2x32xf32>
    %1017 = arith.negf %1016 : vector<2x32xf32>
    %1018 = math.exp %1017 : vector<2x32xf32>
    %cst_397 = arith.constant 1.000000e+00 : f32
    %1019 = vector.broadcast %cst_397 : f32 to vector<2x32xf32>
    %1020 = arith.addf %1019, %1018 : vector<2x32xf32>
    %1021 = arith.divf %1019, %1020 : vector<2x32xf32>
    %1022 = arith.mulf %1013, %990 : vector<2x32xf32>
    %1023 = arith.mulf %1007, %1015 : vector<2x32xf32>
    %1024 = arith.addf %1022, %1023 : vector<2x32xf32>
    %1025 = math.tanh %1024 : vector<2x32xf32>
    %1026 = arith.mulf %1021, %1025 : vector<2x32xf32>
    %1027 = arith.index_cast %c7_i32_391 : i32 to index
    %c0_398 = arith.constant 0 : index
    %c0_399 = arith.constant 0 : index
    %1028 = vector.load %arg8[%1027, %c0_398, %c0_399] : memref<8x2x32xf32, #tpu.memory_space<vmem>>, vector<1x2x32xf32>
    %1029 = vector.shape_cast %1028 : vector<1x2x32xf32> to vector<2x32xf32>
    %1030 = vector.shape_cast %1026 : vector<2x32xf32> to vector<1x2x32xf32>
    tpu.vector_store %arg8[%1027, %c0_398, %c0_399], %1030 {strides = array<i32>} : memref<8x2x32xf32, #tpu.memory_space<vmem>>, vector<1x2x32xf32>,
    %c8_i32_400 = arith.constant 8 : i32
    %c2_401 = arith.constant 2 : index
    %c0_402 = arith.constant 0 : index
    %c0_403 = arith.constant 0 : index
    %1031 = vector.load %arg2[%c2_401, %c0_402, %c0_403] : memref<3x32x128xf32, #tpu.memory_space<vmem>>, vector<1x32x128xf32>
    %1032 = vector.shape_cast %1031 : vector<1x32x128xf32> to vector<32x128xf32>
    %c3_404 = arith.constant 3 : index
    %c0_405 = arith.constant 0 : index
    %c0_406 = arith.constant 0 : index
    %1033 = vector.load %arg4[%c3_404, %c0_405, %c0_406] : memref<4x1x128xf32, #tpu.memory_space<vmem>>, vector<1x1x128xf32>
    %1034 = vector.shape_cast %1033 : vector<1x1x128xf32> to vector<1x128xf32>
    %c0_407 = arith.constant 0 : index
    %c0_408 = arith.constant 0 : index
    %c0_409 = arith.constant 0 : index
    %1035 = vector.load %arg8[%c0_407, %c0_408, %c0_409] : memref<8x2x32xf32, #tpu.memory_space<vmem>>, vector<1x2x32xf32>
    %1036 = vector.shape_cast %1035 : vector<1x2x32xf32> to vector<2x32xf32>
    %cst_410 = arith.constant dense<0.000000e+00> : vector<2x128xf32>
    %1037 = tpu.matmul %1036, %1032, %cst_410 {dimension_numbers = #tpu.dot_dimension_numbers<[1], [0], [0], [1], [0, 0, 1, 1], [], []>} : vector<2x32xf32>, vector<32x128xf32>, vector<2x128xf32> -> vector<2x128xf32>
    %1038 = vector.broadcast %1034 : vector<1x128xf32> to vector<2x128xf32>
    %1039 = arith.addf %1037, %1038 : vector<2x128xf32>
    %c0_411 = arith.constant 0 : index
    %c0_412 = arith.constant 0 : index
    %c0_413 = arith.constant 0 : index
    %1040 = vector.load %arg9[%c0_411, %c0_412, %c0_413] : memref<8x2x128xf32, #tpu.memory_space<vmem>>, vector<1x2x128xf32>
    %1041 = vector.shape_cast %1040 : vector<1x2x128xf32> to vector<2x128xf32>
    %1042 = vector.shape_cast %1039 : vector<2x128xf32> to vector<1x2x128xf32>
    tpu.vector_store %arg9[%c0_411, %c0_412, %c0_413], %1042 {strides = array<i32>} : memref<8x2x128xf32, #tpu.memory_space<vmem>>, vector<1x2x128xf32>,
    %c1_414 = arith.constant 1 : index
    %c0_415 = arith.constant 0 : index
    %c0_416 = arith.constant 0 : index
    %1043 = vector.load %arg8[%c1_414, %c0_415, %c0_416] : memref<8x2x32xf32, #tpu.memory_space<vmem>>, vector<1x2x32xf32>
    %1044 = vector.shape_cast %1043 : vector<1x2x32xf32> to vector<2x32xf32>
    %cst_417 = arith.constant dense<0.000000e+00> : vector<2x128xf32>
    %1045 = tpu.matmul %1044, %1032, %cst_417 {dimension_numbers = #tpu.dot_dimension_numbers<[1], [0], [0], [1], [0, 0, 1, 1], [], []>} : vector<2x32xf32>, vector<32x128xf32>, vector<2x128xf32> -> vector<2x128xf32>
    %1046 = vector.broadcast %1034 : vector<1x128xf32> to vector<2x128xf32>
    %1047 = arith.addf %1045, %1046 : vector<2x128xf32>
    %c1_418 = arith.constant 1 : index
    %c0_419 = arith.constant 0 : index
    %c0_420 = arith.constant 0 : index
    %1048 = vector.load %arg9[%c1_418, %c0_419, %c0_420] : memref<8x2x128xf32, #tpu.memory_space<vmem>>, vector<1x2x128xf32>
    %1049 = vector.shape_cast %1048 : vector<1x2x128xf32> to vector<2x128xf32>
    %1050 = vector.shape_cast %1047 : vector<2x128xf32> to vector<1x2x128xf32>
    tpu.vector_store %arg9[%c1_418, %c0_419, %c0_420], %1050 {strides = array<i32>} : memref<8x2x128xf32, #tpu.memory_space<vmem>>, vector<1x2x128xf32>,
    %c2_421 = arith.constant 2 : index
    %c0_422 = arith.constant 0 : index
    %c0_423 = arith.constant 0 : index
    %1051 = vector.load %arg8[%c2_421, %c0_422, %c0_423] : memref<8x2x32xf32, #tpu.memory_space<vmem>>, vector<1x2x32xf32>
    %1052 = vector.shape_cast %1051 : vector<1x2x32xf32> to vector<2x32xf32>
    %cst_424 = arith.constant dense<0.000000e+00> : vector<2x128xf32>
    %1053 = tpu.matmul %1052, %1032, %cst_424 {dimension_numbers = #tpu.dot_dimension_numbers<[1], [0], [0], [1], [0, 0, 1, 1], [], []>} : vector<2x32xf32>, vector<32x128xf32>, vector<2x128xf32> -> vector<2x128xf32>
    %1054 = vector.broadcast %1034 : vector<1x128xf32> to vector<2x128xf32>
    %1055 = arith.addf %1053, %1054 : vector<2x128xf32>
    %c2_425 = arith.constant 2 : index
    %c0_426 = arith.constant 0 : index
    %c0_427 = arith.constant 0 : index
    %1056 = vector.load %arg9[%c2_425, %c0_426, %c0_427] : memref<8x2x128xf32, #tpu.memory_space<vmem>>, vector<1x2x128xf32>
    %1057 = vector.shape_cast %1056 : vector<1x2x128xf32> to vector<2x128xf32>
    %1058 = vector.shape_cast %1055 : vector<2x128xf32> to vector<1x2x128xf32>
    tpu.vector_store %arg9[%c2_425, %c0_426, %c0_427], %1058 {strides = array<i32>} : memref<8x2x128xf32, #tpu.memory_space<vmem>>, vector<1x2x128xf32>,
    %c3_428 = arith.constant 3 : index
    %c0_429 = arith.constant 0 : index
    %c0_430 = arith.constant 0 : index
    %1059 = vector.load %arg8[%c3_428, %c0_429, %c0_430] : memref<8x2x32xf32, #tpu.memory_space<vmem>>, vector<1x2x32xf32>
    %1060 = vector.shape_cast %1059 : vector<1x2x32xf32> to vector<2x32xf32>
    %cst_431 = arith.constant dense<0.000000e+00> : vector<2x128xf32>
    %1061 = tpu.matmul %1060, %1032, %cst_431 {dimension_numbers = #tpu.dot_dimension_numbers<[1], [0], [0], [1], [0, 0, 1, 1], [], []>} : vector<2x32xf32>, vector<32x128xf32>, vector<2x128xf32> -> vector<2x128xf32>
    %1062 = vector.broadcast %1034 : vector<1x128xf32> to vector<2x128xf32>
    %1063 = arith.addf %1061, %1062 : vector<2x128xf32>
    %c3_432 = arith.constant 3 : index
    %c0_433 = arith.constant 0 : index
    %c0_434 = arith.constant 0 : index
    %1064 = vector.load %arg9[%c3_432, %c0_433, %c0_434] : memref<8x2x128xf32, #tpu.memory_space<vmem>>, vector<1x2x128xf32>
    %1065 = vector.shape_cast %1064 : vector<1x2x128xf32> to vector<2x128xf32>
    %1066 = vector.shape_cast %1063 : vector<2x128xf32> to vector<1x2x128xf32>
    tpu.vector_store %arg9[%c3_432, %c0_433, %c0_434], %1066 {strides = array<i32>} : memref<8x2x128xf32, #tpu.memory_space<vmem>>, vector<1x2x128xf32>,
    %c4_435 = arith.constant 4 : index
    %c0_436 = arith.constant 0 : index
    %c0_437 = arith.constant 0 : index
    %1067 = vector.load %arg8[%c4_435, %c0_436, %c0_437] : memref<8x2x32xf32, #tpu.memory_space<vmem>>, vector<1x2x32xf32>
    %1068 = vector.shape_cast %1067 : vector<1x2x32xf32> to vector<2x32xf32>
    %cst_438 = arith.constant dense<0.000000e+00> : vector<2x128xf32>
    %1069 = tpu.matmul %1068, %1032, %cst_438 {dimension_numbers = #tpu.dot_dimension_numbers<[1], [0], [0], [1], [0, 0, 1, 1], [], []>} : vector<2x32xf32>, vector<32x128xf32>, vector<2x128xf32> -> vector<2x128xf32>
    %1070 = vector.broadcast %1034 : vector<1x128xf32> to vector<2x128xf32>
    %1071 = arith.addf %1069, %1070 : vector<2x128xf32>
    %c4_439 = arith.constant 4 : index
    %c0_440 = arith.constant 0 : index
    %c0_441 = arith.constant 0 : index
    %1072 = vector.load %arg9[%c4_439, %c0_440, %c0_441] : memref<8x2x128xf32, #tpu.memory_space<vmem>>, vector<1x2x128xf32>
    %1073 = vector.shape_cast %1072 : vector<1x2x128xf32> to vector<2x128xf32>
    %1074 = vector.shape_cast %1071 : vector<2x128xf32> to vector<1x2x128xf32>
    tpu.vector_store %arg9[%c4_439, %c0_440, %c0_441], %1074 {strides = array<i32>} : memref<8x2x128xf32, #tpu.memory_space<vmem>>, vector<1x2x128xf32>,
    %c5_442 = arith.constant 5 : index
    %c0_443 = arith.constant 0 : index
    %c0_444 = arith.constant 0 : index
    %1075 = vector.load %arg8[%c5_442, %c0_443, %c0_444] : memref<8x2x32xf32, #tpu.memory_space<vmem>>, vector<1x2x32xf32>
    %1076 = vector.shape_cast %1075 : vector<1x2x32xf32> to vector<2x32xf32>
    %cst_445 = arith.constant dense<0.000000e+00> : vector<2x128xf32>
    %1077 = tpu.matmul %1076, %1032, %cst_445 {dimension_numbers = #tpu.dot_dimension_numbers<[1], [0], [0], [1], [0, 0, 1, 1], [], []>} : vector<2x32xf32>, vector<32x128xf32>, vector<2x128xf32> -> vector<2x128xf32>
    %1078 = vector.broadcast %1034 : vector<1x128xf32> to vector<2x128xf32>
    %1079 = arith.addf %1077, %1078 : vector<2x128xf32>
    %c5_446 = arith.constant 5 : index
    %c0_447 = arith.constant 0 : index
    %c0_448 = arith.constant 0 : index
    %1080 = vector.load %arg9[%c5_446, %c0_447, %c0_448] : memref<8x2x128xf32, #tpu.memory_space<vmem>>, vector<1x2x128xf32>
    %1081 = vector.shape_cast %1080 : vector<1x2x128xf32> to vector<2x128xf32>
    %1082 = vector.shape_cast %1079 : vector<2x128xf32> to vector<1x2x128xf32>
    tpu.vector_store %arg9[%c5_446, %c0_447, %c0_448], %1082 {strides = array<i32>} : memref<8x2x128xf32, #tpu.memory_space<vmem>>, vector<1x2x128xf32>,
    %c6_449 = arith.constant 6 : index
    %c0_450 = arith.constant 0 : index
    %c0_451 = arith.constant 0 : index
    %1083 = vector.load %arg8[%c6_449, %c0_450, %c0_451] : memref<8x2x32xf32, #tpu.memory_space<vmem>>, vector<1x2x32xf32>
    %1084 = vector.shape_cast %1083 : vector<1x2x32xf32> to vector<2x32xf32>
    %cst_452 = arith.constant dense<0.000000e+00> : vector<2x128xf32>
    %1085 = tpu.matmul %1084, %1032, %cst_452 {dimension_numbers = #tpu.dot_dimension_numbers<[1], [0], [0], [1], [0, 0, 1, 1], [], []>} : vector<2x32xf32>, vector<32x128xf32>, vector<2x128xf32> -> vector<2x128xf32>
    %1086 = vector.broadcast %1034 : vector<1x128xf32> to vector<2x128xf32>
    %1087 = arith.addf %1085, %1086 : vector<2x128xf32>
    %c6_453 = arith.constant 6 : index
    %c0_454 = arith.constant 0 : index
    %c0_455 = arith.constant 0 : index
    %1088 = vector.load %arg9[%c6_453, %c0_454, %c0_455] : memref<8x2x128xf32, #tpu.memory_space<vmem>>, vector<1x2x128xf32>
    %1089 = vector.shape_cast %1088 : vector<1x2x128xf32> to vector<2x128xf32>
    %1090 = vector.shape_cast %1087 : vector<2x128xf32> to vector<1x2x128xf32>
    tpu.vector_store %arg9[%c6_453, %c0_454, %c0_455], %1090 {strides = array<i32>} : memref<8x2x128xf32, #tpu.memory_space<vmem>>, vector<1x2x128xf32>,
    %c7_456 = arith.constant 7 : index
    %c0_457 = arith.constant 0 : index
    %c0_458 = arith.constant 0 : index
    %1091 = vector.load %arg8[%c7_456, %c0_457, %c0_458] : memref<8x2x32xf32, #tpu.memory_space<vmem>>, vector<1x2x32xf32>
    %1092 = vector.shape_cast %1091 : vector<1x2x32xf32> to vector<2x32xf32>
    %cst_459 = arith.constant dense<0.000000e+00> : vector<2x128xf32>
    %1093 = tpu.matmul %1092, %1032, %cst_459 {dimension_numbers = #tpu.dot_dimension_numbers<[1], [0], [0], [1], [0, 0, 1, 1], [], []>} : vector<2x32xf32>, vector<32x128xf32>, vector<2x128xf32> -> vector<2x128xf32>
    %1094 = vector.broadcast %1034 : vector<1x128xf32> to vector<2x128xf32>
    %1095 = arith.addf %1093, %1094 : vector<2x128xf32>
    %c7_460 = arith.constant 7 : index
    %c0_461 = arith.constant 0 : index
    %c0_462 = arith.constant 0 : index
    %1096 = vector.load %arg9[%c7_460, %c0_461, %c0_462] : memref<8x2x128xf32, #tpu.memory_space<vmem>>, vector<1x2x128xf32>
    %1097 = vector.shape_cast %1096 : vector<1x2x128xf32> to vector<2x128xf32>
    %1098 = vector.shape_cast %1095 : vector<2x128xf32> to vector<1x2x128xf32>
    tpu.vector_store %arg9[%c7_460, %c0_461, %c0_462], %1098 {strides = array<i32>} : memref<8x2x128xf32, #tpu.memory_space<vmem>>, vector<1x2x128xf32>,
    %c3_463 = arith.constant 3 : index
    %c0_464 = arith.constant 0 : index
    %c0_465 = arith.constant 0 : index
    %1099 = vector.load %arg3[%c3_463, %c0_464, %c0_465] : memref<4x32x128xf32, #tpu.memory_space<vmem>>, vector<1x32x128xf32>
    %1100 = vector.shape_cast %1099 : vector<1x32x128xf32> to vector<32x128xf32>
    %cst_466 = arith.constant 0.000000e+00 : f32
    %1101 = vector.broadcast %cst_466 : f32 to vector<2x32xf32>
    %cst_467 = arith.constant 0.000000e+00 : f32
    %1102 = vector.broadcast %cst_467 : f32 to vector<2x32xf32>
    %c0_i32_468 = arith.constant 0 : i32
    %1103 = arith.index_cast %c0_i32_468 : i32 to index
    %c0_469 = arith.constant 0 : index
    %c0_470 = arith.constant 0 : index
    %1104 = vector.load %arg9[%1103, %c0_469, %c0_470] : memref<8x2x128xf32, #tpu.memory_space<vmem>>, vector<1x2x128xf32>
    %1105 = vector.shape_cast %1104 : vector<1x2x128xf32> to vector<2x128xf32>
    %cst_471 = arith.constant dense<0.000000e+00> : vector<2x128xf32>
    %1106 = tpu.matmul %1101, %1100, %cst_471 {dimension_numbers = #tpu.dot_dimension_numbers<[1], [0], [0], [1], [0, 0, 1, 1], [], []>} : vector<2x32xf32>, vector<32x128xf32>, vector<2x128xf32> -> vector<2x128xf32>
    %1107 = arith.addf %1105, %1106 : vector<2x128xf32>
    %1108 = vector.extract_strided_slice %1107 {offsets = [0, 0], sizes = [2, 32], strides = [1, 1]} : vector<2x128xf32> to vector<2x32xf32>
    %1109 = arith.negf %1108 : vector<2x32xf32>
    %1110 = math.exp %1109 : vector<2x32xf32>
    %cst_472 = arith.constant 1.000000e+00 : f32
    %1111 = vector.broadcast %cst_472 : f32 to vector<2x32xf32>
    %1112 = arith.addf %1111, %1110 : vector<2x32xf32>
    %1113 = arith.divf %1111, %1112 : vector<2x32xf32>
    %1114 = vector.extract_strided_slice %1107 {offsets = [0, 32], sizes = [2, 32], strides = [1, 1]} : vector<2x128xf32> to vector<2x32xf32>
    %1115 = arith.negf %1114 : vector<2x32xf32>
    %1116 = math.exp %1115 : vector<2x32xf32>
    %cst_473 = arith.constant 1.000000e+00 : f32
    %1117 = vector.broadcast %cst_473 : f32 to vector<2x32xf32>
    %1118 = arith.addf %1117, %1116 : vector<2x32xf32>
    %1119 = arith.divf %1117, %1118 : vector<2x32xf32>
    %1120 = vector.extract_strided_slice %1107 {offsets = [0, 64], sizes = [2, 32], strides = [1, 1]} : vector<2x128xf32> to vector<2x32xf32>
    %1121 = math.tanh %1120 : vector<2x32xf32>
    %1122 = vector.extract_strided_slice %1107 {offsets = [0, 96], sizes = [2, 32], strides = [1, 1]} : vector<2x128xf32> to vector<2x32xf32>
    %1123 = arith.negf %1122 : vector<2x32xf32>
    %1124 = math.exp %1123 : vector<2x32xf32>
    %cst_474 = arith.constant 1.000000e+00 : f32
    %1125 = vector.broadcast %cst_474 : f32 to vector<2x32xf32>
    %1126 = arith.addf %1125, %1124 : vector<2x32xf32>
    %1127 = arith.divf %1125, %1126 : vector<2x32xf32>
    %1128 = arith.mulf %1119, %1102 : vector<2x32xf32>
    %1129 = arith.mulf %1113, %1121 : vector<2x32xf32>
    %1130 = arith.addf %1128, %1129 : vector<2x32xf32>
    %1131 = math.tanh %1130 : vector<2x32xf32>
    %1132 = arith.mulf %1127, %1131 : vector<2x32xf32>
    %c1_i32_475 = arith.constant 1 : i32
    %1133 = arith.index_cast %c1_i32_475 : i32 to index
    %c0_476 = arith.constant 0 : index
    %c0_477 = arith.constant 0 : index
    %1134 = vector.load %arg9[%1133, %c0_476, %c0_477] : memref<8x2x128xf32, #tpu.memory_space<vmem>>, vector<1x2x128xf32>
    %1135 = vector.shape_cast %1134 : vector<1x2x128xf32> to vector<2x128xf32>
    %cst_478 = arith.constant dense<0.000000e+00> : vector<2x128xf32>
    %1136 = tpu.matmul %1132, %1100, %cst_478 {dimension_numbers = #tpu.dot_dimension_numbers<[1], [0], [0], [1], [0, 0, 1, 1], [], []>} : vector<2x32xf32>, vector<32x128xf32>, vector<2x128xf32> -> vector<2x128xf32>
    %1137 = arith.addf %1135, %1136 : vector<2x128xf32>
    %1138 = vector.extract_strided_slice %1137 {offsets = [0, 0], sizes = [2, 32], strides = [1, 1]} : vector<2x128xf32> to vector<2x32xf32>
    %1139 = arith.negf %1138 : vector<2x32xf32>
    %1140 = math.exp %1139 : vector<2x32xf32>
    %cst_479 = arith.constant 1.000000e+00 : f32
    %1141 = vector.broadcast %cst_479 : f32 to vector<2x32xf32>
    %1142 = arith.addf %1141, %1140 : vector<2x32xf32>
    %1143 = arith.divf %1141, %1142 : vector<2x32xf32>
    %1144 = vector.extract_strided_slice %1137 {offsets = [0, 32], sizes = [2, 32], strides = [1, 1]} : vector<2x128xf32> to vector<2x32xf32>
    %1145 = arith.negf %1144 : vector<2x32xf32>
    %1146 = math.exp %1145 : vector<2x32xf32>
    %cst_480 = arith.constant 1.000000e+00 : f32
    %1147 = vector.broadcast %cst_480 : f32 to vector<2x32xf32>
    %1148 = arith.addf %1147, %1146 : vector<2x32xf32>
    %1149 = arith.divf %1147, %1148 : vector<2x32xf32>
    %1150 = vector.extract_strided_slice %1137 {offsets = [0, 64], sizes = [2, 32], strides = [1, 1]} : vector<2x128xf32> to vector<2x32xf32>
    %1151 = math.tanh %1150 : vector<2x32xf32>
    %1152 = vector.extract_strided_slice %1137 {offsets = [0, 96], sizes = [2, 32], strides = [1, 1]} : vector<2x128xf32> to vector<2x32xf32>
    %1153 = arith.negf %1152 : vector<2x32xf32>
    %1154 = math.exp %1153 : vector<2x32xf32>
    %cst_481 = arith.constant 1.000000e+00 : f32
    %1155 = vector.broadcast %cst_481 : f32 to vector<2x32xf32>
    %1156 = arith.addf %1155, %1154 : vector<2x32xf32>
    %1157 = arith.divf %1155, %1156 : vector<2x32xf32>
    %1158 = arith.mulf %1149, %1130 : vector<2x32xf32>
    %1159 = arith.mulf %1143, %1151 : vector<2x32xf32>
    %1160 = arith.addf %1158, %1159 : vector<2x32xf32>
    %1161 = math.tanh %1160 : vector<2x32xf32>
    %1162 = arith.mulf %1157, %1161 : vector<2x32xf32>
    %c2_i32_482 = arith.constant 2 : i32
    %1163 = arith.index_cast %c2_i32_482 : i32 to index
    %c0_483 = arith.constant 0 : index
    %c0_484 = arith.constant 0 : index
    %1164 = vector.load %arg9[%1163, %c0_483, %c0_484] : memref<8x2x128xf32, #tpu.memory_space<vmem>>, vector<1x2x128xf32>
    %1165 = vector.shape_cast %1164 : vector<1x2x128xf32> to vector<2x128xf32>
    %cst_485 = arith.constant dense<0.000000e+00> : vector<2x128xf32>
    %1166 = tpu.matmul %1162, %1100, %cst_485 {dimension_numbers = #tpu.dot_dimension_numbers<[1], [0], [0], [1], [0, 0, 1, 1], [], []>} : vector<2x32xf32>, vector<32x128xf32>, vector<2x128xf32> -> vector<2x128xf32>
    %1167 = arith.addf %1165, %1166 : vector<2x128xf32>
    %1168 = vector.extract_strided_slice %1167 {offsets = [0, 0], sizes = [2, 32], strides = [1, 1]} : vector<2x128xf32> to vector<2x32xf32>
    %1169 = arith.negf %1168 : vector<2x32xf32>
    %1170 = math.exp %1169 : vector<2x32xf32>
    %cst_486 = arith.constant 1.000000e+00 : f32
    %1171 = vector.broadcast %cst_486 : f32 to vector<2x32xf32>
    %1172 = arith.addf %1171, %1170 : vector<2x32xf32>
    %1173 = arith.divf %1171, %1172 : vector<2x32xf32>
    %1174 = vector.extract_strided_slice %1167 {offsets = [0, 32], sizes = [2, 32], strides = [1, 1]} : vector<2x128xf32> to vector<2x32xf32>
    %1175 = arith.negf %1174 : vector<2x32xf32>
    %1176 = math.exp %1175 : vector<2x32xf32>
    %cst_487 = arith.constant 1.000000e+00 : f32
    %1177 = vector.broadcast %cst_487 : f32 to vector<2x32xf32>
    %1178 = arith.addf %1177, %1176 : vector<2x32xf32>
    %1179 = arith.divf %1177, %1178 : vector<2x32xf32>
    %1180 = vector.extract_strided_slice %1167 {offsets = [0, 64], sizes = [2, 32], strides = [1, 1]} : vector<2x128xf32> to vector<2x32xf32>
    %1181 = math.tanh %1180 : vector<2x32xf32>
    %1182 = vector.extract_strided_slice %1167 {offsets = [0, 96], sizes = [2, 32], strides = [1, 1]} : vector<2x128xf32> to vector<2x32xf32>
    %1183 = arith.negf %1182 : vector<2x32xf32>
    %1184 = math.exp %1183 : vector<2x32xf32>
    %cst_488 = arith.constant 1.000000e+00 : f32
    %1185 = vector.broadcast %cst_488 : f32 to vector<2x32xf32>
    %1186 = arith.addf %1185, %1184 : vector<2x32xf32>
    %1187 = arith.divf %1185, %1186 : vector<2x32xf32>
    %1188 = arith.mulf %1179, %1160 : vector<2x32xf32>
    %1189 = arith.mulf %1173, %1181 : vector<2x32xf32>
    %1190 = arith.addf %1188, %1189 : vector<2x32xf32>
    %1191 = math.tanh %1190 : vector<2x32xf32>
    %1192 = arith.mulf %1187, %1191 : vector<2x32xf32>
    %c3_i32_489 = arith.constant 3 : i32
    %1193 = arith.index_cast %c3_i32_489 : i32 to index
    %c0_490 = arith.constant 0 : index
    %c0_491 = arith.constant 0 : index
    %1194 = vector.load %arg9[%1193, %c0_490, %c0_491] : memref<8x2x128xf32, #tpu.memory_space<vmem>>, vector<1x2x128xf32>
    %1195 = vector.shape_cast %1194 : vector<1x2x128xf32> to vector<2x128xf32>
    %cst_492 = arith.constant dense<0.000000e+00> : vector<2x128xf32>
    %1196 = tpu.matmul %1192, %1100, %cst_492 {dimension_numbers = #tpu.dot_dimension_numbers<[1], [0], [0], [1], [0, 0, 1, 1], [], []>} : vector<2x32xf32>, vector<32x128xf32>, vector<2x128xf32> -> vector<2x128xf32>
    %1197 = arith.addf %1195, %1196 : vector<2x128xf32>
    %1198 = vector.extract_strided_slice %1197 {offsets = [0, 0], sizes = [2, 32], strides = [1, 1]} : vector<2x128xf32> to vector<2x32xf32>
    %1199 = arith.negf %1198 : vector<2x32xf32>
    %1200 = math.exp %1199 : vector<2x32xf32>
    %cst_493 = arith.constant 1.000000e+00 : f32
    %1201 = vector.broadcast %cst_493 : f32 to vector<2x32xf32>
    %1202 = arith.addf %1201, %1200 : vector<2x32xf32>
    %1203 = arith.divf %1201, %1202 : vector<2x32xf32>
    %1204 = vector.extract_strided_slice %1197 {offsets = [0, 32], sizes = [2, 32], strides = [1, 1]} : vector<2x128xf32> to vector<2x32xf32>
    %1205 = arith.negf %1204 : vector<2x32xf32>
    %1206 = math.exp %1205 : vector<2x32xf32>
    %cst_494 = arith.constant 1.000000e+00 : f32
    %1207 = vector.broadcast %cst_494 : f32 to vector<2x32xf32>
    %1208 = arith.addf %1207, %1206 : vector<2x32xf32>
    %1209 = arith.divf %1207, %1208 : vector<2x32xf32>
    %1210 = vector.extract_strided_slice %1197 {offsets = [0, 64], sizes = [2, 32], strides = [1, 1]} : vector<2x128xf32> to vector<2x32xf32>
    %1211 = math.tanh %1210 : vector<2x32xf32>
    %1212 = vector.extract_strided_slice %1197 {offsets = [0, 96], sizes = [2, 32], strides = [1, 1]} : vector<2x128xf32> to vector<2x32xf32>
    %1213 = arith.negf %1212 : vector<2x32xf32>
    %1214 = math.exp %1213 : vector<2x32xf32>
    %cst_495 = arith.constant 1.000000e+00 : f32
    %1215 = vector.broadcast %cst_495 : f32 to vector<2x32xf32>
    %1216 = arith.addf %1215, %1214 : vector<2x32xf32>
    %1217 = arith.divf %1215, %1216 : vector<2x32xf32>
    %1218 = arith.mulf %1209, %1190 : vector<2x32xf32>
    %1219 = arith.mulf %1203, %1211 : vector<2x32xf32>
    %1220 = arith.addf %1218, %1219 : vector<2x32xf32>
    %1221 = math.tanh %1220 : vector<2x32xf32>
    %1222 = arith.mulf %1217, %1221 : vector<2x32xf32>
    %c4_i32_496 = arith.constant 4 : i32
    %1223 = arith.index_cast %c4_i32_496 : i32 to index
    %c0_497 = arith.constant 0 : index
    %c0_498 = arith.constant 0 : index
    %1224 = vector.load %arg9[%1223, %c0_497, %c0_498] : memref<8x2x128xf32, #tpu.memory_space<vmem>>, vector<1x2x128xf32>
    %1225 = vector.shape_cast %1224 : vector<1x2x128xf32> to vector<2x128xf32>
    %cst_499 = arith.constant dense<0.000000e+00> : vector<2x128xf32>
    %1226 = tpu.matmul %1222, %1100, %cst_499 {dimension_numbers = #tpu.dot_dimension_numbers<[1], [0], [0], [1], [0, 0, 1, 1], [], []>} : vector<2x32xf32>, vector<32x128xf32>, vector<2x128xf32> -> vector<2x128xf32>
    %1227 = arith.addf %1225, %1226 : vector<2x128xf32>
    %1228 = vector.extract_strided_slice %1227 {offsets = [0, 0], sizes = [2, 32], strides = [1, 1]} : vector<2x128xf32> to vector<2x32xf32>
    %1229 = arith.negf %1228 : vector<2x32xf32>
    %1230 = math.exp %1229 : vector<2x32xf32>
    %cst_500 = arith.constant 1.000000e+00 : f32
    %1231 = vector.broadcast %cst_500 : f32 to vector<2x32xf32>
    %1232 = arith.addf %1231, %1230 : vector<2x32xf32>
    %1233 = arith.divf %1231, %1232 : vector<2x32xf32>
    %1234 = vector.extract_strided_slice %1227 {offsets = [0, 32], sizes = [2, 32], strides = [1, 1]} : vector<2x128xf32> to vector<2x32xf32>
    %1235 = arith.negf %1234 : vector<2x32xf32>
    %1236 = math.exp %1235 : vector<2x32xf32>
    %cst_501 = arith.constant 1.000000e+00 : f32
    %1237 = vector.broadcast %cst_501 : f32 to vector<2x32xf32>
    %1238 = arith.addf %1237, %1236 : vector<2x32xf32>
    %1239 = arith.divf %1237, %1238 : vector<2x32xf32>
    %1240 = vector.extract_strided_slice %1227 {offsets = [0, 64], sizes = [2, 32], strides = [1, 1]} : vector<2x128xf32> to vector<2x32xf32>
    %1241 = math.tanh %1240 : vector<2x32xf32>
    %1242 = vector.extract_strided_slice %1227 {offsets = [0, 96], sizes = [2, 32], strides = [1, 1]} : vector<2x128xf32> to vector<2x32xf32>
    %1243 = arith.negf %1242 : vector<2x32xf32>
    %1244 = math.exp %1243 : vector<2x32xf32>
    %cst_502 = arith.constant 1.000000e+00 : f32
    %1245 = vector.broadcast %cst_502 : f32 to vector<2x32xf32>
    %1246 = arith.addf %1245, %1244 : vector<2x32xf32>
    %1247 = arith.divf %1245, %1246 : vector<2x32xf32>
    %1248 = arith.mulf %1239, %1220 : vector<2x32xf32>
    %1249 = arith.mulf %1233, %1241 : vector<2x32xf32>
    %1250 = arith.addf %1248, %1249 : vector<2x32xf32>
    %1251 = math.tanh %1250 : vector<2x32xf32>
    %1252 = arith.mulf %1247, %1251 : vector<2x32xf32>
    %c5_i32_503 = arith.constant 5 : i32
    %1253 = arith.index_cast %c5_i32_503 : i32 to index
    %c0_504 = arith.constant 0 : index
    %c0_505 = arith.constant 0 : index
    %1254 = vector.load %arg9[%1253, %c0_504, %c0_505] : memref<8x2x128xf32, #tpu.memory_space<vmem>>, vector<1x2x128xf32>
    %1255 = vector.shape_cast %1254 : vector<1x2x128xf32> to vector<2x128xf32>
    %cst_506 = arith.constant dense<0.000000e+00> : vector<2x128xf32>
    %1256 = tpu.matmul %1252, %1100, %cst_506 {dimension_numbers = #tpu.dot_dimension_numbers<[1], [0], [0], [1], [0, 0, 1, 1], [], []>} : vector<2x32xf32>, vector<32x128xf32>, vector<2x128xf32> -> vector<2x128xf32>
    %1257 = arith.addf %1255, %1256 : vector<2x128xf32>
    %1258 = vector.extract_strided_slice %1257 {offsets = [0, 0], sizes = [2, 32], strides = [1, 1]} : vector<2x128xf32> to vector<2x32xf32>
    %1259 = arith.negf %1258 : vector<2x32xf32>
    %1260 = math.exp %1259 : vector<2x32xf32>
    %cst_507 = arith.constant 1.000000e+00 : f32
    %1261 = vector.broadcast %cst_507 : f32 to vector<2x32xf32>
    %1262 = arith.addf %1261, %1260 : vector<2x32xf32>
    %1263 = arith.divf %1261, %1262 : vector<2x32xf32>
    %1264 = vector.extract_strided_slice %1257 {offsets = [0, 32], sizes = [2, 32], strides = [1, 1]} : vector<2x128xf32> to vector<2x32xf32>
    %1265 = arith.negf %1264 : vector<2x32xf32>
    %1266 = math.exp %1265 : vector<2x32xf32>
    %cst_508 = arith.constant 1.000000e+00 : f32
    %1267 = vector.broadcast %cst_508 : f32 to vector<2x32xf32>
    %1268 = arith.addf %1267, %1266 : vector<2x32xf32>
    %1269 = arith.divf %1267, %1268 : vector<2x32xf32>
    %1270 = vector.extract_strided_slice %1257 {offsets = [0, 64], sizes = [2, 32], strides = [1, 1]} : vector<2x128xf32> to vector<2x32xf32>
    %1271 = math.tanh %1270 : vector<2x32xf32>
    %1272 = vector.extract_strided_slice %1257 {offsets = [0, 96], sizes = [2, 32], strides = [1, 1]} : vector<2x128xf32> to vector<2x32xf32>
    %1273 = arith.negf %1272 : vector<2x32xf32>
    %1274 = math.exp %1273 : vector<2x32xf32>
    %cst_509 = arith.constant 1.000000e+00 : f32
    %1275 = vector.broadcast %cst_509 : f32 to vector<2x32xf32>
    %1276 = arith.addf %1275, %1274 : vector<2x32xf32>
    %1277 = arith.divf %1275, %1276 : vector<2x32xf32>
    %1278 = arith.mulf %1269, %1250 : vector<2x32xf32>
    %1279 = arith.mulf %1263, %1271 : vector<2x32xf32>
    %1280 = arith.addf %1278, %1279 : vector<2x32xf32>
    %1281 = math.tanh %1280 : vector<2x32xf32>
    %1282 = arith.mulf %1277, %1281 : vector<2x32xf32>
    %c6_i32_510 = arith.constant 6 : i32
    %1283 = arith.index_cast %c6_i32_510 : i32 to index
    %c0_511 = arith.constant 0 : index
    %c0_512 = arith.constant 0 : index
    %1284 = vector.load %arg9[%1283, %c0_511, %c0_512] : memref<8x2x128xf32, #tpu.memory_space<vmem>>, vector<1x2x128xf32>
    %1285 = vector.shape_cast %1284 : vector<1x2x128xf32> to vector<2x128xf32>
    %cst_513 = arith.constant dense<0.000000e+00> : vector<2x128xf32>
    %1286 = tpu.matmul %1282, %1100, %cst_513 {dimension_numbers = #tpu.dot_dimension_numbers<[1], [0], [0], [1], [0, 0, 1, 1], [], []>} : vector<2x32xf32>, vector<32x128xf32>, vector<2x128xf32> -> vector<2x128xf32>
    %1287 = arith.addf %1285, %1286 : vector<2x128xf32>
    %1288 = vector.extract_strided_slice %1287 {offsets = [0, 0], sizes = [2, 32], strides = [1, 1]} : vector<2x128xf32> to vector<2x32xf32>
    %1289 = arith.negf %1288 : vector<2x32xf32>
    %1290 = math.exp %1289 : vector<2x32xf32>
    %cst_514 = arith.constant 1.000000e+00 : f32
    %1291 = vector.broadcast %cst_514 : f32 to vector<2x32xf32>
    %1292 = arith.addf %1291, %1290 : vector<2x32xf32>
    %1293 = arith.divf %1291, %1292 : vector<2x32xf32>
    %1294 = vector.extract_strided_slice %1287 {offsets = [0, 32], sizes = [2, 32], strides = [1, 1]} : vector<2x128xf32> to vector<2x32xf32>
    %1295 = arith.negf %1294 : vector<2x32xf32>
    %1296 = math.exp %1295 : vector<2x32xf32>
    %cst_515 = arith.constant 1.000000e+00 : f32
    %1297 = vector.broadcast %cst_515 : f32 to vector<2x32xf32>
    %1298 = arith.addf %1297, %1296 : vector<2x32xf32>
    %1299 = arith.divf %1297, %1298 : vector<2x32xf32>
    %1300 = vector.extract_strided_slice %1287 {offsets = [0, 64], sizes = [2, 32], strides = [1, 1]} : vector<2x128xf32> to vector<2x32xf32>
    %1301 = math.tanh %1300 : vector<2x32xf32>
    %1302 = vector.extract_strided_slice %1287 {offsets = [0, 96], sizes = [2, 32], strides = [1, 1]} : vector<2x128xf32> to vector<2x32xf32>
    %1303 = arith.negf %1302 : vector<2x32xf32>
    %1304 = math.exp %1303 : vector<2x32xf32>
    %cst_516 = arith.constant 1.000000e+00 : f32
    %1305 = vector.broadcast %cst_516 : f32 to vector<2x32xf32>
    %1306 = arith.addf %1305, %1304 : vector<2x32xf32>
    %1307 = arith.divf %1305, %1306 : vector<2x32xf32>
    %1308 = arith.mulf %1299, %1280 : vector<2x32xf32>
    %1309 = arith.mulf %1293, %1301 : vector<2x32xf32>
    %1310 = arith.addf %1308, %1309 : vector<2x32xf32>
    %1311 = math.tanh %1310 : vector<2x32xf32>
    %1312 = arith.mulf %1307, %1311 : vector<2x32xf32>
    %c7_i32_517 = arith.constant 7 : i32
    %1313 = arith.index_cast %c7_i32_517 : i32 to index
    %c0_518 = arith.constant 0 : index
    %c0_519 = arith.constant 0 : index
    %1314 = vector.load %arg9[%1313, %c0_518, %c0_519] : memref<8x2x128xf32, #tpu.memory_space<vmem>>, vector<1x2x128xf32>
    %1315 = vector.shape_cast %1314 : vector<1x2x128xf32> to vector<2x128xf32>
    %cst_520 = arith.constant dense<0.000000e+00> : vector<2x128xf32>
    %1316 = tpu.matmul %1312, %1100, %cst_520 {dimension_numbers = #tpu.dot_dimension_numbers<[1], [0], [0], [1], [0, 0, 1, 1], [], []>} : vector<2x32xf32>, vector<32x128xf32>, vector<2x128xf32> -> vector<2x128xf32>
    %1317 = arith.addf %1315, %1316 : vector<2x128xf32>
    %1318 = vector.extract_strided_slice %1317 {offsets = [0, 0], sizes = [2, 32], strides = [1, 1]} : vector<2x128xf32> to vector<2x32xf32>
    %1319 = arith.negf %1318 : vector<2x32xf32>
    %1320 = math.exp %1319 : vector<2x32xf32>
    %cst_521 = arith.constant 1.000000e+00 : f32
    %1321 = vector.broadcast %cst_521 : f32 to vector<2x32xf32>
    %1322 = arith.addf %1321, %1320 : vector<2x32xf32>
    %1323 = arith.divf %1321, %1322 : vector<2x32xf32>
    %1324 = vector.extract_strided_slice %1317 {offsets = [0, 32], sizes = [2, 32], strides = [1, 1]} : vector<2x128xf32> to vector<2x32xf32>
    %1325 = arith.negf %1324 : vector<2x32xf32>
    %1326 = math.exp %1325 : vector<2x32xf32>
    %cst_522 = arith.constant 1.000000e+00 : f32
    %1327 = vector.broadcast %cst_522 : f32 to vector<2x32xf32>
    %1328 = arith.addf %1327, %1326 : vector<2x32xf32>
    %1329 = arith.divf %1327, %1328 : vector<2x32xf32>
    %1330 = vector.extract_strided_slice %1317 {offsets = [0, 64], sizes = [2, 32], strides = [1, 1]} : vector<2x128xf32> to vector<2x32xf32>
    %1331 = math.tanh %1330 : vector<2x32xf32>
    %1332 = vector.extract_strided_slice %1317 {offsets = [0, 96], sizes = [2, 32], strides = [1, 1]} : vector<2x128xf32> to vector<2x32xf32>
    %1333 = arith.negf %1332 : vector<2x32xf32>
    %1334 = math.exp %1333 : vector<2x32xf32>
    %cst_523 = arith.constant 1.000000e+00 : f32
    %1335 = vector.broadcast %cst_523 : f32 to vector<2x32xf32>
    %1336 = arith.addf %1335, %1334 : vector<2x32xf32>
    %1337 = arith.divf %1335, %1336 : vector<2x32xf32>
    %1338 = arith.mulf %1329, %1310 : vector<2x32xf32>
    %1339 = arith.mulf %1323, %1331 : vector<2x32xf32>
    %1340 = arith.addf %1338, %1339 : vector<2x32xf32>
    %1341 = math.tanh %1340 : vector<2x32xf32>
    %1342 = arith.mulf %1337, %1341 : vector<2x32xf32>
    %c8_i32_524 = arith.constant 8 : i32
    %c0_525 = arith.constant 0 : index
    %c0_526 = arith.constant 0 : index
    %1343 = vector.load %arg5[%c0_525, %c0_526] : memref<32x10xf32, #tpu.memory_space<vmem>>, vector<32x10xf32>
    %cst_527 = arith.constant dense<0.000000e+00> : vector<2x10xf32>
    %1344 = tpu.matmul %1342, %1343, %cst_527 {dimension_numbers = #tpu.dot_dimension_numbers<[1], [0], [0], [1], [0, 0, 1, 1], [], []>} : vector<2x32xf32>, vector<32x10xf32>, vector<2x10xf32> -> vector<2x10xf32>
    %c0_528 = arith.constant 0 : index
    %c0_529 = arith.constant 0 : index
    %1345 = vector.load %arg6[%c0_528, %c0_529] : memref<1x10xf32, #tpu.memory_space<vmem>>, vector<1x10xf32>
    %1346 = vector.broadcast %1345 : vector<1x10xf32> to vector<2x10xf32>
    %1347 = arith.addf %1344, %1346 : vector<2x10xf32>
    %c0_530 = arith.constant 0 : index
    %c0_531 = arith.constant 0 : index
    %1348 = vector.load %arg7[%c0_530, %c0_531] : memref<2x10xf32, #tpu.memory_space<vmem>>, vector<2x10xf32>
    tpu.vector_store %arg7[%c0_530, %c0_531], %1347 {strides = array<i32>} : memref<2x10xf32, #tpu.memory_space<vmem>>, vector<2x10xf32>,
    return
  }
}

</mosaic_0001>

<bundles_post_ra>
// kernel: tpu_custom_call.1
= control target key start
LH: loop header
LB: loop body
LE: loop exit
PB: predicated region body
PF: predicated region fallthrough
CT: control target
= control target key end

     0   :  { %12 = vsyncpa [#allocation5], 0  ;;  %s8727_s0 = inlined_call_operand.hbm [shape: f32[8,2,40], index: 0, kind: input, shape index: {}]   ;;  %s8728_s1 = inlined_call_operand.vmem [shape: f32[40,128], index: 1, kind: input, shape index: {}]   ;;  %s8729_s2 = inlined_call_operand.hbm [shape: f32[3,32,128], index: 2, kind: input, shape index: {}]   ;;  %s8730_s3 = inlined_call_operand.hbm [shape: f32[4,32,128], index: 3, kind: input, shape index: {}]   ;;  %s8731_s4 = inlined_call_operand.vmem [shape: f32[4,1,128], index: 4, kind: input, shape index: {}]   ;;  %s8732_s5 = inlined_call_operand.vmem [shape: f32[32,10], index: 5, kind: input, shape index: {}]   ;;  %s8733_s6 = inlined_call_operand.vmem [shape: f32[1,10], index: 6, kind: input, shape index: {}]   ;;  %s8734_s7 = inlined_call_operand.hbm [shape: f32[2,10], index: 7, kind: output, shape index: {}]  }
   0x1   :  { %13 = vsyncpa [#allocation8], 0 }
   0x2   :  { %14 = vsyncpa [#allocation6], 0  ;;  %s7854_s24 = smov [#allocation7]   ;;  %s7760_s28 = scalar_lea.hbm %s8729_s2, 1536 }
   0x3   :  { %s34_s25 = sshll.u32 %s7854_s24, 4  ;;  %p7761_p0 = scmp.ne.s32.totalorder %s8729_s2, %s7760_s28  ;;  %s35_s25 = int_to_ptr.vmem [resolvable:$true] %s34_s25 }
   0x4   :  { %p7764_p1 = scmp.lt.u32.totalorder %s7760_s28, %s8729_s2 }
   0x6   :  { %p7766_p2 = pnand %p7764_p1, %p7761_p0 }
   0x8   :  { %7769 = shalt.err (!%p7766_p2)
}
   0x9   :  { %s7770_s10 = scalar_lea.vmem %s35_s25, 1536  ;;  %p7775_p4 = scmp.lt.s32.totalorder %s35_s25, %s35_s25 }
   0xa   :  { %p7771_p3 = scmp.ne.s32.totalorder %s35_s25, %s7770_s10  ;;  %p7776_p5 = scmp.lt.s32.totalorder %s7770_s10, %s7770_s10 }
   0xc   :  { %p7777_p6 = por %p7776_p5, %p7775_p4 }
   0xe   :  { %p7778_p7 = pnand %p7777_p6, %p7771_p3 }
  0x10   :  { %7781 = shalt.err (!%p7778_p7)
}
  0x11   :  { %s7855_s11 = smov 128   ;;  %s7856_s12 = smov 8  }
  0x12   :  { %40 = dma.hbm_to_vmem [thread:$0]  %s8729_s2, 1536, %s35_s25, [#allocation8], %s7855_s11, %s7855_s11, %s7856_s12  }
  0x13   :  { %s7857_s15 = smov [#allocation4]   ;;  %s7782_s19 = scalar_lea.hbm %s8727_s0, 256 }
  0x14   :  { %s20_s16 = sshll.u32 %s7857_s15, 4  ;;  %p7783_p8 = scmp.ne.s32.totalorder %s8727_s0, %s7782_s19  ;;  %s21_s16 = int_to_ptr.vmem [resolvable:$true] %s20_s16 }
  0x15   :  { %p7786_p9 = scmp.lt.u32.totalorder %s7782_s19, %s8727_s0 }
  0x17   :  { %p7788_p10 = pnand %p7786_p9, %p7783_p8 }
  0x19   :  { %7791 = shalt.err (!%p7788_p10)
}
  0x1a   :  { %s7792_s24 = scalar_lea.vmem %s21_s16, 256  ;;  %p7797_p12 = scmp.lt.s32.totalorder %s21_s16, %s21_s16 }
  0x1b   :  { %p7793_p11 = scmp.ne.s32.totalorder %s21_s16, %s7792_s24  ;;  %p7798_p13 = scmp.lt.s32.totalorder %s7792_s24, %s7792_s24 }
  0x1d   :  { %p7799_p0 = por %p7798_p13, %p7797_p12 }
  0x1f   :  { %p7800_p1 = pnand %p7799_p0, %p7793_p11 }
  0x21   :  { %7803 = shalt.err (!%p7800_p1)
}
  0x22   :  { %s7858_s2 = smov 32   ;;  %s7859_s25 = smov 2  }
  0x23   :  { %26 = dma.hbm_to_vmem [thread:$0]  %s8727_s0, 256, %s21_s16, [#allocation5], %s7858_s2, %s7858_s2, %s7859_s25  }
  0x24   :  { %s7860_s28 = smov [#allocation9]   ;;  %s7804_s9 = scalar_lea.hbm %s8730_s3, 2048 }
  0x25   :  { %s46_s29 = sshll.u32 %s7860_s28, 4  ;;  %p7805_p2 = scmp.ne.s32.totalorder %s8730_s3, %s7804_s9  ;;  %s47_s29 = int_to_ptr.vmem [resolvable:$true] %s46_s29 }
  0x26   :  { %p7808_p3 = scmp.lt.u32.totalorder %s7804_s9, %s8730_s3 }
  0x28   :  { %p7810_p4 = pnand %p7808_p3, %p7805_p2 }
  0x2a   :  { %7813 = shalt.err (!%p7810_p4)
}
  0x2b   :  { %s7814_s17 = scalar_lea.vmem %s47_s29, 2048  ;;  %p7819_p6 = scmp.lt.s32.totalorder %s47_s29, %s47_s29 }
  0x2c   :  { %p7815_p5 = scmp.ne.s32.totalorder %s47_s29, %s7814_s17  ;;  %p7820_p7 = scmp.lt.s32.totalorder %s7814_s17, %s7814_s17 }
  0x2e   :  { %p7821_p8 = por %p7820_p7, %p7819_p6 }
  0x30   :  { %p7822_p9 = pnand %p7821_p8, %p7815_p5 }
  0x32   :  { %7825 = shalt.err (!%p7822_p9)
}
  0x33   :  { %52 = dma.hbm_to_vmem [thread:$0]  %s8730_s3, 2048, %s47_s29, [#allocation8], %s7855_s11, %s7855_s11, %s7856_s12  }
  0x34   :  { %7848 = dma.done.wait [#allocation5], 256  }
  0x35   :  { %7849 = vsyncadd [#allocation5], 4294967040 }
  0x36   :  { %7850 = dma.done.wait [#allocation8], 3584  }
  0x37   :  { %7851 = vsyncadd [#allocation8], 4294963712  ;;  %v7861_v0 = vmov 0.0|0.0   ;;  %vm7862_vm0 = vmmov 0   ;;  %v7863_v1 = vmov 0.0   ;;  %v68_v2 = vld [vmem:[%s8728_s1] sm:$0xff] }
  0x38   :  { %7102 = vmatprep.subr.bf16.mxu0 %v7861_v0  ;;  %6381 = vmatprep.mubr.msk.f32.mxu0 %vm7862_vm0, %v7863_v1  ;;  %v69_v3 = vld [vmem:[%s8728_s1 + $0x8] sm:$0xff]  ;;  %v70_v4 = vld [vmem:[%s8728_s1 + $0x10] sm:$0xff]  ;;  %v71_v6 = vld [vmem:[%s8728_s1 + $0x18] sm:$0xff]  ;;  %vm81_vm1 = vcmask 326656   ;;  %s7864_s26 = smov 64   ;;  %vm803_vm2 = vcmask 254976  }
  0x39   :  { %7108 = vmatprep.subr.bf16.mxu1 %v7861_v0  ;;  %6394 = vmatprep.mubr.msk.f32.mxu1 %vm7862_vm0, %v7863_v1  ;;  %v7965_v5 = vpack.c.bf16 %v69_v3, %v68_v2  ;;  %v7971_v7 = vpack.c.bf16 %v71_v6, %v70_v4  ;;  %v7982_v8 = vld [vmem:[%s8728_s1 + $0x20] sm:$0xff]  ;;  %v388_v11 = vld [vmem:[#allocation4 + $0x8] sm:$0x3]  ;;  %v695_v12 = vld [vmem:[#allocation9] sm:$0xff]  ;;  %vm700_vm3 = vcmask 261120   ;;  %vm5919_vm4 = vcmask 74752  }
  0x3a   :  { %v74_v9 = vld [vmem:[#allocation4] sm:$0x3]  ;;  %v234_v10 = vld [vmem:[#allocation4 + $0x4] sm:$0x3]  ;;  %v696_v13 = vld [vmem:[#allocation9 + $0x8] sm:$0xff] }
  0x3b   :  { %7104 = vmatpush3.bf16.msra.mxu0 %v7965_v5  ;;  %7110 = vmatpush3.bf16.msra.mxu1 %v7965_v5  ;;  %v542_v14 = vld [vmem:[#allocation4 + $0xc] sm:$0x3]  ;;  %v8014_v15 = vpack.c.bf16 %v696_v13, %v695_v12  ;;  %v697_v16 = vld [vmem:[#allocation9 + $0x10] sm:$0xff]  ;;  %v465_v49 = vld [vmem:[#allocation4 + $0xa] sm:$0x3] }
  0x3c   :  { %7105 = vmatprep.subr.bf16.mxu0 %v7861_v0  ;;  %7111 = vmatprep.subr.bf16.mxu1 %v7861_v0  ;;  %v698_v17 = vld [vmem:[#allocation9 + $0x18] sm:$0xff]  ;;  %v8037_v19 = vld [vmem:[%s8731_s4] ss:$0 sm:$0xff]  ;;  %v157_v46 = vld [vmem:[#allocation4 + $0x2] sm:$0x3] }
  0x3d   :  { %v8020_v18 = vpack.c.bf16 %v698_v17, %v697_v16  ;;  %v311_v47 = vld [vmem:[#allocation4 + $0x6] sm:$0x3]  ;;  %v619_v50 = vld [vmem:[#allocation4 + $0xe] sm:$0x3] }
  0x3f   :  { %7107 = vmatpush3.bf16.msra.mxu0 %v7971_v7  ;;  %7113 = vmatpush3.bf16.msra.mxu1 %v7971_v7 }
  0x40   :  { %6379 = vmatprep.subr.mxu0 %v7863_v1  ;;  %6392 = vmatprep.subr.mxu1 %v7863_v1 }
  0x43   :  { %6380 = vmatpush3.msra.mxu0 %v7982_v8  ;;  %6393 = vmatpush3.msra.mxu1 %v7982_v8 }
  0x44   :  { %6382 = vmatmul.mubr.msk.f32.vlgmr.msra.gmra.mrb[0].mxu0 %vm81_vm1, %v74_v9  ;;  %7114 = vmatprep.subr.bf16.mxu0 %v7861_v0 }
  0x45   :  { %7116 = vmatpush3.bf16.msra.mxu0 %v7965_v5  ;;  %6407 = vmatprep.mubr.msk.f32.mxu0 %vm7862_vm0, %v7863_v1 }
  0x46   :  { %7117 = vmatprep.subr.bf16.mxu0 %v7861_v0  ;;  %7120 = vmatprep.subr.bf16.mxu1 %v7861_v0 }
  0x47   :  { %6395 = vmatmul.mubr.msk.f32.vlgmr.msra.gmra.mrb[0].mxu1 %vm81_vm1, %v157_v46 }
  0x48   :  { %7122 = vmatpush3.bf16.msra.mxu1 %v7965_v5  ;;  %6420 = vmatprep.mubr.msk.f32.mxu1 %vm7862_vm0, %v7863_v1 }
  0x49   :  { %7119 = vmatpush3.bf16.msra.mxu0 %v7971_v7  ;;  %7123 = vmatprep.subr.bf16.mxu1 %v7861_v0 }
  0x4a   :  { %6405 = vmatprep.subr.mxu0 %v7863_v1 }
  0x4c   :  { %7125 = vmatpush3.bf16.msra.mxu1 %v7971_v7 }
  0x4d   :  { %6406 = vmatpush3.msra.mxu0 %v7982_v8  ;;  %6418 = vmatprep.subr.mxu1 %v7863_v1 }
  0x4e   :  { %6408 = vmatmul.mubr.msk.f32.vlgmr.msra.gmra.mrb[2].mxu0 %vm81_vm1, %v234_v10  ;;  %7126 = vmatprep.subr.bf16.mxu0 %v7861_v0 }
  0x4f   :  { %7128 = vmatpush3.bf16.msra.mxu0 %v7965_v5  ;;  %6433 = vmatprep.mubr.msk.f32.mxu0 %vm7862_vm0, %v7863_v1 }
  0x50   :  { %7129 = vmatprep.subr.bf16.mxu0 %v7861_v0  ;;  %6419 = vmatpush3.msra.mxu1 %v7982_v8 }
  0x51   :  { %6421 = vmatmul.mubr.msk.f32.vlgmr.msra.gmra.mrb[2].mxu1 %vm81_vm1, %v311_v47  ;;  %7132 = vmatprep.subr.bf16.mxu1 %v7861_v0 }
  0x52   :  { %6446 = vmatprep.mubr.msk.f32.mxu1 %vm7862_vm0, %v7863_v1  ;;  %7134 = vmatpush3.bf16.msra.mxu1 %v7965_v5 }
  0x53   :  { %7131 = vmatpush3.bf16.msra.mxu0 %v7971_v7  ;;  %7135 = vmatprep.subr.bf16.mxu1 %v7861_v0 }
  0x54   :  { %6431 = vmatprep.subr.mxu0 %v7863_v1 }
  0x56   :  { %7137 = vmatpush3.bf16.msra.mxu1 %v7971_v7 }
  0x57   :  { %6432 = vmatpush3.msra.mxu0 %v7982_v8  ;;  %6444 = vmatprep.subr.mxu1 %v7863_v1 }
  0x58   :  { %6434 = vmatmul.mubr.msk.f32.vlgmr.msra.gmra.mrb[4].mxu0 %vm81_vm1, %v388_v11  ;;  %7138 = vmatprep.subr.bf16.mxu0 %v7861_v0 }
  0x59   :  { %7140 = vmatpush3.bf16.msra.mxu0 %v7965_v5  ;;  %6459 = vmatprep.mubr.msk.f32.mxu0 %vm7862_vm0, %v7863_v1 }
  0x5a   :  { %7141 = vmatprep.subr.bf16.mxu0 %v7861_v0  ;;  %6445 = vmatpush3.msra.mxu1 %v7982_v8 }
  0x5b   :  { %6447 = vmatmul.mubr.msk.f32.vlgmr.msra.gmra.mrb[4].mxu1 %vm81_vm1, %v465_v49  ;;  %7144 = vmatprep.subr.bf16.mxu1 %v7861_v0 }
  0x5c   :  { %7146 = vmatpush3.bf16.msra.mxu1 %v7965_v5  ;;  %6472 = vmatprep.mubr.msk.f32.mxu1 %vm7862_vm0, %v7863_v1 }
  0x5d   :  { %7143 = vmatpush3.bf16.msra.mxu0 %v7971_v7  ;;  %7147 = vmatprep.subr.bf16.mxu1 %v7861_v0 }
  0x5e   :  { %6457 = vmatprep.subr.mxu0 %v7863_v1 }
  0x60   :  { %7149 = vmatpush3.bf16.msra.mxu1 %v7971_v7 }
  0x61   :  { %6458 = vmatpush3.msra.mxu0 %v7982_v8  ;;  %6470 = vmatprep.subr.mxu1 %v7863_v1 }
  0x62   :  { %6460 = vmatmul.mubr.msk.f32.vlgmr.msra.gmra.mrb[6].mxu0 %vm81_vm1, %v542_v14  ;;  %7150 = vmatprep.subr.bf16.mxu0 %v7861_v0 }
  0x63   :  { %7152 = vmatpush3.bf16.msra.mxu0 %v8014_v15  ;;  %6483 = vmatprep.mubr.msk.f32.mxu0 %vm7862_vm0, %v7863_v1 }
  0x64   :  { %7153 = vmatprep.subr.bf16.mxu0 %v7861_v0  ;;  %6471 = vmatpush3.msra.mxu1 %v7982_v8 }
  0x65   :  { %6473 = vmatmul.mubr.msk.f32.vlgmr.msra.gmra.mrb[6].mxu1 %vm81_vm1, %v619_v50  ;;  %7156 = vmatprep.subr.bf16.mxu1 %v7861_v0 }
  0x66   :  { %7158 = vmatpush3.bf16.msra.mxu1 %v8014_v15  ;;  %6494 = vmatprep.mubr.msk.f32.mxu1 %vm7862_vm0, %v7863_v1 }
  0x67   :  { %7155 = vmatpush3.bf16.msra.mxu0 %v8020_v18  ;;  %7159 = vmatprep.subr.bf16.mxu1 %v7861_v0 }
  0x68   :  { %7162 = vmatprep.subr.bf16.mxu0 %v7861_v0 }
  0x6a   :  { %6484 = vmatmul.mubr.f32.vlgmr.msra.gmra.mrb[8].mxu0 %v7863_v1  ;;  %7161 = vmatpush3.bf16.msra.mxu1 %v8020_v18 }
  0x6b   :  { %7164 = vmatpush3.bf16.msra.mxu0 %v8014_v15  ;;  %6505 = vmatprep.mubr.msk.f32.mxu0 %vm7862_vm0, %v7863_v1 }
  0x6c   :  { %7165 = vmatprep.subr.bf16.mxu0 %v7861_v0  ;;  %7168 = vmatprep.subr.bf16.mxu1 %v7861_v0 }
  0x6f   :  { %7167 = vmatpush3.bf16.msra.mxu0 %v8020_v18 }
  0x70   :  { %7174 = vmatprep.subr.bf16.mxu0 %v7861_v0 }
 0x117   :  { %v151_v20 = vpop.f32.mrb[0].mxu0 }
 0x118   :  { %v152_v21 = vadd.f32 %v8037_v19, %v151_v20  ;;  %v6383_v22 = vpop.f32.mrb[1].mxu0 }
 0x11a   :  { %155 = vst [vmem:[#allocation3] sm:$0x3] %v152_v21  ;;  %v227_v53 = vpop.f32.mrb[0].mxu1 }
 0x11b   :  { %v228_v54 = vadd.f32 %v8037_v19, %v227_v53  ;;  %v6396_v55 = vpop.f32.mrb[1].mxu1 }
 0x11d   :  { %232 = vst [vmem:[#allocation3 + $0x2] sm:$0x3] %v228_v54 }
 0x121   :  { %v304_v23 = vpop.f32.mrb[2].mxu0  ;;  %v699_v32 = vld [vmem:[#allocation3] sm:$0x3] }
 0x122   :  { %v305_v24 = vadd.f32 %v8037_v19, %v304_v23  ;;  %v6409_v25 = vpop.f32.mrb[3].mxu0 }
 0x124   :  { %309 = vst [vmem:[#allocation3 + $0x4] sm:$0x3] %v305_v24  ;;  %v381_v56 = vpop.f32.mrb[2].mxu1  ;;  %v805_v4 = vld [vmem:[#allocation3 + $0x2] sm:$0x3] }
 0x125   :  { %v382_v57 = vadd.f32 %v8037_v19, %v381_v56  ;;  %v6422_v58 = vpop.f32.mrb[3].mxu1 }
 0x127   :  { %386 = vst [vmem:[#allocation3 + $0x6] sm:$0x3] %v382_v57 }
 0x12b   :  { %v458_v26 = vpop.f32.mrb[4].mxu0  ;;  %v909_v24 = vld [vmem:[#allocation3 + $0x4] sm:$0x3] }
 0x12c   :  { %v459_v27 = vadd.f32 %v8037_v19, %v458_v26  ;;  %v6435_v28 = vpop.f32.mrb[5].mxu0 }
 0x12e   :  { %463 = vst [vmem:[#allocation3 + $0x8] sm:$0x3] %v459_v27  ;;  %v535_v59 = vpop.f32.mrb[4].mxu1 }
 0x12f   :  { %v536_v60 = vadd.f32 %v8037_v19, %v535_v59  ;;  %v6448_v61 = vpop.f32.mrb[5].mxu1 }
 0x131   :  { %540 = vst [vmem:[#allocation3 + $0xa] sm:$0x3] %v536_v60 }
 0x135   :  { %v612_v29 = vpop.f32.mrb[6].mxu0  ;;  %v1117_v60 = vld [vmem:[#allocation3 + $0x8] sm:$0x3] }
 0x136   :  { %v613_v30 = vadd.f32 %v8037_v19, %v612_v29  ;;  %v6461_v31 = vpop.f32.mrb[7].mxu0 }
 0x138   :  { %617 = vst [vmem:[#allocation3 + $0xc] sm:$0x3] %v613_v30  ;;  %v689_v63 = vpop.f32.mrb[6].mxu1 }
 0x139   :  { %v690_v2 = vadd.f32 %v8037_v19, %v689_v63  ;;  %v6474_v3 = vpop.f32.mrb[7].mxu1 }
 0x13b   :  { %694 = vst [vmem:[#allocation3 + $0xe] sm:$0x3] %v690_v2 }
 0x13d   :  { %v770_v33 = vpop.f32.mrb[8].mxu0 }
 0x13e   :  { %v774_v34 = vadd.f32 %v770_v33, %v699_v32  ;;  %v6485_v35 = vpop.f32.mrb[9].mxu0 }
 0x140   :  { %7504 = vtanh.f32 %v774_v34  ;;  %v5946_v37 = vmul.f32 -1.442695, %v774_v34 }
 0x142   :  { %7506 = vpow2.f32 %v5946_v37 }
 0x14a   :  { %v7505_v36 = vpop.eup %7504 }
 0x14b   :  { %784 = vrot.lane.b32.xlu0 %v7505_v36, %s7864_s26 }
 0x14c   :  { %v7507_v38 = vpop.eup %7506 }
 0x14d   :  { %v778_v39 = vadd.f32 1.0, %v7507_v38 }
 0x14f   :  { %7508 = vrcp.f32 %v778_v39 }
 0x159   :  { %v7509_v40 = vpop.eup %7508 }
 0x15a   :  { %v782_v43 = vmul.f32 0.0, %v7509_v40 }
 0x1bd   :  { %v785_v41 = vpop.permute.xlu0 %784 }
 0x1be   :  { %v787_v42 = vmul.f32 %v7509_v40, %v785_v41 }
 0x1c0   :  { %789 = vrot.lane.b32.xlu0 %v787_v42, %s7858_s2  ;;  %v1013_v42 = vld [vmem:[#allocation3 + $0x6] sm:$0x3] }
 0x232   :  { %v790_v44 = vpop.permute.xlu0 %789 }
 0x233   :  { %v8045_v45 = vadd.f32 %v790_v44, %v782_v43 }
 0x235   :  { %7510 = vtanh.f32 %v8045_v45 }
 0x23f   :  { %v7511_v48 = vpop.eup %7510 }
 0x240   :  { %795 = vrot.lane.b32.xlu1 %v7511_v48, %s7864_s26 }
 0x2b2   :  { %v796_v51 = vpop.permute.xlu1 %795 }
 0x2b3   :  { %v798_v52 = vmul.f32 %v7509_v40, %v796_v51 }
 0x2b5   :  { %800 = vrot.lane.b32.xlu1 %v798_v52, %s7858_s2 }
 0x327   :  { %v801_v62 = vpop.permute.xlu1 %800 }
 0x328   :  { %804 = vst.msk [vmem:[#allocation2] sm:$0x3] %vm803_vm2, %v801_v62  ;;  %6495 = vmatmul.mubr.msk.f32.vlgmr.msra.gmra.mrb[8].mxu1 %vm700_vm3, %v801_v62 }
 0x329   :  { %7170 = vmatpush3.bf16.msra.mxu1 %v8014_v15  ;;  %6516 = vmatprep.mubr.msk.f32.mxu1 %vm7862_vm0, %v7863_v1 }
 0x32a   :  { %7171 = vmatprep.subr.bf16.mxu1 %v7861_v0 }
 0x32d   :  { %7173 = vmatpush3.bf16.msra.mxu1 %v8020_v18 }
 0x32e   :  { %7180 = vmatprep.subr.bf16.mxu1 %v7861_v0 }
 0x3fb   :  { %v874_v5 = vpop.f32.mrb[8].mxu1 }
 0x3fc   :  { %v878_v6 = vadd.f32 %v874_v5, %v805_v4  ;;  %v6496_v7 = vpop.f32.mrb[9].mxu1 }
 0x3fe   :  { %7512 = vtanh.f32 %v878_v6  ;;  %v5948_v9 = vmul.f32 -1.442695, %v878_v6 }
 0x400   :  { %7514 = vpow2.f32 %v5948_v9 }
 0x408   :  { %v7513_v8 = vpop.eup %7512 }
 0x409   :  { %888 = vrot.lane.b32.xlu0 %v7513_v8, %s7864_s26 }
 0x40a   :  { %v7515_v10 = vpop.eup %7514 }
 0x40b   :  { %v882_v11 = vadd.f32 1.0, %v7515_v10 }
 0x40d   :  { %7516 = vrcp.f32 %v882_v11 }
 0x417   :  { %v7517_v12 = vpop.eup %7516 }
 0x418   :  { %v886_v16 = vmul.f32 %v7517_v12, %v8045_v45 }
 0x47b   :  { %v889_v13 = vpop.permute.xlu0 %888 }
 0x47c   :  { %v891_v14 = vmul.f32 %v7517_v12, %v889_v13 }
 0x47e   :  { %893 = vrot.lane.b32.xlu1 %v891_v14, %s7858_s2 }
 0x4f0   :  { %v894_v17 = vpop.permute.xlu1 %893 }
 0x4f1   :  { %v896_v19 = vadd.f32 %v894_v17, %v886_v16  ;;  %v1221_v17 = vld [vmem:[#allocation3 + $0xa] sm:$0x3] }
 0x4f3   :  { %7518 = vtanh.f32 %v896_v19 }
 0x4fd   :  { %v7519_v20 = vpop.eup %7518 }
 0x4fe   :  { %899 = vrot.lane.b32.xlu0 %v7519_v20, %s7864_s26 }
 0x570   :  { %v900_v21 = vpop.permute.xlu0 %899 }
 0x571   :  { %v902_v22 = vmul.f32 %v7517_v12, %v900_v21 }
 0x573   :  { %904 = vrot.lane.b32.xlu1 %v902_v22, %s7858_s2 }
 0x5e5   :  { %v905_v23 = vpop.permute.xlu1 %904 }
 0x5e6   :  { %908 = vst.msk [vmem:[#allocation2 + $0x2] sm:$0x3] %vm803_vm2, %v905_v23  ;;  %6506 = vmatmul.mubr.msk.f32.vlgmr.msra.gmra.mrb[10].mxu0 %vm700_vm3, %v905_v23 }
 0x5e7   :  { %7176 = vmatpush3.bf16.msra.mxu0 %v8014_v15  ;;  %6527 = vmatprep.mubr.msk.f32.mxu0 %vm7862_vm0, %v7863_v1 }
 0x5e8   :  { %7177 = vmatprep.subr.bf16.mxu0 %v7861_v0 }
 0x5eb   :  { %7179 = vmatpush3.bf16.msra.mxu0 %v8020_v18 }
 0x5ec   :  { %7186 = vmatprep.subr.bf16.mxu0 %v7861_v0 }
 0x6b9   :  { %v978_v25 = vpop.f32.mrb[10].mxu0 }
 0x6ba   :  { %v982_v26 = vadd.f32 %v978_v25, %v909_v24  ;;  %v6507_v27 = vpop.f32.mrb[11].mxu0 }
 0x6bc   :  { %7520 = vtanh.f32 %v982_v26  ;;  %v5950_v29 = vmul.f32 -1.442695, %v982_v26 }
 0x6be   :  { %7522 = vpow2.f32 %v5950_v29 }
 0x6c6   :  { %v7521_v28 = vpop.eup %7520 }
 0x6c7   :  { %992 = vrot.lane.b32.xlu0 %v7521_v28, %s7864_s26 }
 0x6c8   :  { %v7523_v30 = vpop.eup %7522 }
 0x6c9   :  { %v986_v31 = vadd.f32 1.0, %v7523_v30 }
 0x6cb   :  { %7524 = vrcp.f32 %v986_v31 }
 0x6d5   :  { %v7525_v32 = vpop.eup %7524 }
 0x6d6   :  { %v990_v35 = vmul.f32 %v7525_v32, %v896_v19 }
 0x739   :  { %v993_v33 = vpop.permute.xlu0 %992 }
 0x73a   :  { %v995_v34 = vmul.f32 %v7525_v32, %v993_v33  ;;  %v1533_v33 = vld [vmem:[#allocation7] sm:$0xff] }
 0x73c   :  { %997 = vrot.lane.b32.xlu1 %v995_v34, %s7858_s2  ;;  %v1534_v34 = vld [vmem:[#allocation7 + $0x8] sm:$0xff] }
 0x7ae   :  { %v998_v36 = vpop.permute.xlu1 %997 }
 0x7af   :  { %v1000_v37 = vadd.f32 %v998_v36, %v990_v35  ;;  %v8152_v35 = vpack.c.bf16 %v1534_v34, %v1533_v33  ;;  %v1535_v36 = vld [vmem:[#allocation7 + $0x10] sm:$0xff] }
 0x7b1   :  { %7526 = vtanh.f32 %v1000_v37 }
 0x7bb   :  { %v7527_v38 = vpop.eup %7526 }
 0x7bc   :  { %1003 = vrot.lane.b32.xlu0 %v7527_v38, %s7864_s26 }
 0x82e   :  { %v1004_v39 = vpop.permute.xlu0 %1003 }
 0x82f   :  { %v1006_v40 = vmul.f32 %v7525_v32, %v1004_v39 }
 0x831   :  { %1008 = vrot.lane.b32.xlu1 %v1006_v40, %s7858_s2  ;;  %v1539_v40 = vld [vmem:[#allocation2] sm:$0x3] }
 0x8a3   :  { %v1009_v41 = vpop.permute.xlu1 %1008 }
 0x8a4   :  { %1012 = vst.msk [vmem:[#allocation2 + $0x4] sm:$0x3] %vm803_vm2, %v1009_v41  ;;  %6517 = vmatmul.mubr.msk.f32.vlgmr.msra.gmra.mrb[10].mxu1 %vm700_vm3, %v1009_v41 }
 0x8a5   :  { %7182 = vmatpush3.bf16.msra.mxu1 %v8014_v15  ;;  %6538 = vmatprep.mubr.msk.f32.mxu1 %vm7862_vm0, %v7863_v1 }
 0x8a6   :  { %7183 = vmatprep.subr.bf16.mxu1 %v7861_v0 }
 0x8a9   :  { %7185 = vmatpush3.bf16.msra.mxu1 %v8020_v18 }
 0x8aa   :  { %7192 = vmatprep.subr.bf16.mxu1 %v7861_v0 }
 0x8ab   :  { %v1695_v41 = vld [vmem:[#allocation2 + $0x4] sm:$0x3] }
 0x977   :  { %v1082_v43 = vpop.f32.mrb[10].mxu1 }
 0x978   :  { %v1086_v44 = vadd.f32 %v1082_v43, %v1013_v42  ;;  %v6518_v45 = vpop.f32.mrb[11].mxu1  ;;  %v1325_v43 = vld [vmem:[#allocation3 + $0xc] sm:$0x3] }
 0x97a   :  { %7528 = vtanh.f32 %v1086_v44  ;;  %v5952_v47 = vmul.f32 -1.442695, %v1086_v44 }
 0x97c   :  { %7530 = vpow2.f32 %v5952_v47  ;;  %v8188_v47 = vld [vmem:[%s8731_s4 + $0x1] ss:$0 sm:$0xff] }
 0x984   :  { %v7529_v46 = vpop.eup %7528 }
 0x985   :  { %1096 = vrot.lane.b32.xlu0 %v7529_v46, %s7864_s26 }
 0x986   :  { %v7531_v48 = vpop.eup %7530 }
 0x987   :  { %v1090_v49 = vadd.f32 1.0, %v7531_v48 }
 0x989   :  { %7532 = vrcp.f32 %v1090_v49 }
 0x993   :  { %v7533_v50 = vpop.eup %7532 }
 0x994   :  { %v1094_v53 = vmul.f32 %v7533_v50, %v1000_v37  ;;  %v1536_v37 = vld [vmem:[#allocation7 + $0x18] sm:$0xff] }
 0x995   :  { %v8157_v39 = vpack.c.bf16 %v1536_v37, %v1535_v36 }
 0x9f7   :  { %v1097_v51 = vpop.permute.xlu0 %1096 }
 0x9f8   :  { %v1099_v52 = vmul.f32 %v7533_v50, %v1097_v51 }
 0x9fa   :  { %1101 = vrot.lane.b32.xlu1 %v1099_v52, %s7858_s2 }
 0xa6c   :  { %v1102_v54 = vpop.permute.xlu1 %1101 }
 0xa6d   :  { %v1104_v55 = vadd.f32 %v1102_v54, %v1094_v53 }
 0xa6f   :  { %7534 = vtanh.f32 %v1104_v55 }
 0xa79   :  { %v7535_v56 = vpop.eup %7534 }
 0xa7a   :  { %1107 = vrot.lane.b32.xlu0 %v7535_v56, %s7864_s26 }
 0xaec   :  { %v1108_v57 = vpop.permute.xlu0 %1107 }
 0xaed   :  { %v1110_v58 = vmul.f32 %v7533_v50, %v1108_v57 }
 0xaef   :  { %1112 = vrot.lane.b32.xlu1 %v1110_v58, %s7858_s2 }
 0xb61   :  { %v1113_v59 = vpop.permute.xlu1 %1112 }
 0xb62   :  { %1116 = vst.msk [vmem:[#allocation2 + $0x6] sm:$0x3] %vm803_vm2, %v1113_v59  ;;  %6528 = vmatmul.mubr.msk.f32.vlgmr.msra.gmra.mrb[12].mxu0 %vm700_vm3, %v1113_v59 }
 0xb63   :  { %7188 = vmatpush3.bf16.msra.mxu0 %v8014_v15  ;;  %6549 = vmatprep.mubr.msk.f32.mxu0 %vm7862_vm0, %v7863_v1 }
 0xb64   :  { %7189 = vmatprep.subr.bf16.mxu0 %v7861_v0 }
 0xb67   :  { %7191 = vmatpush3.bf16.msra.mxu0 %v8020_v18 }
 0xb68   :  { %7198 = vmatprep.subr.bf16.mxu0 %v7861_v0 }
 0xc35   :  { %v1186_v61 = vpop.f32.mrb[12].mxu0 }
 0xc36   :  { %v1190_v62 = vadd.f32 %v1186_v61, %v1117_v60  ;;  %v6529_v63 = vpop.f32.mrb[13].mxu0 }
 0xc38   :  { %7536 = vtanh.f32 %v1190_v62  ;;  %v5954_v3 = vmul.f32 -1.442695, %v1190_v62 }
 0xc3a   :  { %7538 = vpow2.f32 %v5954_v3 }
 0xc42   :  { %v7537_v2 = vpop.eup %7536 }
 0xc43   :  { %1200 = vrot.lane.b32.xlu0 %v7537_v2, %s7864_s26 }
 0xc44   :  { %v7539_v4 = vpop.eup %7538 }
 0xc45   :  { %v1194_v5 = vadd.f32 1.0, %v7539_v4 }
 0xc47   :  { %7540 = vrcp.f32 %v1194_v5 }
 0xc51   :  { %v7541_v6 = vpop.eup %7540 }
 0xc52   :  { %v1198_v9 = vmul.f32 %v7541_v6, %v1104_v55 }
 0xcb5   :  { %v1201_v7 = vpop.permute.xlu0 %1200 }
 0xcb6   :  { %v1203_v8 = vmul.f32 %v7541_v6, %v1201_v7 }
 0xcb8   :  { %1205 = vrot.lane.b32.xlu1 %v1203_v8, %s7858_s2 }
 0xd2a   :  { %v1206_v10 = vpop.permute.xlu1 %1205 }
 0xd2b   :  { %v1208_v11 = vadd.f32 %v1206_v10, %v1198_v9  ;;  %v2146_v9 = vld [vmem:[#allocation9 + $0x20] sm:$0xff]  ;;  %v2147_v10 = vld [vmem:[#allocation9 + $0x28] sm:$0xff] }
 0xd2d   :  { %7542 = vtanh.f32 %v1208_v11 }
 0xd37   :  { %v7543_v12 = vpop.eup %7542 }
 0xd38   :  { %1211 = vrot.lane.b32.xlu0 %v7543_v12, %s7864_s26  ;;  %v2148_v12 = vld [vmem:[#allocation9 + $0x30] sm:$0xff] }
 0xdaa   :  { %v1212_v13 = vpop.permute.xlu0 %1211 }
 0xdab   :  { %v1214_v14 = vmul.f32 %v7541_v6, %v1212_v13  ;;  %v2149_v13 = vld [vmem:[#allocation9 + $0x38] sm:$0xff] }
 0xdad   :  { %1216 = vrot.lane.b32.xlu1 %v1214_v14, %s7858_s2  ;;  %v1620_v14 = vld [vmem:[#allocation2 + $0x2] sm:$0x3] }
 0xe1f   :  { %v1217_v16 = vpop.permute.xlu1 %1216 }
 0xe20   :  { %1220 = vst.msk [vmem:[#allocation2 + $0x8] sm:$0x3] %vm803_vm2, %v1217_v16  ;;  %6539 = vmatmul.mubr.msk.f32.vlgmr.msra.gmra.mrb[12].mxu1 %vm700_vm3, %v1217_v16 }
 0xe21   :  { %7194 = vmatpush3.bf16.msra.mxu1 %v8014_v15  ;;  %6560 = vmatprep.mubr.msk.f32.mxu1 %vm7862_vm0, %v7863_v1 }
 0xe22   :  { %7195 = vmatprep.subr.bf16.mxu1 %v7861_v0 }
 0xe25   :  { %7197 = vmatpush3.bf16.msra.mxu1 %v8020_v18 }
 0xe26   :  { %7204 = vmatprep.subr.bf16.mxu1 %v7861_v0 }
 0xe27   :  { %v1845_v42 = vld [vmem:[#allocation2 + $0x8] sm:$0x3] }
 0xef3   :  { %v1290_v19 = vpop.f32.mrb[12].mxu1 }
 0xef4   :  { %v1294_v20 = vadd.f32 %v1290_v19, %v1221_v17  ;;  %v6540_v21 = vpop.f32.mrb[13].mxu1  ;;  %v8215_v17 = vpack.c.bf16 %v2149_v13, %v2148_v12  ;;  %v1770_v19 = vld [vmem:[#allocation2 + $0x6] sm:$0x3] }
 0xef5   :  { %v1429_v21 = vld [vmem:[#allocation3 + $0xe] sm:$0x3] }
 0xef6   :  { %7544 = vtanh.f32 %v1294_v20  ;;  %v5956_v23 = vmul.f32 -1.442695, %v1294_v20 }
 0xef8   :  { %7546 = vpow2.f32 %v5956_v23 }
 0xf00   :  { %v7545_v22 = vpop.eup %7544 }
 0xf01   :  { %1304 = vrot.lane.b32.xlu0 %v7545_v22, %s7864_s26 }
 0xf02   :  { %v7547_v15 = vpop.eup %7546 }
 0xf03   :  { %v1298_v24 = vadd.f32 1.0, %v7547_v15 }
 0xf05   :  { %7548 = vrcp.f32 %v1298_v24 }
 0xf0f   :  { %v7549_v25 = vpop.eup %7548 }
 0xf10   :  { %v1302_v18 = vmul.f32 %v7549_v25, %v1208_v11  ;;  %v8208_v11 = vpack.c.bf16 %v2147_v10, %v2146_v9 }
 0xf73   :  { %v1305_v26 = vpop.permute.xlu0 %1304 }
 0xf74   :  { %v1307_v27 = vmul.f32 %v7549_v25, %v1305_v26 }
 0xf76   :  { %1309 = vrot.lane.b32.xlu1 %v1307_v27, %s7858_s2 }
 0xfe8   :  { %v1310_v28 = vpop.permute.xlu1 %1309 }
 0xfe9   :  { %v8147_v29 = vadd.f32 %v1310_v28, %v1302_v18 }
 0xfeb   :  { %7550 = vtanh.f32 %v8147_v29 }
 0xff5   :  { %v7551_v30 = vpop.eup %7550 }
 0xff6   :  { %1315 = vrot.lane.b32.xlu0 %v7551_v30, %s7864_s26 }
0x1068   :  { %v1316_v31 = vpop.permute.xlu0 %1315 }
0x1069   :  { %v1318_v32 = vmul.f32 %v7549_v25, %v1316_v31 }
0x106b   :  { %1320 = vrot.lane.b32.xlu1 %v1318_v32, %s7858_s2 }
0x10dd   :  { %v1321_v38 = vpop.permute.xlu1 %1320 }
0x10de   :  { %1324 = vst.msk [vmem:[#allocation2 + $0xa] sm:$0x3] %vm803_vm2, %v1321_v38  ;;  %6550 = vmatmul.mubr.msk.f32.vlgmr.msra.gmra.mrb[14].mxu0 %vm700_vm3, %v1321_v38 }
0x10df   :  { %7200 = vmatpush3.bf16.msra.mxu0 %v8152_v35  ;;  %6571 = vmatprep.mubr.msk.f32.mxu0 %vm7862_vm0, %v7863_v1 }
0x10e0   :  { %7201 = vmatprep.subr.bf16.mxu0 %v7861_v0 }
0x10e3   :  { %7203 = vmatpush3.bf16.msra.mxu0 %v8157_v39 }
0x10e4   :  { %7210 = vmatprep.subr.bf16.mxu0 %v7861_v0 }
0x10e5   :  { %v1920_v20 = vld [vmem:[#allocation2 + $0xa] sm:$0x3] }
0x10e6   :  { %6572 = vmatmul.mubr.msk.f32.vlgmr.msra.gmra.mrb[16].mxu0 %vm700_vm3, %v1539_v40 }
0x10e7   :  { %7212 = vmatpush3.bf16.msra.mxu0 %v8152_v35  ;;  %6593 = vmatprep.mubr.msk.f32.mxu0 %vm7862_vm0, %v7863_v1 }
0x10e8   :  { %7213 = vmatprep.subr.bf16.mxu0 %v7861_v0 }
0x10eb   :  { %7215 = vmatpush3.bf16.msra.mxu0 %v8157_v39 }
0x10ec   :  { %7222 = vmatprep.subr.bf16.mxu0 %v7861_v0 }
0x10ee   :  { %6594 = vmatmul.mubr.msk.f32.vlgmr.msra.gmra.mrb[18].mxu0 %vm700_vm3, %v1695_v41 }
0x10ef   :  { %7224 = vmatpush3.bf16.msra.mxu0 %v8152_v35  ;;  %6615 = vmatprep.mubr.msk.f32.mxu0 %vm7862_vm0, %v7863_v1 }
0x10f0   :  { %7225 = vmatprep.subr.bf16.mxu0 %v7861_v0 }
0x10f3   :  { %7227 = vmatpush3.bf16.msra.mxu0 %v8157_v39 }
0x10f4   :  { %7234 = vmatprep.subr.bf16.mxu0 %v7861_v0 }
0x10f6   :  { %6616 = vmatmul.mubr.msk.f32.vlgmr.msra.gmra.mrb[20].mxu0 %vm700_vm3, %v1845_v42 }
0x10f7   :  { %7236 = vmatpush3.bf16.msra.mxu0 %v8152_v35  ;;  %6637 = vmatprep.mubr.msk.f32.mxu0 %vm7862_vm0, %v7863_v1 }
0x10f8   :  { %7237 = vmatprep.subr.bf16.mxu0 %v7861_v0 }
0x10fb   :  { %7239 = vmatpush3.bf16.msra.mxu0 %v8157_v39 }
0x10fc   :  { %7246 = vmatprep.subr.bf16.mxu0 %v7861_v0 }
0x11b1   :  { %v1394_v44 = vpop.f32.mrb[14].mxu0 }
0x11b2   :  { %v1398_v45 = vadd.f32 %v1394_v44, %v1325_v43  ;;  %v6551_v46 = vpop.f32.mrb[15].mxu0 }
0x11b4   :  { %7552 = vtanh.f32 %v1398_v45  ;;  %v5958_v58 = vmul.f32 -1.442695, %v1398_v45 }
0x11b6   :  { %7554 = vpow2.f32 %v5958_v58 }
0x11b9   :  { %v1615_v48 = vpop.f32.mrb[16].mxu0 }
0x11ba   :  { %v1616_v49 = vadd.f32 %v8188_v47, %v1615_v48  ;;  %v6573_v50 = vpop.f32.mrb[17].mxu0 }
0x11bc   :  { %1619 = vst [vmem:[#allocation3] sm:$0x3] %v1616_v49 }
0x11be   :  { %v7553_v51 = vpop.eup %7552 }
0x11bf   :  { %1408 = vrot.lane.b32.xlu0 %v7553_v51, %s7864_s26 }
0x11c0   :  { %v7555_v59 = vpop.eup %7554 }
0x11c1   :  { %v1765_v52 = vpop.f32.mrb[18].mxu0  ;;  %v1402_v60 = vadd.f32 1.0, %v7555_v59 }
0x11c2   :  { %v1766_v53 = vadd.f32 %v8188_v47, %v1765_v52  ;;  %v6595_v54 = vpop.f32.mrb[19].mxu0 }
0x11c3   :  { %7556 = vrcp.f32 %v1402_v60  ;;  %v2150_v31 = vld [vmem:[#allocation3] sm:$0x3] }
0x11c4   :  { %1769 = vst [vmem:[#allocation3 + $0x4] sm:$0x3] %v1766_v53 }
0x11c9   :  { %v1915_v55 = vpop.f32.mrb[20].mxu0 }
0x11ca   :  { %v1916_v56 = vadd.f32 %v8188_v47, %v1915_v55  ;;  %v6617_v57 = vpop.f32.mrb[21].mxu0 }
0x11cc   :  { %1919 = vst [vmem:[#allocation3 + $0x8] sm:$0x3] %v1916_v56 }
0x11cd   :  { %v7557_v61 = vpop.eup %7556 }
0x11ce   :  { %v1406_v2 = vmul.f32 %v7557_v61, %v8147_v29 }
0x1231   :  { %v1409_v62 = vpop.permute.xlu0 %1408 }
0x1232   :  { %v1411_v63 = vmul.f32 %v7557_v61, %v1409_v62 }
0x1234   :  { %1413 = vrot.lane.b32.xlu1 %v1411_v63, %s7858_s2 }
0x12a6   :  { %v1414_v3 = vpop.permute.xlu1 %1413 }
0x12a7   :  { %v8196_v4 = vadd.f32 %v1414_v3, %v1406_v2 }
0x12a9   :  { %7558 = vtanh.f32 %v8196_v4 }
0x12b3   :  { %v7559_v5 = vpop.eup %7558 }
0x12b4   :  { %1419 = vrot.lane.b32.xlu0 %v7559_v5, %s7864_s26 }
0x1326   :  { %v1420_v6 = vpop.permute.xlu0 %1419 }
0x1327   :  { %v1422_v7 = vmul.f32 %v7557_v61, %v1420_v6 }
0x1329   :  { %1424 = vrot.lane.b32.xlu1 %v1422_v7, %s7858_s2 }
0x139b   :  { %v1425_v8 = vpop.permute.xlu1 %1424 }
0x139c   :  { %1428 = vst.msk [vmem:[#allocation2 + $0xc] sm:$0x3] %vm803_vm2, %v1425_v8  ;;  %6561 = vmatmul.mubr.msk.f32.vlgmr.msra.gmra.mrb[14].mxu1 %vm700_vm3, %v1425_v8 }
0x139d   :  { %7206 = vmatpush3.bf16.msra.mxu1 %v8152_v35  ;;  %6582 = vmatprep.mubr.msk.f32.mxu1 %vm7862_vm0, %v7863_v1 }
0x139e   :  { %7207 = vmatprep.subr.bf16.mxu1 %v7861_v0 }
0x13a1   :  { %7209 = vmatpush3.bf16.msra.mxu1 %v8157_v39 }
0x13a2   :  { %7216 = vmatprep.subr.bf16.mxu1 %v7861_v0 }
0x13a3   :  { %v1995_v16 = vld [vmem:[#allocation2 + $0xc] sm:$0x3] }
0x13a4   :  { %6583 = vmatmul.mubr.msk.f32.vlgmr.msra.gmra.mrb[16].mxu1 %vm700_vm3, %v1620_v14  ;;  %6638 = vmatmul.mubr.msk.f32.vlgmr.msra.gmra.mrb[22].mxu0 %vm700_vm3, %v1995_v16 }
0x13a5   :  { %7218 = vmatpush3.bf16.msra.mxu1 %v8152_v35  ;;  %7248 = vmatpush3.bf16.msra.mxu0 %v8208_v11 }
0x13a6   :  { %7219 = vmatprep.subr.bf16.mxu1 %v7861_v0  ;;  %7249 = vmatprep.subr.bf16.mxu0 %v7861_v0 }
0x13a7   :  { %6604 = vmatprep.mubr.msk.f32.mxu1 %vm7862_vm0, %v7863_v1  ;;  %6659 = vmatprep.mubr.msk.f32.mxu0 %vm7862_vm0, %v7863_v1 }
0x13a9   :  { %7221 = vmatpush3.bf16.msra.mxu1 %v8157_v39  ;;  %7251 = vmatpush3.bf16.msra.mxu0 %v8215_v17 }
0x13aa   :  { %7228 = vmatprep.subr.bf16.mxu1 %v7861_v0  ;;  %7258 = vmatprep.subr.bf16.mxu0 %v7861_v0 }
0x13ac   :  { %6605 = vmatmul.mubr.msk.f32.vlgmr.msra.gmra.mrb[18].mxu1 %vm700_vm3, %v1770_v19  ;;  %6660 = vmatmul.mubr.f32.vlgmr.msra.gmra.mrb[24].mxu0 %v7863_v1 }
0x13ad   :  { %7230 = vmatpush3.bf16.msra.mxu1 %v8152_v35  ;;  %6626 = vmatprep.mubr.msk.f32.mxu1 %vm7862_vm0, %v7863_v1 }
0x13ae   :  { %7231 = vmatprep.subr.bf16.mxu1 %v7861_v0  ;;  %7260 = vmatpush3.bf16.msra.mxu0 %v8208_v11 }
0x13af   :  { %7261 = vmatprep.subr.bf16.mxu0 %v7861_v0  ;;  %6681 = vmatprep.mubr.msk.f32.mxu0 %vm7862_vm0, %v7863_v1 }
0x13b1   :  { %7233 = vmatpush3.bf16.msra.mxu1 %v8157_v39 }
0x13b2   :  { %7240 = vmatprep.subr.bf16.mxu1 %v7861_v0  ;;  %7263 = vmatpush3.bf16.msra.mxu0 %v8215_v17 }
0x13b3   :  { %7270 = vmatprep.subr.bf16.mxu0 %v7861_v0 }
0x13b4   :  { %6627 = vmatmul.mubr.msk.f32.vlgmr.msra.gmra.mrb[20].mxu1 %vm700_vm3, %v1920_v20 }
0x13b5   :  { %7242 = vmatpush3.bf16.msra.mxu1 %v8152_v35  ;;  %6648 = vmatprep.mubr.msk.f32.mxu1 %vm7862_vm0, %v7863_v1 }
0x13b6   :  { %7243 = vmatprep.subr.bf16.mxu1 %v7861_v0 }
0x13b9   :  { %7245 = vmatpush3.bf16.msra.mxu1 %v8157_v39 }
0x13ba   :  { %7252 = vmatprep.subr.bf16.mxu1 %v7861_v0 }
0x146f   :  { %v1498_v22 = vpop.f32.mrb[14].mxu1 }
0x1470   :  { %v1502_v23 = vadd.f32 %v1498_v22, %v1429_v21  ;;  %v6562_v15 = vpop.f32.mrb[15].mxu1 }
0x1472   :  { %7560 = vtanh.f32 %v1502_v23  ;;  %v5960_v41 = vmul.f32 -1.442695, %v1502_v23 }
0x1477   :  { %v1690_v24 = vpop.f32.mrb[16].mxu1  ;;  %v2065_v25 = vpop.f32.mrb[22].mxu0 }
0x1478   :  { %v1691_v26 = vadd.f32 %v8188_v47, %v1690_v24  ;;  %v6584_v27 = vpop.f32.mrb[17].mxu1  ;;  %v2066_v18 = vadd.f32 %v8188_v47, %v2065_v25  ;;  %v6639_v28 = vpop.f32.mrb[23].mxu0 }
0x147a   :  { %1694 = vst [vmem:[#allocation3 + $0x2] sm:$0x3] %v1691_v26  ;;  %2069 = vst [vmem:[#allocation3 + $0xc] sm:$0x3] %v2066_v18 }
0x147c   :  { %v7561_v29 = vpop.eup %7560 }
0x147d   :  { %1512 = vrot.lane.b32.xlu0 %v7561_v29, %s7864_s26  ;;  %v2354_v29 = vld [vmem:[#allocation3 + $0x4] sm:$0x3] }
0x147f   :  { %v1840_v30 = vpop.f32.mrb[18].mxu1  ;;  %v2217_v32 = vpop.f32.mrb[24].mxu0 }
0x1480   :  { %v1841_v33 = vadd.f32 %v8188_v47, %v1840_v30  ;;  %v2221_v34 = vadd.f32 %v2217_v32, %v2150_v31  ;;  %v6606_v35 = vpop.f32.mrb[19].mxu1  ;;  %v6661_v36 = vpop.f32.mrb[25].mxu0 }
0x1481   :  { %v2251_v10 = vld [vmem:[#allocation3 + $0x2] sm:$0x3] }
0x1482   :  { %1844 = vst [vmem:[#allocation3 + $0x6] sm:$0x3] %v1841_v33  ;;  %7562 = vtanh.f32 %v2221_v34  ;;  %v5971_v43 = vmul.f32 -1.442695, %v2221_v34 }
0x1483   :  { %7564 = vpow2.f32 %v5960_v41 }
0x1484   :  { %7566 = vpow2.f32 %v5971_v43 }
0x1487   :  { %v1990_v37 = vpop.f32.mrb[20].mxu1 }
0x1488   :  { %v1991_v38 = vadd.f32 %v8188_v47, %v1990_v37  ;;  %v6628_v39 = vpop.f32.mrb[21].mxu1 }
0x148a   :  { %1994 = vst [vmem:[#allocation3 + $0xa] sm:$0x3] %v1991_v38 }
0x148c   :  { %v7563_v40 = vpop.eup %7562 }
0x148d   :  { %2231 = vrot.lane.b32.xlu1 %v7563_v40, %s7864_s26  ;;  %v7565_v42 = vpop.eup %7564 }
0x148e   :  { %v1506_v44 = vadd.f32 1.0, %v7565_v42  ;;  %v7567_v45 = vpop.eup %7566 }
0x148f   :  { %v2225_v50 = vadd.f32 1.0, %v7567_v45 }
0x1490   :  { %7568 = vrcp.f32 %v1506_v44 }
0x1491   :  { %7570 = vrcp.f32 %v2225_v50 }
0x149a   :  { %v7569_v46 = vpop.eup %7568 }
0x149b   :  { %v7571_v51 = vpop.eup %7570  ;;  %v1510_v54 = vmul.f32 %v7569_v46, %v8196_v4 }
0x149c   :  { %v2229_v58 = vmul.f32 0.0, %v7571_v51 }
0x14ef   :  { %v1513_v48 = vpop.permute.xlu0 %1512 }
0x14f0   :  { %v1515_v49 = vmul.f32 %v7569_v46, %v1513_v48  ;;  %v2457_v48 = vld [vmem:[#allocation3 + $0x6] sm:$0x3] }
0x14f2   :  { %1517 = vrot.lane.b32.xlu0 %v1515_v49, %s7858_s2 }
0x14ff   :  { %v2232_v52 = vpop.permute.xlu1 %2231 }
0x1500   :  { %v2234_v53 = vmul.f32 %v7571_v51, %v2232_v52 }
0x1502   :  { %2236 = vrot.lane.b32.xlu1 %v2234_v53, %s7858_s2 }
0x1564   :  { %v1518_v55 = vpop.permute.xlu0 %1517 }
0x1565   :  { %v1520_v56 = vadd.f32 %v1518_v55, %v1510_v54 }
0x1567   :  { %7572 = vtanh.f32 %v1520_v56 }
0x1571   :  { %v7573_v57 = vpop.eup %7572 }
0x1572   :  { %1523 = vrot.lane.b32.xlu0 %v7573_v57, %s7864_s26 }
0x1574   :  { %v2237_v59 = vpop.permute.xlu1 %2236 }
0x1575   :  { %v2239_v60 = vadd.f32 %v2237_v59, %v2229_v58 }
0x1577   :  { %7574 = vtanh.f32 %v2239_v60 }
0x1581   :  { %v7575_v61 = vpop.eup %7574 }
0x1582   :  { %2242 = vrot.lane.b32.xlu1 %v7575_v61, %s7864_s26 }
0x15e4   :  { %v1524_v62 = vpop.permute.xlu0 %1523 }
0x15e5   :  { %v1526_v63 = vmul.f32 %v7569_v46, %v1524_v62 }
0x15e7   :  { %1528 = vrot.lane.b32.xlu0 %v1526_v63, %s7858_s2 }
0x15f4   :  { %v2243_v2 = vpop.permute.xlu1 %2242 }
0x15f5   :  { %v2245_v3 = vmul.f32 %v7571_v51, %v2243_v2 }
0x15f7   :  { %2247 = vrot.lane.b32.xlu1 %v2245_v3, %s7858_s2 }
0x1659   :  { %v1529_v4 = vpop.permute.xlu0 %1528 }
0x165a   :  { %1532 = vst.msk [vmem:[#allocation2 + $0xe] sm:$0x3] %vm803_vm2, %v1529_v4  ;;  %v2560_v4 = vld [vmem:[#allocation3 + $0x8] sm:$0x3] }
0x1661   :  { %v2070_v5 = vld [vmem:[#allocation2 + $0xe] sm:$0x3] }
0x1662   :  { %6649 = vmatmul.mubr.msk.f32.vlgmr.msra.gmra.mrb[22].mxu1 %vm700_vm3, %v2070_v5 }
0x1663   :  { %7254 = vmatpush3.bf16.msra.mxu1 %v8208_v11  ;;  %6670 = vmatprep.mubr.msk.f32.mxu1 %vm7862_vm0, %v7863_v1 }
0x1664   :  { %7255 = vmatprep.subr.bf16.mxu1 %v7861_v0 }
0x1667   :  { %7257 = vmatpush3.bf16.msra.mxu1 %v8215_v17 }
0x1668   :  { %7264 = vmatprep.subr.bf16.mxu1 %v7861_v0 }
0x1669   :  { %v2248_v6 = vpop.permute.xlu1 %2247 }
0x166a   :  { %2250 = vst.msk [vmem:[#allocation2] sm:$0x3] %vm803_vm2, %v2248_v6  ;;  %6671 = vmatmul.mubr.msk.f32.vlgmr.msra.gmra.mrb[24].mxu1 %vm700_vm3, %v2248_v6 }
0x166b   :  { %7266 = vmatpush3.bf16.msra.mxu1 %v8208_v11  ;;  %6692 = vmatprep.mubr.msk.f32.mxu1 %vm7862_vm0, %v7863_v1 }
0x166c   :  { %7267 = vmatprep.subr.bf16.mxu1 %v7861_v0 }
0x166f   :  { %7269 = vmatpush3.bf16.msra.mxu1 %v8215_v17 }
0x1670   :  { %7276 = vmatprep.subr.bf16.mxu1 %v7861_v0 }
0x1735   :  { %v2140_v7 = vpop.f32.mrb[22].mxu1 }
0x1736   :  { %v2141_v8 = vadd.f32 %v8188_v47, %v2140_v7  ;;  %v6650_v9 = vpop.f32.mrb[23].mxu1 }
0x1738   :  { %2144 = vst [vmem:[#allocation3 + $0xe] sm:$0x3] %v2141_v8 }
0x173d   :  { %v2320_v12 = vpop.f32.mrb[24].mxu1 }
0x173e   :  { %v2324_v13 = vadd.f32 %v2320_v12, %v2251_v10  ;;  %v6672_v14 = vpop.f32.mrb[25].mxu1 }
0x1740   :  { %7576 = vtanh.f32 %v2324_v13  ;;  %v5973_v19 = vmul.f32 -1.442695, %v2324_v13 }
0x1742   :  { %7578 = vpow2.f32 %v5973_v19 }
0x174a   :  { %v7577_v16 = vpop.eup %7576 }
0x174b   :  { %2334 = vrot.lane.b32.xlu0 %v7577_v16, %s7864_s26 }
0x174c   :  { %v7579_v20 = vpop.eup %7578 }
0x174d   :  { %v2328_v21 = vadd.f32 1.0, %v7579_v20 }
0x174f   :  { %7580 = vrcp.f32 %v2328_v21 }
0x1759   :  { %v7581_v22 = vpop.eup %7580 }
0x175a   :  { %v2332_v47 = vmul.f32 %v7581_v22, %v2239_v60 }
0x17bd   :  { %v2335_v23 = vpop.permute.xlu0 %2334 }
0x17be   :  { %v2337_v15 = vmul.f32 %v7581_v22, %v2335_v23 }
0x17c0   :  { %2339 = vrot.lane.b32.xlu1 %v2337_v15, %s7858_s2 }
0x1832   :  { %v2340_v24 = vpop.permute.xlu1 %2339 }
0x1833   :  { %v2342_v25 = vadd.f32 %v2340_v24, %v2332_v47  ;;  %v2663_v24 = vld [vmem:[#allocation3 + $0xa] sm:$0x3] }
0x1835   :  { %7582 = vtanh.f32 %v2342_v25 }
0x183f   :  { %v7583_v26 = vpop.eup %7582 }
0x1840   :  { %2345 = vrot.lane.b32.xlu0 %v7583_v26, %s7864_s26 }
0x18b2   :  { %v2346_v27 = vpop.permute.xlu0 %2345 }
0x18b3   :  { %v2348_v18 = vmul.f32 %v7581_v22, %v2346_v27 }
0x18b5   :  { %2350 = vrot.lane.b32.xlu1 %v2348_v18, %s7858_s2 }
0x1927   :  { %v2351_v28 = vpop.permute.xlu1 %2350 }
0x1928   :  { %2353 = vst.msk [vmem:[#allocation2 + $0x2] sm:$0x3] %vm803_vm2, %v2351_v28  ;;  %6682 = vmatmul.mubr.msk.f32.vlgmr.msra.gmra.mrb[26].mxu0 %vm700_vm3, %v2351_v28 }
0x1929   :  { %7272 = vmatpush3.bf16.msra.mxu0 %v8208_v11  ;;  %6703 = vmatprep.mubr.msk.f32.mxu0 %vm7862_vm0, %v7863_v1 }
0x192a   :  { %7273 = vmatprep.subr.bf16.mxu0 %v7861_v0 }
0x192d   :  { %7275 = vmatpush3.bf16.msra.mxu0 %v8215_v17 }
0x192e   :  { %7282 = vmatprep.subr.bf16.mxu0 %v7861_v0 }
0x19fb   :  { %v2423_v30 = vpop.f32.mrb[26].mxu0 }
0x19fc   :  { %v2427_v31 = vadd.f32 %v2423_v30, %v2354_v29  ;;  %v6683_v32 = vpop.f32.mrb[27].mxu0 }
0x19fe   :  { %7584 = vtanh.f32 %v2427_v31  ;;  %v5975_v34 = vmul.f32 -1.442695, %v2427_v31 }
0x1a00   :  { %7586 = vpow2.f32 %v5975_v34 }
0x1a08   :  { %v7585_v33 = vpop.eup %7584 }
0x1a09   :  { %2437 = vrot.lane.b32.xlu0 %v7585_v33, %s7864_s26 }
0x1a0a   :  { %v7587_v35 = vpop.eup %7586 }
0x1a0b   :  { %v2431_v36 = vadd.f32 1.0, %v7587_v35 }
0x1a0d   :  { %7588 = vrcp.f32 %v2431_v36 }
0x1a17   :  { %v7589_v37 = vpop.eup %7588 }
0x1a18   :  { %v2435_v40 = vmul.f32 %v7589_v37, %v2342_v25 }
0x1a7b   :  { %v2438_v38 = vpop.permute.xlu0 %2437 }
0x1a7c   :  { %v2440_v39 = vmul.f32 %v7589_v37, %v2438_v38  ;;  %v2973_v38 = vld [vmem:[#allocation7 + $0x20] sm:$0xff] }
0x1a7e   :  { %2442 = vrot.lane.b32.xlu1 %v2440_v39, %s7858_s2  ;;  %v2974_v39 = vld [vmem:[#allocation7 + $0x28] sm:$0xff] }
0x1af0   :  { %v2443_v41 = vpop.permute.xlu1 %2442 }
0x1af1   :  { %v2445_v42 = vadd.f32 %v2443_v41, %v2435_v40  ;;  %v8333_v40 = vpack.c.bf16 %v2974_v39, %v2973_v38  ;;  %v2975_v41 = vld [vmem:[#allocation7 + $0x30] sm:$0xff] }
0x1af3   :  { %7590 = vtanh.f32 %v2445_v42 }
0x1afd   :  { %v7591_v43 = vpop.eup %7590 }
0x1afe   :  { %2448 = vrot.lane.b32.xlu0 %v7591_v43, %s7864_s26 }
0x1b70   :  { %v2449_v44 = vpop.permute.xlu0 %2448 }
0x1b71   :  { %v2451_v45 = vmul.f32 %v7589_v37, %v2449_v44 }
0x1b73   :  { %2453 = vrot.lane.b32.xlu1 %v2451_v45, %s7858_s2  ;;  %v2979_v45 = vld [vmem:[#allocation2] sm:$0x3] }
0x1be5   :  { %v2454_v46 = vpop.permute.xlu1 %2453 }
0x1be6   :  { %2456 = vst.msk [vmem:[#allocation2 + $0x4] sm:$0x3] %vm803_vm2, %v2454_v46  ;;  %6693 = vmatmul.mubr.msk.f32.vlgmr.msra.gmra.mrb[26].mxu1 %vm700_vm3, %v2454_v46 }
0x1be7   :  { %7278 = vmatpush3.bf16.msra.mxu1 %v8208_v11  ;;  %6714 = vmatprep.mubr.msk.f32.mxu1 %vm7862_vm0, %v7863_v1 }
0x1be8   :  { %7279 = vmatprep.subr.bf16.mxu1 %v7861_v0 }
0x1beb   :  { %7281 = vmatpush3.bf16.msra.mxu1 %v8215_v17 }
0x1bec   :  { %7288 = vmatprep.subr.bf16.mxu1 %v7861_v0 }
0x1bed   :  { %v3135_v46 = vld [vmem:[#allocation2 + $0x4] sm:$0x3] }
0x1cb9   :  { %v2526_v49 = vpop.f32.mrb[26].mxu1 }
0x1cba   :  { %v2530_v50 = vadd.f32 %v2526_v49, %v2457_v48  ;;  %v6694_v51 = vpop.f32.mrb[27].mxu1  ;;  %v2766_v49 = vld [vmem:[#allocation3 + $0xc] sm:$0x3] }
0x1cbc   :  { %7592 = vtanh.f32 %v2530_v50  ;;  %v5977_v53 = vmul.f32 -1.442695, %v2530_v50 }
0x1cbe   :  { %7594 = vpow2.f32 %v5977_v53  ;;  %v8369_v53 = vld [vmem:[%s8731_s4 + $0x2] ss:$0 sm:$0xff] }
0x1cc6   :  { %v7593_v52 = vpop.eup %7592 }
0x1cc7   :  { %2540 = vrot.lane.b32.xlu0 %v7593_v52, %s7864_s26 }
0x1cc8   :  { %v7595_v54 = vpop.eup %7594 }
0x1cc9   :  { %v2534_v55 = vadd.f32 1.0, %v7595_v54 }
0x1ccb   :  { %7596 = vrcp.f32 %v2534_v55 }
0x1cd5   :  { %v7597_v56 = vpop.eup %7596 }
0x1cd6   :  { %v2538_v59 = vmul.f32 %v7597_v56, %v2445_v42  ;;  %v2976_v42 = vld [vmem:[#allocation7 + $0x38] sm:$0xff] }
0x1cd7   :  { %v8338_v44 = vpack.c.bf16 %v2976_v42, %v2975_v41 }
0x1d39   :  { %v2541_v57 = vpop.permute.xlu0 %2540 }
0x1d3a   :  { %v2543_v58 = vmul.f32 %v7597_v56, %v2541_v57 }
0x1d3c   :  { %2545 = vrot.lane.b32.xlu1 %v2543_v58, %s7858_s2 }
0x1dae   :  { %v2546_v60 = vpop.permute.xlu1 %2545 }
0x1daf   :  { %v2548_v61 = vadd.f32 %v2546_v60, %v2538_v59 }
0x1db1   :  { %7598 = vtanh.f32 %v2548_v61 }
0x1dbb   :  { %v7599_v62 = vpop.eup %7598 }
0x1dbc   :  { %2551 = vrot.lane.b32.xlu0 %v7599_v62, %s7864_s26 }
0x1e2e   :  { %v2552_v63 = vpop.permute.xlu0 %2551 }
0x1e2f   :  { %v2554_v2 = vmul.f32 %v7597_v56, %v2552_v63 }
0x1e31   :  { %2556 = vrot.lane.b32.xlu1 %v2554_v2, %s7858_s2 }
0x1ea3   :  { %v2557_v3 = vpop.permute.xlu1 %2556 }
0x1ea4   :  { %2559 = vst.msk [vmem:[#allocation2 + $0x6] sm:$0x3] %vm803_vm2, %v2557_v3  ;;  %6704 = vmatmul.mubr.msk.f32.vlgmr.msra.gmra.mrb[28].mxu0 %vm700_vm3, %v2557_v3 }
0x1ea5   :  { %7284 = vmatpush3.bf16.msra.mxu0 %v8208_v11  ;;  %6725 = vmatprep.mubr.msk.f32.mxu0 %vm7862_vm0, %v7863_v1 }
0x1ea6   :  { %7285 = vmatprep.subr.bf16.mxu0 %v7861_v0 }
0x1ea9   :  { %7287 = vmatpush3.bf16.msra.mxu0 %v8215_v17 }
0x1eaa   :  { %7294 = vmatprep.subr.bf16.mxu0 %v7861_v0 }
0x1f77   :  { %v2629_v5 = vpop.f32.mrb[28].mxu0 }
0x1f78   :  { %v2633_v6 = vadd.f32 %v2629_v5, %v2560_v4  ;;  %v6705_v7 = vpop.f32.mrb[29].mxu0 }
0x1f7a   :  { %7600 = vtanh.f32 %v2633_v6  ;;  %v5979_v9 = vmul.f32 -1.442695, %v2633_v6 }
0x1f7c   :  { %7602 = vpow2.f32 %v5979_v9 }
0x1f84   :  { %v7601_v8 = vpop.eup %7600 }
0x1f85   :  { %2643 = vrot.lane.b32.xlu0 %v7601_v8, %s7864_s26 }
0x1f86   :  { %v7603_v10 = vpop.eup %7602 }
0x1f87   :  { %v2637_v12 = vadd.f32 1.0, %v7603_v10 }
0x1f89   :  { %7604 = vrcp.f32 %v2637_v12 }
0x1f93   :  { %v7605_v13 = vpop.eup %7604 }
0x1f94   :  { %v2641_v19 = vmul.f32 %v7605_v13, %v2548_v61 }
0x1ff7   :  { %v2644_v14 = vpop.permute.xlu0 %2643 }
0x1ff8   :  { %v2646_v16 = vmul.f32 %v7605_v13, %v2644_v14 }
0x1ffa   :  { %2648 = vrot.lane.b32.xlu1 %v2646_v16, %s7858_s2 }
0x206c   :  { %v2649_v20 = vpop.permute.xlu1 %2648 }
0x206d   :  { %v2651_v21 = vadd.f32 %v2649_v20, %v2641_v19  ;;  %v3586_v19 = vld [vmem:[#allocation9 + $0x40] sm:$0xff]  ;;  %v3587_v20 = vld [vmem:[#allocation9 + $0x48] sm:$0xff] }
0x206f   :  { %7606 = vtanh.f32 %v2651_v21 }
0x2079   :  { %v7607_v22 = vpop.eup %7606 }
0x207a   :  { %2654 = vrot.lane.b32.xlu0 %v7607_v22, %s7864_s26  ;;  %v3588_v22 = vld [vmem:[#allocation9 + $0x50] sm:$0xff] }
0x20ec   :  { %v2655_v23 = vpop.permute.xlu0 %2654 }
0x20ed   :  { %v2657_v15 = vmul.f32 %v7605_v13, %v2655_v23  ;;  %v3589_v23 = vld [vmem:[#allocation9 + $0x58] sm:$0xff] }
0x20ef   :  { %2659 = vrot.lane.b32.xlu1 %v2657_v15, %s7858_s2  ;;  %v3060_v15 = vld [vmem:[#allocation2 + $0x2] sm:$0x3] }
0x2161   :  { %v2660_v47 = vpop.permute.xlu1 %2659 }
0x2162   :  { %2662 = vst.msk [vmem:[#allocation2 + $0x8] sm:$0x3] %vm803_vm2, %v2660_v47  ;;  %6715 = vmatmul.mubr.msk.f32.vlgmr.msra.gmra.mrb[28].mxu1 %vm700_vm3, %v2660_v47 }
0x2163   :  { %7290 = vmatpush3.bf16.msra.mxu1 %v8208_v11  ;;  %6736 = vmatprep.mubr.msk.f32.mxu1 %vm7862_vm0, %v7863_v1 }
0x2164   :  { %7291 = vmatprep.subr.bf16.mxu1 %v7861_v0 }
0x2167   :  { %7293 = vmatpush3.bf16.msra.mxu1 %v8215_v17 }
0x2168   :  { %7300 = vmatprep.subr.bf16.mxu1 %v7861_v0 }
0x2169   :  { %v3285_v48 = vld [vmem:[#allocation2 + $0x8] sm:$0x3] }
0x2235   :  { %v2732_v25 = vpop.f32.mrb[28].mxu1 }
0x2236   :  { %v2736_v26 = vadd.f32 %v2732_v25, %v2663_v24  ;;  %v6716_v27 = vpop.f32.mrb[29].mxu1  ;;  %v8396_v24 = vpack.c.bf16 %v3589_v23, %v3588_v22  ;;  %v3210_v25 = vld [vmem:[#allocation2 + $0x6] sm:$0x3] }
0x2237   :  { %v2869_v27 = vld [vmem:[#allocation3 + $0xe] sm:$0x3] }
0x2238   :  { %7608 = vtanh.f32 %v2736_v26  ;;  %v5981_v28 = vmul.f32 -1.442695, %v2736_v26 }
0x223a   :  { %7610 = vpow2.f32 %v5981_v28 }
0x2242   :  { %v7609_v18 = vpop.eup %7608 }
0x2243   :  { %2746 = vrot.lane.b32.xlu0 %v7609_v18, %s7864_s26 }
0x2244   :  { %v7611_v11 = vpop.eup %7610 }
0x2245   :  { %v2740_v29 = vadd.f32 1.0, %v7611_v11 }
0x2247   :  { %7612 = vrcp.f32 %v2740_v29 }
0x2251   :  { %v7613_v30 = vpop.eup %7612 }
0x2252   :  { %v2744_v17 = vmul.f32 %v7613_v30, %v2651_v21  ;;  %v8389_v21 = vpack.c.bf16 %v3587_v20, %v3586_v19 }
0x22b5   :  { %v2747_v31 = vpop.permute.xlu0 %2746 }
0x22b6   :  { %v2749_v32 = vmul.f32 %v7613_v30, %v2747_v31 }
0x22b8   :  { %2751 = vrot.lane.b32.xlu1 %v2749_v32, %s7858_s2 }
0x232a   :  { %v2752_v33 = vpop.permute.xlu1 %2751 }
0x232b   :  { %v8328_v34 = vadd.f32 %v2752_v33, %v2744_v17 }
0x232d   :  { %7614 = vtanh.f32 %v8328_v34 }
0x2337   :  { %v7615_v35 = vpop.eup %7614 }
0x2338   :  { %2757 = vrot.lane.b32.xlu0 %v7615_v35, %s7864_s26 }
0x23aa   :  { %v2758_v36 = vpop.permute.xlu0 %2757 }
0x23ab   :  { %v2760_v37 = vmul.f32 %v7613_v30, %v2758_v36 }
0x23ad   :  { %2762 = vrot.lane.b32.xlu1 %v2760_v37, %s7858_s2 }
0x241f   :  { %v2763_v43 = vpop.permute.xlu1 %2762 }
0x2420   :  { %2765 = vst.msk [vmem:[#allocation2 + $0xa] sm:$0x3] %vm803_vm2, %v2763_v43  ;;  %6726 = vmatmul.mubr.msk.f32.vlgmr.msra.gmra.mrb[30].mxu0 %vm700_vm3, %v2763_v43 }
0x2421   :  { %7296 = vmatpush3.bf16.msra.mxu0 %v8333_v40  ;;  %6747 = vmatprep.mubr.msk.f32.mxu0 %vm7862_vm0, %v7863_v1 }
0x2422   :  { %7297 = vmatprep.subr.bf16.mxu0 %v7861_v0 }
0x2425   :  { %7299 = vmatpush3.bf16.msra.mxu0 %v8338_v44 }
0x2426   :  { %7306 = vmatprep.subr.bf16.mxu0 %v7861_v0 }
0x2427   :  { %v3360_v26 = vld [vmem:[#allocation2 + $0xa] sm:$0x3] }
0x2428   :  { %6748 = vmatmul.mubr.msk.f32.vlgmr.msra.gmra.mrb[32].mxu0 %vm700_vm3, %v2979_v45 }
0x2429   :  { %7308 = vmatpush3.bf16.msra.mxu0 %v8333_v40  ;;  %6769 = vmatprep.mubr.msk.f32.mxu0 %vm7862_vm0, %v7863_v1 }
0x242a   :  { %7309 = vmatprep.subr.bf16.mxu0 %v7861_v0 }
0x242d   :  { %7311 = vmatpush3.bf16.msra.mxu0 %v8338_v44 }
0x242e   :  { %7318 = vmatprep.subr.bf16.mxu0 %v7861_v0 }
0x2430   :  { %6770 = vmatmul.mubr.msk.f32.vlgmr.msra.gmra.mrb[34].mxu0 %vm700_vm3, %v3135_v46 }
0x2431   :  { %7320 = vmatpush3.bf16.msra.mxu0 %v8333_v40  ;;  %6791 = vmatprep.mubr.msk.f32.mxu0 %vm7862_vm0, %v7863_v1 }
0x2432   :  { %7321 = vmatprep.subr.bf16.mxu0 %v7861_v0 }
0x2435   :  { %7323 = vmatpush3.bf16.msra.mxu0 %v8338_v44 }
0x2436   :  { %7330 = vmatprep.subr.bf16.mxu0 %v7861_v0 }
0x2438   :  { %6792 = vmatmul.mubr.msk.f32.vlgmr.msra.gmra.mrb[36].mxu0 %vm700_vm3, %v3285_v48 }
0x2439   :  { %7332 = vmatpush3.bf16.msra.mxu0 %v8333_v40  ;;  %6813 = vmatprep.mubr.msk.f32.mxu0 %vm7862_vm0, %v7863_v1 }
0x243a   :  { %7333 = vmatprep.subr.bf16.mxu0 %v7861_v0 }
0x243d   :  { %7335 = vmatpush3.bf16.msra.mxu0 %v8338_v44 }
0x243e   :  { %7342 = vmatprep.subr.bf16.mxu0 %v7861_v0 }
0x24f3   :  { %v2835_v50 = vpop.f32.mrb[30].mxu0 }
0x24f4   :  { %v2839_v51 = vadd.f32 %v2835_v50, %v2766_v49  ;;  %v6727_v52 = vpop.f32.mrb[31].mxu0 }
0x24f6   :  { %7616 = vtanh.f32 %v2839_v51  ;;  %v5983_v2 = vmul.f32 -1.442695, %v2839_v51 }
0x24f8   :  { %7618 = vpow2.f32 %v5983_v2 }
0x24fb   :  { %v3055_v54 = vpop.f32.mrb[32].mxu0 }
0x24fc   :  { %v3056_v55 = vadd.f32 %v8369_v53, %v3055_v54  ;;  %v6749_v56 = vpop.f32.mrb[33].mxu0 }
0x24fe   :  { %3059 = vst [vmem:[#allocation3] sm:$0x3] %v3056_v55 }
0x2500   :  { %v7617_v57 = vpop.eup %7616 }
0x2501   :  { %2849 = vrot.lane.b32.xlu0 %v7617_v57, %s7864_s26 }
0x2502   :  { %v7619_v3 = vpop.eup %7618 }
0x2503   :  { %v3205_v58 = vpop.f32.mrb[34].mxu0  ;;  %v2843_v4 = vadd.f32 1.0, %v7619_v3 }
0x2504   :  { %v3206_v59 = vadd.f32 %v8369_v53, %v3205_v58  ;;  %v6771_v60 = vpop.f32.mrb[35].mxu0 }
0x2505   :  { %7620 = vrcp.f32 %v2843_v4  ;;  %v3590_v36 = vld [vmem:[#allocation3] sm:$0x3] }
0x2506   :  { %3209 = vst [vmem:[#allocation3 + $0x4] sm:$0x3] %v3206_v59 }
0x250b   :  { %v3355_v61 = vpop.f32.mrb[36].mxu0 }
0x250c   :  { %v3356_v62 = vadd.f32 %v8369_v53, %v3355_v61  ;;  %v6793_v63 = vpop.f32.mrb[37].mxu0 }
0x250e   :  { %3359 = vst [vmem:[#allocation3 + $0x8] sm:$0x3] %v3356_v62 }
0x250f   :  { %v7621_v5 = vpop.eup %7620 }
0x2510   :  { %v2847_v8 = vmul.f32 %v7621_v5, %v8328_v34 }
0x2573   :  { %v2850_v6 = vpop.permute.xlu0 %2849 }
0x2574   :  { %v2852_v7 = vmul.f32 %v7621_v5, %v2850_v6 }
0x2576   :  { %2854 = vrot.lane.b32.xlu1 %v2852_v7, %s7858_s2 }
0x25e8   :  { %v2855_v9 = vpop.permute.xlu1 %2854 }
0x25e9   :  { %v8377_v10 = vadd.f32 %v2855_v9, %v2847_v8 }
0x25eb   :  { %7622 = vtanh.f32 %v8377_v10 }
0x25f5   :  { %v7623_v12 = vpop.eup %7622 }
0x25f6   :  { %2860 = vrot.lane.b32.xlu0 %v7623_v12, %s7864_s26 }
0x2668   :  { %v2861_v13 = vpop.permute.xlu0 %2860 }
0x2669   :  { %v2863_v14 = vmul.f32 %v7621_v5, %v2861_v13 }
0x266b   :  { %2865 = vrot.lane.b32.xlu1 %v2863_v14, %s7858_s2 }
0x26dd   :  { %v2866_v16 = vpop.permute.xlu1 %2865 }
0x26de   :  { %2868 = vst.msk [vmem:[#allocation2 + $0xc] sm:$0x3] %vm803_vm2, %v2866_v16  ;;  %6737 = vmatmul.mubr.msk.f32.vlgmr.msra.gmra.mrb[30].mxu1 %vm700_vm3, %v2866_v16 }
0x26df   :  { %7302 = vmatpush3.bf16.msra.mxu1 %v8333_v40  ;;  %6758 = vmatprep.mubr.msk.f32.mxu1 %vm7862_vm0, %v7863_v1 }
0x26e0   :  { %7303 = vmatprep.subr.bf16.mxu1 %v7861_v0 }
0x26e3   :  { %7305 = vmatpush3.bf16.msra.mxu1 %v8338_v44 }
0x26e4   :  { %7312 = vmatprep.subr.bf16.mxu1 %v7861_v0 }
0x26e5   :  { %v3435_v47 = vld [vmem:[#allocation2 + $0xc] sm:$0x3] }
0x26e6   :  { %6759 = vmatmul.mubr.msk.f32.vlgmr.msra.gmra.mrb[32].mxu1 %vm700_vm3, %v3060_v15  ;;  %6814 = vmatmul.mubr.msk.f32.vlgmr.msra.gmra.mrb[38].mxu0 %vm700_vm3, %v3435_v47 }
0x26e7   :  { %7314 = vmatpush3.bf16.msra.mxu1 %v8333_v40  ;;  %7344 = vmatpush3.bf16.msra.mxu0 %v8389_v21 }
0x26e8   :  { %7315 = vmatprep.subr.bf16.mxu1 %v7861_v0  ;;  %7345 = vmatprep.subr.bf16.mxu0 %v7861_v0 }
0x26e9   :  { %6780 = vmatprep.mubr.msk.f32.mxu1 %vm7862_vm0, %v7863_v1  ;;  %6835 = vmatprep.mubr.msk.f32.mxu0 %vm7862_vm0, %v7863_v1 }
0x26eb   :  { %7317 = vmatpush3.bf16.msra.mxu1 %v8338_v44  ;;  %7347 = vmatpush3.bf16.msra.mxu0 %v8396_v24 }
0x26ec   :  { %7324 = vmatprep.subr.bf16.mxu1 %v7861_v0  ;;  %7354 = vmatprep.subr.bf16.mxu0 %v7861_v0 }
0x26ee   :  { %6781 = vmatmul.mubr.msk.f32.vlgmr.msra.gmra.mrb[34].mxu1 %vm700_vm3, %v3210_v25  ;;  %6836 = vmatmul.mubr.f32.vlgmr.msra.gmra.mrb[40].mxu0 %v7863_v1 }
0x26ef   :  { %7326 = vmatpush3.bf16.msra.mxu1 %v8333_v40  ;;  %6802 = vmatprep.mubr.msk.f32.mxu1 %vm7862_vm0, %v7863_v1 }
0x26f0   :  { %7327 = vmatprep.subr.bf16.mxu1 %v7861_v0  ;;  %7356 = vmatpush3.bf16.msra.mxu0 %v8389_v21 }
0x26f1   :  { %7357 = vmatprep.subr.bf16.mxu0 %v7861_v0  ;;  %6857 = vmatprep.mubr.msk.f32.mxu0 %vm7862_vm0, %v7863_v1 }
0x26f3   :  { %7329 = vmatpush3.bf16.msra.mxu1 %v8338_v44 }
0x26f4   :  { %7336 = vmatprep.subr.bf16.mxu1 %v7861_v0  ;;  %7359 = vmatpush3.bf16.msra.mxu0 %v8396_v24 }
0x26f5   :  { %7366 = vmatprep.subr.bf16.mxu0 %v7861_v0 }
0x26f6   :  { %6803 = vmatmul.mubr.msk.f32.vlgmr.msra.gmra.mrb[36].mxu1 %vm700_vm3, %v3360_v26 }
0x26f7   :  { %7338 = vmatpush3.bf16.msra.mxu1 %v8333_v40  ;;  %6824 = vmatprep.mubr.msk.f32.mxu1 %vm7862_vm0, %v7863_v1 }
0x26f8   :  { %7339 = vmatprep.subr.bf16.mxu1 %v7861_v0 }
0x26fb   :  { %7341 = vmatpush3.bf16.msra.mxu1 %v8338_v44 }
0x26fc   :  { %7348 = vmatprep.subr.bf16.mxu1 %v7861_v0 }
0x27b1   :  { %v2938_v18 = vpop.f32.mrb[30].mxu1 }
0x27b2   :  { %v2942_v28 = vadd.f32 %v2938_v18, %v2869_v27  ;;  %v6738_v11 = vpop.f32.mrb[31].mxu1 }
0x27b4   :  { %7624 = vtanh.f32 %v2942_v28  ;;  %v5985_v46 = vmul.f32 -1.442695, %v2942_v28 }
0x27b9   :  { %v3130_v29 = vpop.f32.mrb[32].mxu1  ;;  %v3505_v30 = vpop.f32.mrb[38].mxu0 }
0x27ba   :  { %v3131_v31 = vadd.f32 %v8369_v53, %v3130_v29  ;;  %v6760_v32 = vpop.f32.mrb[33].mxu1  ;;  %v3506_v17 = vadd.f32 %v8369_v53, %v3505_v30  ;;  %v6815_v33 = vpop.f32.mrb[39].mxu0 }
0x27bc   :  { %3134 = vst [vmem:[#allocation3 + $0x2] sm:$0x3] %v3131_v31  ;;  %3509 = vst [vmem:[#allocation3 + $0xc] sm:$0x3] %v3506_v17 }
0x27be   :  { %v7625_v34 = vpop.eup %7624 }
0x27bf   :  { %2952 = vrot.lane.b32.xlu0 %v7625_v34, %s7864_s26  ;;  %v3794_v34 = vld [vmem:[#allocation3 + $0x4] sm:$0x3] }
0x27c1   :  { %v3280_v35 = vpop.f32.mrb[34].mxu1  ;;  %v3657_v37 = vpop.f32.mrb[40].mxu0 }
0x27c2   :  { %v3281_v38 = vadd.f32 %v8369_v53, %v3280_v35  ;;  %v3661_v39 = vadd.f32 %v3657_v37, %v3590_v36  ;;  %v6782_v40 = vpop.f32.mrb[35].mxu1  ;;  %v6837_v41 = vpop.f32.mrb[41].mxu0 }
0x27c3   :  { %v3691_v20 = vld [vmem:[#allocation3 + $0x2] sm:$0x3] }
0x27c4   :  { %3284 = vst [vmem:[#allocation3 + $0x6] sm:$0x3] %v3281_v38  ;;  %7626 = vtanh.f32 %v3661_v39  ;;  %v5996_v49 = vmul.f32 -1.442695, %v3661_v39 }
0x27c5   :  { %7628 = vpow2.f32 %v5985_v46 }
0x27c6   :  { %7630 = vpow2.f32 %v5996_v49 }
0x27c9   :  { %v3430_v42 = vpop.f32.mrb[36].mxu1 }
0x27ca   :  { %v3431_v43 = vadd.f32 %v8369_v53, %v3430_v42  ;;  %v6804_v44 = vpop.f32.mrb[37].mxu1 }
0x27cc   :  { %3434 = vst [vmem:[#allocation3 + $0xa] sm:$0x3] %v3431_v43 }
0x27ce   :  { %v7627_v45 = vpop.eup %7626 }
0x27cf   :  { %3671 = vrot.lane.b32.xlu1 %v7627_v45, %s7864_s26  ;;  %v7629_v48 = vpop.eup %7628 }
0x27d0   :  { %v2946_v50 = vadd.f32 1.0, %v7629_v48  ;;  %v7631_v51 = vpop.eup %7630 }
0x27d1   :  { %v3665_v56 = vadd.f32 1.0, %v7631_v51 }
0x27d2   :  { %7632 = vrcp.f32 %v2946_v50 }
0x27d3   :  { %7634 = vrcp.f32 %v3665_v56 }
0x27dc   :  { %v7633_v52 = vpop.eup %7632 }
0x27dd   :  { %v7635_v57 = vpop.eup %7634  ;;  %v2950_v60 = vmul.f32 %v7633_v52, %v8377_v10 }
0x27de   :  { %v3669_v2 = vmul.f32 0.0, %v7635_v57 }
0x2831   :  { %v2953_v54 = vpop.permute.xlu0 %2952 }
0x2832   :  { %v2955_v55 = vmul.f32 %v7633_v52, %v2953_v54  ;;  %v3897_v54 = vld [vmem:[#allocation3 + $0x6] sm:$0x3] }
0x2834   :  { %2957 = vrot.lane.b32.xlu0 %v2955_v55, %s7858_s2 }
0x2841   :  { %v3672_v58 = vpop.permute.xlu1 %3671 }
0x2842   :  { %v3674_v59 = vmul.f32 %v7635_v57, %v3672_v58 }
0x2844   :  { %3676 = vrot.lane.b32.xlu1 %v3674_v59, %s7858_s2 }
0x28a6   :  { %v2958_v61 = vpop.permute.xlu0 %2957 }
0x28a7   :  { %v2960_v62 = vadd.f32 %v2958_v61, %v2950_v60 }
0x28a9   :  { %7636 = vtanh.f32 %v2960_v62 }
0x28b3   :  { %v7637_v63 = vpop.eup %7636 }
0x28b4   :  { %2963 = vrot.lane.b32.xlu0 %v7637_v63, %s7864_s26 }
0x28b6   :  { %v3677_v3 = vpop.permute.xlu1 %3676 }
0x28b7   :  { %v3679_v4 = vadd.f32 %v3677_v3, %v3669_v2 }
0x28b9   :  { %7638 = vtanh.f32 %v3679_v4 }
0x28c3   :  { %v7639_v5 = vpop.eup %7638 }
0x28c4   :  { %3682 = vrot.lane.b32.xlu1 %v7639_v5, %s7864_s26 }
0x2926   :  { %v2964_v6 = vpop.permute.xlu0 %2963 }
0x2927   :  { %v2966_v7 = vmul.f32 %v7633_v52, %v2964_v6 }
0x2929   :  { %2968 = vrot.lane.b32.xlu0 %v2966_v7, %s7858_s2 }
0x2936   :  { %v3683_v8 = vpop.permute.xlu1 %3682 }
0x2937   :  { %v3685_v9 = vmul.f32 %v7635_v57, %v3683_v8 }
0x2939   :  { %3687 = vrot.lane.b32.xlu1 %v3685_v9, %s7858_s2 }
0x299b   :  { %v2969_v10 = vpop.permute.xlu0 %2968 }
0x299c   :  { %2971 = vst.msk [vmem:[#allocation2 + $0xe] sm:$0x3] %vm803_vm2, %v2969_v10  ;;  %v4000_v10 = vld [vmem:[#allocation3 + $0x8] sm:$0x3] }
0x29a3   :  { %v3510_v12 = vld [vmem:[#allocation2 + $0xe] sm:$0x3] }
0x29a4   :  { %6825 = vmatmul.mubr.msk.f32.vlgmr.msra.gmra.mrb[38].mxu1 %vm700_vm3, %v3510_v12 }
0x29a5   :  { %7350 = vmatpush3.bf16.msra.mxu1 %v8389_v21  ;;  %6846 = vmatprep.mubr.msk.f32.mxu1 %vm7862_vm0, %v7863_v1 }
0x29a6   :  { %7351 = vmatprep.subr.bf16.mxu1 %v7861_v0 }
0x29a9   :  { %7353 = vmatpush3.bf16.msra.mxu1 %v8396_v24 }
0x29aa   :  { %7360 = vmatprep.subr.bf16.mxu1 %v7861_v0 }
0x29ab   :  { %v3688_v13 = vpop.permute.xlu1 %3687 }
0x29ac   :  { %3690 = vst.msk [vmem:[#allocation2] sm:$0x3] %vm803_vm2, %v3688_v13  ;;  %6847 = vmatmul.mubr.msk.f32.vlgmr.msra.gmra.mrb[40].mxu1 %vm700_vm3, %v3688_v13 }
0x29ad   :  { %7362 = vmatpush3.bf16.msra.mxu1 %v8389_v21  ;;  %6868 = vmatprep.mubr.msk.f32.mxu1 %vm7862_vm0, %v7863_v1 }
0x29ae   :  { %7363 = vmatprep.subr.bf16.mxu1 %v7861_v0 }
0x29b1   :  { %7365 = vmatpush3.bf16.msra.mxu1 %v8396_v24 }
0x29b2   :  { %7372 = vmatprep.subr.bf16.mxu1 %v7861_v0 }
0x2a77   :  { %v3580_v14 = vpop.f32.mrb[38].mxu1 }
0x2a78   :  { %v3581_v16 = vadd.f32 %v8369_v53, %v3580_v14  ;;  %v6826_v19 = vpop.f32.mrb[39].mxu1 }
0x2a7a   :  { %3584 = vst [vmem:[#allocation3 + $0xe] sm:$0x3] %v3581_v16 }
0x2a7f   :  { %v3760_v22 = vpop.f32.mrb[40].mxu1 }
0x2a80   :  { %v3764_v23 = vadd.f32 %v3760_v22, %v3691_v20  ;;  %v6848_v15 = vpop.f32.mrb[41].mxu1 }
0x2a82   :  { %7640 = vtanh.f32 %v3764_v23  ;;  %v5998_v25 = vmul.f32 -1.442695, %v3764_v23 }
0x2a84   :  { %7642 = vpow2.f32 %v5998_v25 }
0x2a8c   :  { %v7641_v47 = vpop.eup %7640 }
0x2a8d   :  { %3774 = vrot.lane.b32.xlu0 %v7641_v47, %s7864_s26 }
0x2a8e   :  { %v7643_v26 = vpop.eup %7642 }
0x2a8f   :  { %v3768_v27 = vadd.f32 1.0, %v7643_v26 }
0x2a91   :  { %7644 = vrcp.f32 %v3768_v27 }
0x2a9b   :  { %v7645_v18 = vpop.eup %7644 }
0x2a9c   :  { %v3772_v53 = vmul.f32 %v7645_v18, %v3679_v4 }
0x2aff   :  { %v3775_v28 = vpop.permute.xlu0 %3774 }
0x2b00   :  { %v3777_v11 = vmul.f32 %v7645_v18, %v3775_v28 }
0x2b02   :  { %3779 = vrot.lane.b32.xlu1 %v3777_v11, %s7858_s2 }
0x2b74   :  { %v3780_v29 = vpop.permute.xlu1 %3779 }
0x2b75   :  { %v3782_v30 = vadd.f32 %v3780_v29, %v3772_v53  ;;  %v4103_v29 = vld [vmem:[#allocation3 + $0xa] sm:$0x3] }
0x2b77   :  { %7646 = vtanh.f32 %v3782_v30 }
0x2b81   :  { %v7647_v31 = vpop.eup %7646 }
0x2b82   :  { %3785 = vrot.lane.b32.xlu0 %v7647_v31, %s7864_s26 }
0x2bf4   :  { %v3786_v32 = vpop.permute.xlu0 %3785 }
0x2bf5   :  { %v3788_v17 = vmul.f32 %v7645_v18, %v3786_v32 }
0x2bf7   :  { %3790 = vrot.lane.b32.xlu1 %v3788_v17, %s7858_s2 }
0x2c69   :  { %v3791_v33 = vpop.permute.xlu1 %3790 }
0x2c6a   :  { %3793 = vst.msk [vmem:[#allocation2 + $0x2] sm:$0x3] %vm803_vm2, %v3791_v33  ;;  %6858 = vmatmul.mubr.msk.f32.vlgmr.msra.gmra.mrb[42].mxu0 %vm700_vm3, %v3791_v33 }
0x2c6b   :  { %7368 = vmatpush3.bf16.msra.mxu0 %v8389_v21  ;;  %6879 = vmatprep.mubr.msk.f32.mxu0 %vm7862_vm0, %v7863_v1 }
0x2c6c   :  { %7369 = vmatprep.subr.bf16.mxu0 %v7861_v0 }
0x2c6f   :  { %7371 = vmatpush3.bf16.msra.mxu0 %v8396_v24 }
0x2c70   :  { %7378 = vmatprep.subr.bf16.mxu0 %v7861_v0 }
0x2d3d   :  { %v3863_v35 = vpop.f32.mrb[42].mxu0 }
0x2d3e   :  { %v3867_v36 = vadd.f32 %v3863_v35, %v3794_v34  ;;  %v6859_v37 = vpop.f32.mrb[43].mxu0 }
0x2d40   :  { %7648 = vtanh.f32 %v3867_v36  ;;  %v6000_v39 = vmul.f32 -1.442695, %v3867_v36 }
0x2d42   :  { %7650 = vpow2.f32 %v6000_v39 }
0x2d4a   :  { %v7649_v38 = vpop.eup %7648 }
0x2d4b   :  { %3877 = vrot.lane.b32.xlu0 %v7649_v38, %s7864_s26 }
0x2d4c   :  { %v7651_v40 = vpop.eup %7650 }
0x2d4d   :  { %v3871_v41 = vadd.f32 1.0, %v7651_v40 }
0x2d4f   :  { %7652 = vrcp.f32 %v3871_v41 }
0x2d59   :  { %v7653_v42 = vpop.eup %7652 }
0x2d5a   :  { %v3875_v45 = vmul.f32 %v7653_v42, %v3782_v30 }
0x2dbd   :  { %v3878_v43 = vpop.permute.xlu0 %3877 }
0x2dbe   :  { %v3880_v44 = vmul.f32 %v7653_v42, %v3878_v43  ;;  %v4413_v43 = vld [vmem:[#allocation7 + $0x40] sm:$0xff] }
0x2dc0   :  { %3882 = vrot.lane.b32.xlu1 %v3880_v44, %s7858_s2  ;;  %v4414_v44 = vld [vmem:[#allocation7 + $0x48] sm:$0xff] }
0x2e32   :  { %v3883_v46 = vpop.permute.xlu1 %3882 }
0x2e33   :  { %v3885_v48 = vadd.f32 %v3883_v46, %v3875_v45  ;;  %v8514_v45 = vpack.c.bf16 %v4414_v44, %v4413_v43  ;;  %v4415_v46 = vld [vmem:[#allocation7 + $0x50] sm:$0xff] }
0x2e35   :  { %7654 = vtanh.f32 %v3885_v48 }
0x2e3f   :  { %v7655_v49 = vpop.eup %7654 }
0x2e40   :  { %3888 = vrot.lane.b32.xlu0 %v7655_v49, %s7864_s26 }
0x2eb2   :  { %v3889_v50 = vpop.permute.xlu0 %3888 }
0x2eb3   :  { %v3891_v51 = vmul.f32 %v7653_v42, %v3889_v50 }
0x2eb5   :  { %3893 = vrot.lane.b32.xlu1 %v3891_v51, %s7858_s2  ;;  %v4419_v51 = vld [vmem:[#allocation2] sm:$0x3] }
0x2f27   :  { %v3894_v52 = vpop.permute.xlu1 %3893 }
0x2f28   :  { %3896 = vst.msk [vmem:[#allocation2 + $0x4] sm:$0x3] %vm803_vm2, %v3894_v52  ;;  %6869 = vmatmul.mubr.msk.f32.vlgmr.msra.gmra.mrb[42].mxu1 %vm700_vm3, %v3894_v52 }
0x2f29   :  { %7374 = vmatpush3.bf16.msra.mxu1 %v8389_v21  ;;  %6890 = vmatprep.mubr.msk.f32.mxu1 %vm7862_vm0, %v7863_v1 }
0x2f2a   :  { %7375 = vmatprep.subr.bf16.mxu1 %v7861_v0 }
0x2f2d   :  { %7377 = vmatpush3.bf16.msra.mxu1 %v8396_v24 }
0x2f2e   :  { %7384 = vmatprep.subr.bf16.mxu1 %v7861_v0 }
0x2f2f   :  { %v4575_v52 = vld [vmem:[#allocation2 + $0x4] sm:$0x3] }
0x2ffb   :  { %v3966_v55 = vpop.f32.mrb[42].mxu1 }
0x2ffc   :  { %v3970_v56 = vadd.f32 %v3966_v55, %v3897_v54  ;;  %v6870_v57 = vpop.f32.mrb[43].mxu1  ;;  %v4206_v55 = vld [vmem:[#allocation3 + $0xc] sm:$0x3] }
0x2ffe   :  { %7656 = vtanh.f32 %v3970_v56  ;;  %v6002_v59 = vmul.f32 -1.442695, %v3970_v56 }
0x3000   :  { %7658 = vpow2.f32 %v6002_v59  ;;  %v8550_v59 = vld [vmem:[%s8731_s4 + $0x3] ss:$0 sm:$0xff] }
0x3008   :  { %v7657_v58 = vpop.eup %7656 }
0x3009   :  { %3980 = vrot.lane.b32.xlu0 %v7657_v58, %s7864_s26 }
0x300a   :  { %v7659_v60 = vpop.eup %7658 }
0x300b   :  { %v3974_v61 = vadd.f32 1.0, %v7659_v60 }
0x300d   :  { %7660 = vrcp.f32 %v3974_v61 }
0x3017   :  { %v7661_v62 = vpop.eup %7660 }
0x3018   :  { %v3978_v3 = vmul.f32 %v7661_v62, %v3885_v48  ;;  %v4416_v48 = vld [vmem:[#allocation7 + $0x58] sm:$0xff] }
0x3019   :  { %v8519_v50 = vpack.c.bf16 %v4416_v48, %v4415_v46 }
0x307b   :  { %v3981_v63 = vpop.permute.xlu0 %3980 }
0x307c   :  { %v3983_v2 = vmul.f32 %v7661_v62, %v3981_v63 }
0x307e   :  { %3985 = vrot.lane.b32.xlu1 %v3983_v2, %s7858_s2 }
0x30f0   :  { %v3986_v4 = vpop.permute.xlu1 %3985 }
0x30f1   :  { %v3988_v5 = vadd.f32 %v3986_v4, %v3978_v3 }
0x30f3   :  { %7662 = vtanh.f32 %v3988_v5 }
0x30fd   :  { %v7663_v6 = vpop.eup %7662 }
0x30fe   :  { %3991 = vrot.lane.b32.xlu0 %v7663_v6, %s7864_s26 }
0x3170   :  { %v3992_v7 = vpop.permute.xlu0 %3991 }
0x3171   :  { %v3994_v8 = vmul.f32 %v7661_v62, %v3992_v7 }
0x3173   :  { %3996 = vrot.lane.b32.xlu1 %v3994_v8, %s7858_s2 }
0x31e5   :  { %v3997_v9 = vpop.permute.xlu1 %3996 }
0x31e6   :  { %3999 = vst.msk [vmem:[#allocation2 + $0x6] sm:$0x3] %vm803_vm2, %v3997_v9  ;;  %6880 = vmatmul.mubr.msk.f32.vlgmr.msra.gmra.mrb[44].mxu0 %vm700_vm3, %v3997_v9 }
0x31e7   :  { %7380 = vmatpush3.bf16.msra.mxu0 %v8389_v21  ;;  %6901 = vmatprep.mubr.msk.f32.mxu0 %vm7862_vm0, %v7863_v1 }
0x31e8   :  { %7381 = vmatprep.subr.bf16.mxu0 %v7861_v0 }
0x31eb   :  { %7383 = vmatpush3.bf16.msra.mxu0 %v8396_v24 }
0x31ec   :  { %7390 = vmatprep.subr.bf16.mxu0 %v7861_v0 }
0x32b9   :  { %v4069_v12 = vpop.f32.mrb[44].mxu0 }
0x32ba   :  { %v4073_v13 = vadd.f32 %v4069_v12, %v4000_v10  ;;  %v6881_v14 = vpop.f32.mrb[45].mxu0 }
0x32bc   :  { %7664 = vtanh.f32 %v4073_v13  ;;  %v6004_v19 = vmul.f32 -1.442695, %v4073_v13 }
0x32be   :  { %7666 = vpow2.f32 %v6004_v19 }
0x32c6   :  { %v7665_v16 = vpop.eup %7664 }
0x32c7   :  { %4083 = vrot.lane.b32.xlu0 %v7665_v16, %s7864_s26 }
0x32c8   :  { %v7667_v20 = vpop.eup %7666 }
0x32c9   :  { %v4077_v22 = vadd.f32 1.0, %v7667_v20 }
0x32cb   :  { %7668 = vrcp.f32 %v4077_v22 }
0x32d5   :  { %v7669_v23 = vpop.eup %7668 }
0x32d6   :  { %v4081_v25 = vmul.f32 %v7669_v23, %v3988_v5 }
0x3339   :  { %v4084_v15 = vpop.permute.xlu0 %4083 }
0x333a   :  { %v4086_v47 = vmul.f32 %v7669_v23, %v4084_v15 }
0x333c   :  { %4088 = vrot.lane.b32.xlu1 %v4086_v47, %s7858_s2 }
0x33ae   :  { %v4089_v26 = vpop.permute.xlu1 %4088 }
0x33af   :  { %v4091_v27 = vadd.f32 %v4089_v26, %v4081_v25  ;;  %v5026_v25 = vld [vmem:[#allocation9 + $0x60] sm:$0xff]  ;;  %v5027_v26 = vld [vmem:[#allocation9 + $0x68] sm:$0xff] }
0x33b1   :  { %7670 = vtanh.f32 %v4091_v27 }
0x33bb   :  { %v7671_v18 = vpop.eup %7670 }
0x33bc   :  { %4094 = vrot.lane.b32.xlu0 %v7671_v18, %s7864_s26  ;;  %v5028_v18 = vld [vmem:[#allocation9 + $0x70] sm:$0xff] }
0x342e   :  { %v4095_v28 = vpop.permute.xlu0 %4094 }
0x342f   :  { %v4097_v11 = vmul.f32 %v7669_v23, %v4095_v28  ;;  %v5029_v28 = vld [vmem:[#allocation9 + $0x78] sm:$0xff] }
0x3431   :  { %4099 = vrot.lane.b32.xlu1 %v4097_v11, %s7858_s2  ;;  %v4500_v11 = vld [vmem:[#allocation2 + $0x2] sm:$0x3] }
0x34a3   :  { %v4100_v53 = vpop.permute.xlu1 %4099 }
0x34a4   :  { %4102 = vst.msk [vmem:[#allocation2 + $0x8] sm:$0x3] %vm803_vm2, %v4100_v53  ;;  %6891 = vmatmul.mubr.msk.f32.vlgmr.msra.gmra.mrb[44].mxu1 %vm700_vm3, %v4100_v53 }
0x34a5   :  { %7386 = vmatpush3.bf16.msra.mxu1 %v8389_v21  ;;  %6912 = vmatprep.mubr.msk.f32.mxu1 %vm7862_vm0, %v7863_v1 }
0x34a6   :  { %7387 = vmatprep.subr.bf16.mxu1 %v7861_v0 }
0x34a9   :  { %7389 = vmatpush3.bf16.msra.mxu1 %v8396_v24 }
0x34aa   :  { %7396 = vmatprep.subr.bf16.mxu1 %v7861_v0 }
0x34ab   :  { %v4725_v54 = vld [vmem:[#allocation2 + $0x8] sm:$0x3] }
0x3577   :  { %v4172_v30 = vpop.f32.mrb[44].mxu1 }
0x3578   :  { %v4176_v31 = vadd.f32 %v4172_v30, %v4103_v29  ;;  %v6892_v32 = vpop.f32.mrb[45].mxu1  ;;  %v8577_v29 = vpack.c.bf16 %v5029_v28, %v5028_v18  ;;  %v4650_v30 = vld [vmem:[#allocation2 + $0x6] sm:$0x3] }
0x3579   :  { %v4309_v32 = vld [vmem:[#allocation3 + $0xe] sm:$0x3] }
0x357a   :  { %7672 = vtanh.f32 %v4176_v31  ;;  %v6006_v33 = vmul.f32 -1.442695, %v4176_v31 }
0x357c   :  { %7674 = vpow2.f32 %v6006_v33 }
0x3584   :  { %v7673_v17 = vpop.eup %7672 }
0x3585   :  { %4186 = vrot.lane.b32.xlu0 %v7673_v17, %s7864_s26 }
0x3586   :  { %v7675_v21 = vpop.eup %7674 }
0x3587   :  { %v4180_v34 = vadd.f32 1.0, %v7675_v21 }
0x3589   :  { %7676 = vrcp.f32 %v4180_v34 }
0x3593   :  { %v7677_v35 = vpop.eup %7676 }
0x3594   :  { %v4184_v24 = vmul.f32 %v7677_v35, %v4091_v27  ;;  %v8570_v27 = vpack.c.bf16 %v5027_v26, %v5026_v25 }
0x35f7   :  { %v4187_v36 = vpop.permute.xlu0 %4186 }
0x35f8   :  { %v4189_v37 = vmul.f32 %v7677_v35, %v4187_v36 }
0x35fa   :  { %4191 = vrot.lane.b32.xlu1 %v4189_v37, %s7858_s2 }
0x366c   :  { %v4192_v38 = vpop.permute.xlu1 %4191 }
0x366d   :  { %v8509_v39 = vadd.f32 %v4192_v38, %v4184_v24 }
0x366f   :  { %7678 = vtanh.f32 %v8509_v39 }
0x3679   :  { %v7679_v40 = vpop.eup %7678 }
0x367a   :  { %4197 = vrot.lane.b32.xlu0 %v7679_v40, %s7864_s26 }
0x36ec   :  { %v4198_v41 = vpop.permute.xlu0 %4197 }
0x36ed   :  { %v4200_v42 = vmul.f32 %v7677_v35, %v4198_v41 }
0x36ef   :  { %4202 = vrot.lane.b32.xlu1 %v4200_v42, %s7858_s2 }
0x3761   :  { %v4203_v49 = vpop.permute.xlu1 %4202 }
0x3762   :  { %4205 = vst.msk [vmem:[#allocation2 + $0xa] sm:$0x3] %vm803_vm2, %v4203_v49  ;;  %6902 = vmatmul.mubr.msk.f32.vlgmr.msra.gmra.mrb[46].mxu0 %vm700_vm3, %v4203_v49 }
0x3763   :  { %7392 = vmatpush3.bf16.msra.mxu0 %v8514_v45  ;;  %6923 = vmatprep.mubr.msk.f32.mxu0 %vm7862_vm0, %v7863_v1 }
0x3764   :  { %7393 = vmatprep.subr.bf16.mxu0 %v7861_v0 }
0x3767   :  { %7395 = vmatpush3.bf16.msra.mxu0 %v8519_v50 }
0x3768   :  { %7402 = vmatprep.subr.bf16.mxu0 %v7861_v0 }
0x3769   :  { %v4800_v31 = vld [vmem:[#allocation2 + $0xa] sm:$0x3] }
0x376a   :  { %6924 = vmatmul.mubr.msk.f32.vlgmr.msra.gmra.mrb[48].mxu0 %vm700_vm3, %v4419_v51 }
0x376b   :  { %7404 = vmatpush3.bf16.msra.mxu0 %v8514_v45  ;;  %6945 = vmatprep.mubr.msk.f32.mxu0 %vm7862_vm0, %v7863_v1 }
0x376c   :  { %7405 = vmatprep.subr.bf16.mxu0 %v7861_v0 }
0x376f   :  { %7407 = vmatpush3.bf16.msra.mxu0 %v8519_v50 }
0x3770   :  { %7414 = vmatprep.subr.bf16.mxu0 %v7861_v0 }
0x3772   :  { %6946 = vmatmul.mubr.msk.f32.vlgmr.msra.gmra.mrb[50].mxu0 %vm700_vm3, %v4575_v52 }
0x3773   :  { %7416 = vmatpush3.bf16.msra.mxu0 %v8514_v45  ;;  %6967 = vmatprep.mubr.msk.f32.mxu0 %vm7862_vm0, %v7863_v1 }
0x3774   :  { %7417 = vmatprep.subr.bf16.mxu0 %v7861_v0 }
0x3777   :  { %7419 = vmatpush3.bf16.msra.mxu0 %v8519_v50 }
0x3778   :  { %7426 = vmatprep.subr.bf16.mxu0 %v7861_v0 }
0x377a   :  { %6968 = vmatmul.mubr.msk.f32.vlgmr.msra.gmra.mrb[52].mxu0 %vm700_vm3, %v4725_v54 }
0x377b   :  { %7428 = vmatpush3.bf16.msra.mxu0 %v8514_v45  ;;  %6989 = vmatprep.mubr.msk.f32.mxu0 %vm7862_vm0, %v7863_v1 }
0x377c   :  { %7429 = vmatprep.subr.bf16.mxu0 %v7861_v0 }
0x377f   :  { %7431 = vmatpush3.bf16.msra.mxu0 %v8519_v50 }
0x3780   :  { %7438 = vmatprep.subr.bf16.mxu0 %v7861_v0 }
0x3835   :  { %v4275_v56 = vpop.f32.mrb[46].mxu0 }
0x3836   :  { %v4279_v57 = vadd.f32 %v4275_v56, %v4206_v55  ;;  %v6903_v58 = vpop.f32.mrb[47].mxu0 }
0x3838   :  { %7680 = vtanh.f32 %v4279_v57  ;;  %v6008_v8 = vmul.f32 -1.442695, %v4279_v57 }
0x383a   :  { %7682 = vpow2.f32 %v6008_v8 }
0x383d   :  { %v4495_v60 = vpop.f32.mrb[48].mxu0 }
0x383e   :  { %v4496_v61 = vadd.f32 %v8550_v59, %v4495_v60  ;;  %v6925_v62 = vpop.f32.mrb[49].mxu0 }
0x3840   :  { %4499 = vst [vmem:[#allocation3] sm:$0x3] %v4496_v61 }
0x3842   :  { %v7681_v63 = vpop.eup %7680 }
0x3843   :  { %4289 = vrot.lane.b32.xlu0 %v7681_v63, %s7864_s26 }
0x3844   :  { %v7683_v9 = vpop.eup %7682 }
0x3845   :  { %v4645_v2 = vpop.f32.mrb[50].mxu0  ;;  %v4283_v10 = vadd.f32 1.0, %v7683_v9 }
0x3846   :  { %v4646_v3 = vadd.f32 %v8550_v59, %v4645_v2  ;;  %v6947_v4 = vpop.f32.mrb[51].mxu0 }
0x3847   :  { %7684 = vrcp.f32 %v4283_v10  ;;  %v5030_v41 = vld [vmem:[#allocation3] sm:$0x3] }
0x3848   :  { %4649 = vst [vmem:[#allocation3 + $0x4] sm:$0x3] %v4646_v3 }
0x384d   :  { %v4795_v5 = vpop.f32.mrb[52].mxu0 }
0x384e   :  { %v4796_v6 = vadd.f32 %v8550_v59, %v4795_v5  ;;  %v6969_v7 = vpop.f32.mrb[53].mxu0 }
0x3850   :  { %4799 = vst [vmem:[#allocation3 + $0x8] sm:$0x3] %v4796_v6 }
0x3851   :  { %v7685_v12 = vpop.eup %7684 }
0x3852   :  { %v4287_v16 = vmul.f32 %v7685_v12, %v8509_v39 }
0x38b5   :  { %v4290_v13 = vpop.permute.xlu0 %4289 }
0x38b6   :  { %v4292_v14 = vmul.f32 %v7685_v12, %v4290_v13 }
0x38b8   :  { %4294 = vrot.lane.b32.xlu1 %v4292_v14, %s7858_s2 }
0x392a   :  { %v4295_v19 = vpop.permute.xlu1 %4294 }
0x392b   :  { %v8558_v20 = vadd.f32 %v4295_v19, %v4287_v16 }
0x392d   :  { %7686 = vtanh.f32 %v8558_v20 }
0x3937   :  { %v7687_v22 = vpop.eup %7686 }
0x3938   :  { %4300 = vrot.lane.b32.xlu0 %v7687_v22, %s7864_s26 }
0x39aa   :  { %v4301_v23 = vpop.permute.xlu0 %4300 }
0x39ab   :  { %v4303_v15 = vmul.f32 %v7685_v12, %v4301_v23 }
0x39ad   :  { %4305 = vrot.lane.b32.xlu1 %v4303_v15, %s7858_s2 }
0x3a1f   :  { %v4306_v47 = vpop.permute.xlu1 %4305 }
0x3a20   :  { %4308 = vst.msk [vmem:[#allocation2 + $0xc] sm:$0x3] %vm803_vm2, %v4306_v47  ;;  %6913 = vmatmul.mubr.msk.f32.vlgmr.msra.gmra.mrb[46].mxu1 %vm700_vm3, %v4306_v47 }
0x3a21   :  { %7398 = vmatpush3.bf16.msra.mxu1 %v8514_v45  ;;  %6934 = vmatprep.mubr.msk.f32.mxu1 %vm7862_vm0, %v7863_v1 }
0x3a22   :  { %7399 = vmatprep.subr.bf16.mxu1 %v7861_v0 }
0x3a25   :  { %7401 = vmatpush3.bf16.msra.mxu1 %v8519_v50 }
0x3a26   :  { %7408 = vmatprep.subr.bf16.mxu1 %v7861_v0 }
0x3a27   :  { %v4875_v53 = vld [vmem:[#allocation2 + $0xc] sm:$0x3] }
0x3a28   :  { %6935 = vmatmul.mubr.msk.f32.vlgmr.msra.gmra.mrb[48].mxu1 %vm700_vm3, %v4500_v11  ;;  %6990 = vmatmul.mubr.msk.f32.vlgmr.msra.gmra.mrb[54].mxu0 %vm700_vm3, %v4875_v53 }
0x3a29   :  { %7410 = vmatpush3.bf16.msra.mxu1 %v8514_v45  ;;  %7440 = vmatpush3.bf16.msra.mxu0 %v8570_v27 }
0x3a2a   :  { %7411 = vmatprep.subr.bf16.mxu1 %v7861_v0  ;;  %7441 = vmatprep.subr.bf16.mxu0 %v7861_v0 }
0x3a2b   :  { %6956 = vmatprep.mubr.msk.f32.mxu1 %vm7862_vm0, %v7863_v1  ;;  %7011 = vmatprep.mubr.msk.f32.mxu0 %vm7862_vm0, %v7863_v1 }
0x3a2d   :  { %7413 = vmatpush3.bf16.msra.mxu1 %v8519_v50  ;;  %7443 = vmatpush3.bf16.msra.mxu0 %v8577_v29 }
0x3a2e   :  { %7420 = vmatprep.subr.bf16.mxu1 %v7861_v0  ;;  %7450 = vmatprep.subr.bf16.mxu0 %v7861_v0 }
0x3a30   :  { %6957 = vmatmul.mubr.msk.f32.vlgmr.msra.gmra.mrb[50].mxu1 %vm700_vm3, %v4650_v30  ;;  %7012 = vmatmul.mubr.f32.vlgmr.msra.gmra.mrb[56].mxu0 %v7863_v1 }
0x3a31   :  { %7422 = vmatpush3.bf16.msra.mxu1 %v8514_v45  ;;  %6978 = vmatprep.mubr.msk.f32.mxu1 %vm7862_vm0, %v7863_v1 }
0x3a32   :  { %7423 = vmatprep.subr.bf16.mxu1 %v7861_v0  ;;  %7452 = vmatpush3.bf16.msra.mxu0 %v8570_v27 }
0x3a33   :  { %7453 = vmatprep.subr.bf16.mxu0 %v7861_v0  ;;  %7033 = vmatprep.mubr.msk.f32.mxu0 %vm7862_vm0, %v7863_v1 }
0x3a35   :  { %7425 = vmatpush3.bf16.msra.mxu1 %v8519_v50 }
0x3a36   :  { %7432 = vmatprep.subr.bf16.mxu1 %v7861_v0  ;;  %7455 = vmatpush3.bf16.msra.mxu0 %v8577_v29 }
0x3a37   :  { %7462 = vmatprep.subr.bf16.mxu0 %v7861_v0 }
0x3a38   :  { %6979 = vmatmul.mubr.msk.f32.vlgmr.msra.gmra.mrb[52].mxu1 %vm700_vm3, %v4800_v31 }
0x3a39   :  { %7434 = vmatpush3.bf16.msra.mxu1 %v8514_v45  ;;  %7000 = vmatprep.mubr.msk.f32.mxu1 %vm7862_vm0, %v7863_v1 }
0x3a3a   :  { %7435 = vmatprep.subr.bf16.mxu1 %v7861_v0 }
0x3a3d   :  { %7437 = vmatpush3.bf16.msra.mxu1 %v8519_v50 }
0x3a3e   :  { %7444 = vmatprep.subr.bf16.mxu1 %v7861_v0 }
0x3af3   :  { %v4378_v17 = vpop.f32.mrb[46].mxu1 }
0x3af4   :  { %v4382_v33 = vadd.f32 %v4378_v17, %v4309_v32  ;;  %v6914_v21 = vpop.f32.mrb[47].mxu1 }
0x3af6   :  { %7688 = vtanh.f32 %v4382_v33  ;;  %v6010_v52 = vmul.f32 -1.442695, %v4382_v33 }
0x3afb   :  { %v4570_v34 = vpop.f32.mrb[48].mxu1  ;;  %v4945_v35 = vpop.f32.mrb[54].mxu0 }
0x3afc   :  { %v4571_v36 = vadd.f32 %v8550_v59, %v4570_v34  ;;  %v6936_v37 = vpop.f32.mrb[49].mxu1  ;;  %v4946_v24 = vadd.f32 %v8550_v59, %v4945_v35  ;;  %v6991_v38 = vpop.f32.mrb[55].mxu0 }
0x3afe   :  { %4574 = vst [vmem:[#allocation3 + $0x2] sm:$0x3] %v4571_v36  ;;  %4949 = vst [vmem:[#allocation3 + $0xc] sm:$0x3] %v4946_v24 }
0x3b00   :  { %v7689_v39 = vpop.eup %7688 }
0x3b01   :  { %4392 = vrot.lane.b32.xlu0 %v7689_v39, %s7864_s26  ;;  %v5227_v39 = vld [vmem:[#allocation3 + $0x4] sm:$0x3] }
0x3b03   :  { %v4720_v40 = vpop.f32.mrb[50].mxu1  ;;  %v5097_v42 = vpop.f32.mrb[56].mxu0 }
0x3b04   :  { %v4721_v43 = vadd.f32 %v8550_v59, %v4720_v40  ;;  %v5101_v44 = vadd.f32 %v5097_v42, %v5030_v41  ;;  %v6958_v45 = vpop.f32.mrb[51].mxu1  ;;  %v7013_v46 = vpop.f32.mrb[57].mxu0 }
0x3b05   :  { %v5126_v26 = vld [vmem:[#allocation3 + $0x2] sm:$0x3] }
0x3b06   :  { %4724 = vst [vmem:[#allocation3 + $0x6] sm:$0x3] %v4721_v43  ;;  %7690 = vtanh.f32 %v5101_v44  ;;  %v6021_v55 = vmul.f32 -1.442695, %v5101_v44 }
0x3b07   :  { %7692 = vpow2.f32 %v6010_v52 }
0x3b08   :  { %7694 = vpow2.f32 %v6021_v55 }
0x3b0b   :  { %v4870_v48 = vpop.f32.mrb[52].mxu1 }
0x3b0c   :  { %v4871_v49 = vadd.f32 %v8550_v59, %v4870_v48  ;;  %v6980_v50 = vpop.f32.mrb[53].mxu1 }
0x3b0e   :  { %4874 = vst [vmem:[#allocation3 + $0xa] sm:$0x3] %v4871_v49 }
0x3b10   :  { %v7691_v51 = vpop.eup %7690 }
0x3b11   :  { %5111 = vrot.lane.b32.xlu1 %v7691_v51, %s7864_s26  ;;  %v7693_v54 = vpop.eup %7692 }
0x3b12   :  { %v4386_v56 = vadd.f32 1.0, %v7693_v54  ;;  %v7695_v57 = vpop.eup %7694 }
0x3b13   :  { %v5105_v62 = vadd.f32 1.0, %v7695_v57 }
0x3b14   :  { %7696 = vrcp.f32 %v4386_v56 }
0x3b15   :  { %7698 = vrcp.f32 %v5105_v62 }
0x3b1e   :  { %v7697_v58 = vpop.eup %7696 }
0x3b1f   :  { %v7699_v63 = vpop.eup %7698  ;;  %v4390_v4 = vmul.f32 %v7697_v58, %v8558_v20 }
0x3b20   :  { %v5109_v8 = vmul.f32 0.0, %v7699_v63 }
0x3b73   :  { %v4393_v60 = vpop.permute.xlu0 %4392 }
0x3b74   :  { %v4395_v61 = vmul.f32 %v7697_v58, %v4393_v60  ;;  %v5328_v60 = vld [vmem:[#allocation3 + $0x6] sm:$0x3] }
0x3b76   :  { %4397 = vrot.lane.b32.xlu0 %v4395_v61, %s7858_s2 }
0x3b83   :  { %v5112_v2 = vpop.permute.xlu1 %5111 }
0x3b84   :  { %v5114_v3 = vmul.f32 %v7699_v63, %v5112_v2 }
0x3b86   :  { %5116 = vrot.lane.b32.xlu1 %v5114_v3, %s7858_s2 }
0x3be8   :  { %v4398_v5 = vpop.permute.xlu0 %4397 }
0x3be9   :  { %v4400_v6 = vadd.f32 %v4398_v5, %v4390_v4 }
0x3beb   :  { %7700 = vtanh.f32 %v4400_v6 }
0x3bf5   :  { %v7701_v7 = vpop.eup %7700 }
0x3bf6   :  { %4403 = vrot.lane.b32.xlu0 %v7701_v7, %s7864_s26 }
0x3bf8   :  { %v5117_v9 = vpop.permute.xlu1 %5116 }
0x3bf9   :  { %v5119_v10 = vadd.f32 %v5117_v9, %v5109_v8 }
0x3bfb   :  { %7702 = vtanh.f32 %v5119_v10 }
0x3c05   :  { %v7703_v12 = vpop.eup %7702 }
0x3c06   :  { %5122 = vrot.lane.b32.xlu1 %v7703_v12, %s7864_s26 }
0x3c68   :  { %v4404_v13 = vpop.permute.xlu0 %4403 }
0x3c69   :  { %v4406_v14 = vmul.f32 %v7697_v58, %v4404_v13 }
0x3c6b   :  { %4408 = vrot.lane.b32.xlu0 %v4406_v14, %s7858_s2 }
0x3c78   :  { %v5123_v16 = vpop.permute.xlu1 %5122 }
0x3c79   :  { %v5125_v19 = vmul.f32 %v7699_v63, %v5123_v16 }
0x3c7b   :  { %5128 = vrot.lane.b32.xlu1 %v5125_v19, %s7858_s2 }
0x3cdd   :  { %v4409_v20 = vpop.permute.xlu0 %4408 }
0x3cde   :  { %4411 = vst.msk [vmem:[#allocation2 + $0xe] sm:$0x3] %vm803_vm2, %v4409_v20  ;;  %v5429_v20 = vld [vmem:[#allocation3 + $0x8] sm:$0x3] }
0x3ce5   :  { %v4950_v22 = vld [vmem:[#allocation2 + $0xe] sm:$0x3] }
0x3ce6   :  { %7001 = vmatmul.mubr.msk.f32.vlgmr.msra.gmra.mrb[54].mxu1 %vm700_vm3, %v4950_v22 }
0x3ce7   :  { %7446 = vmatpush3.bf16.msra.mxu1 %v8570_v27  ;;  %7022 = vmatprep.mubr.msk.f32.mxu1 %vm7862_vm0, %v7863_v1 }
0x3ce8   :  { %7447 = vmatprep.subr.bf16.mxu1 %v7861_v0 }
0x3ceb   :  { %7449 = vmatpush3.bf16.msra.mxu1 %v8577_v29 }
0x3cec   :  { %7456 = vmatprep.subr.bf16.mxu1 %v7861_v0 }
0x3ced   :  { %v5129_v23 = vpop.permute.xlu1 %5128 }
0x3cee   :  { %7023 = vmatmul.mubr.msk.f32.vlgmr.msra.gmra.mrb[56].mxu1 %vm700_vm3, %v5129_v23 }
0x3cef   :  { %7458 = vmatpush3.bf16.msra.mxu1 %v8570_v27  ;;  %7044 = vmatprep.mubr.msk.f32.mxu1 %vm7862_vm0, %v7863_v1 }
0x3cf0   :  { %7459 = vmatprep.subr.bf16.mxu1 %v7861_v0 }
0x3cf3   :  { %7461 = vmatpush3.bf16.msra.mxu1 %v8577_v29 }
0x3cf4   :  { %7468 = vmatprep.subr.bf16.mxu1 %v7861_v0 }
0x3db9   :  { %v5020_v15 = vpop.f32.mrb[54].mxu1 }
0x3dba   :  { %v5021_v47 = vadd.f32 %v8550_v59, %v5020_v15  ;;  %v7002_v25 = vpop.f32.mrb[55].mxu1 }
0x3dbc   :  { %5024 = vst [vmem:[#allocation3 + $0xe] sm:$0x3] %v5021_v47 }
0x3dc1   :  { %v5198_v18 = vpop.f32.mrb[56].mxu1 }
0x3dc2   :  { %v5202_v28 = vadd.f32 %v5198_v18, %v5126_v26  ;;  %v7024_v11 = vpop.f32.mrb[57].mxu1 }
0x3dc4   :  { %7704 = vtanh.f32 %v5202_v28  ;;  %v6023_v30 = vmul.f32 -1.442695, %v5202_v28 }
0x3dc6   :  { %7706 = vpow2.f32 %v6023_v30 }
0x3dce   :  { %v7705_v53 = vpop.eup %7704 }
0x3dcf   :  { %5212 = vrot.lane.b32.xlu0 %v7705_v53, %s7864_s26 }
0x3dd0   :  { %v7707_v31 = vpop.eup %7706 }
0x3dd1   :  { %v5206_v32 = vadd.f32 1.0, %v7707_v31 }
0x3dd3   :  { %7708 = vrcp.f32 %v5206_v32 }
0x3ddd   :  { %v7709_v17 = vpop.eup %7708 }
0x3dde   :  { %v5210_v59 = vmul.f32 %v7709_v17, %v5119_v10 }
0x3e41   :  { %v5213_v33 = vpop.permute.xlu0 %5212 }
0x3e42   :  { %v5215_v21 = vmul.f32 %v7709_v17, %v5213_v33 }
0x3e44   :  { %5217 = vrot.lane.b32.xlu1 %v5215_v21, %s7858_s2 }
0x3eb6   :  { %v5218_v34 = vpop.permute.xlu1 %5217 }
0x3eb7   :  { %v5220_v35 = vadd.f32 %v5218_v34, %v5210_v59  ;;  %v5530_v34 = vld [vmem:[#allocation3 + $0xa] sm:$0x3] }
0x3eb9   :  { %7710 = vtanh.f32 %v5220_v35 }
0x3ec3   :  { %v7711_v36 = vpop.eup %7710 }
0x3ec4   :  { %5223 = vrot.lane.b32.xlu0 %v7711_v36, %s7864_s26 }
0x3f36   :  { %v5224_v37 = vpop.permute.xlu0 %5223 }
0x3f37   :  { %v5226_v24 = vmul.f32 %v7709_v17, %v5224_v37 }
0x3f39   :  { %5229 = vrot.lane.b32.xlu1 %v5226_v24, %s7858_s2 }
0x3fab   :  { %v5230_v38 = vpop.permute.xlu1 %5229 }
0x3fac   :  { %7034 = vmatmul.mubr.msk.f32.vlgmr.msra.gmra.mrb[58].mxu0 %vm700_vm3, %v5230_v38 }
0x3fad   :  { %7464 = vmatpush3.bf16.msra.mxu0 %v8570_v27  ;;  %7055 = vmatprep.mubr.msk.f32.mxu0 %vm7862_vm0, %v7863_v1 }
0x3fae   :  { %7465 = vmatprep.subr.bf16.mxu0 %v7861_v0 }
0x3fb1   :  { %7467 = vmatpush3.bf16.msra.mxu0 %v8577_v29 }
0x3fb2   :  { %7474 = vmatprep.subr.bf16.mxu0 %v7861_v0 }
0x407f   :  { %v5299_v40 = vpop.f32.mrb[58].mxu0 }
0x4080   :  { %v5303_v41 = vadd.f32 %v5299_v40, %v5227_v39  ;;  %v7035_v42 = vpop.f32.mrb[59].mxu0 }
0x4082   :  { %7712 = vtanh.f32 %v5303_v41  ;;  %v6025_v44 = vmul.f32 -1.442695, %v5303_v41 }
0x4084   :  { %7714 = vpow2.f32 %v6025_v44 }
0x408c   :  { %v7713_v43 = vpop.eup %7712 }
0x408d   :  { %5313 = vrot.lane.b32.xlu0 %v7713_v43, %s7864_s26 }
0x408e   :  { %v7715_v45 = vpop.eup %7714 }
0x408f   :  { %v5307_v46 = vadd.f32 1.0, %v7715_v45 }
0x4091   :  { %7716 = vrcp.f32 %v5307_v46 }
0x409b   :  { %v7717_v48 = vpop.eup %7716 }
0x409c   :  { %v5311_v51 = vmul.f32 %v7717_v48, %v5220_v35 }
0x40ff   :  { %v5314_v49 = vpop.permute.xlu0 %5313 }
0x4100   :  { %v5316_v50 = vmul.f32 %v7717_v48, %v5314_v49 }
0x4102   :  { %5318 = vrot.lane.b32.xlu1 %v5316_v50, %s7858_s2  ;;  %v5631_v50 = vld [vmem:[#allocation3 + $0xc] sm:$0x3] }
0x4174   :  { %v5319_v52 = vpop.permute.xlu1 %5318 }
0x4175   :  { %v5321_v54 = vadd.f32 %v5319_v52, %v5311_v51 }
0x4177   :  { %7718 = vtanh.f32 %v5321_v54 }
0x4181   :  { %v7719_v55 = vpop.eup %7718 }
0x4182   :  { %5324 = vrot.lane.b32.xlu0 %v7719_v55, %s7864_s26 }
0x41f4   :  { %v5325_v56 = vpop.permute.xlu0 %5324 }
0x41f5   :  { %v5327_v57 = vmul.f32 %v7717_v48, %v5325_v56 }
0x41f7   :  { %5330 = vrot.lane.b32.xlu1 %v5327_v57, %s7858_s2 }
0x4269   :  { %v5331_v58 = vpop.permute.xlu1 %5330 }
0x426a   :  { %7045 = vmatmul.mubr.msk.f32.vlgmr.msra.gmra.mrb[58].mxu1 %vm700_vm3, %v5331_v58 }
0x426b   :  { %7470 = vmatpush3.bf16.msra.mxu1 %v8570_v27  ;;  %7066 = vmatprep.mubr.msk.f32.mxu1 %vm7862_vm0, %v7863_v1 }
0x426c   :  { %7471 = vmatprep.subr.bf16.mxu1 %v7861_v0 }
0x426f   :  { %7473 = vmatpush3.bf16.msra.mxu1 %v8577_v29 }
0x4270   :  { %7480 = vmatprep.subr.bf16.mxu1 %v7861_v0 }
0x433d   :  { %v5400_v61 = vpop.f32.mrb[58].mxu1 }
0x433e   :  { %v5404_v62 = vadd.f32 %v5400_v61, %v5328_v60  ;;  %v7046_v63 = vpop.f32.mrb[59].mxu1 }
0x4340   :  { %7720 = vtanh.f32 %v5404_v62  ;;  %v6027_v3 = vmul.f32 -1.442695, %v5404_v62 }
0x4342   :  { %7722 = vpow2.f32 %v6027_v3 }
0x434a   :  { %v7721_v2 = vpop.eup %7720 }
0x434b   :  { %5414 = vrot.lane.b32.xlu0 %v7721_v2, %s7864_s26 }
0x434c   :  { %v7723_v4 = vpop.eup %7722 }
0x434d   :  { %v5408_v5 = vadd.f32 1.0, %v7723_v4 }
0x434f   :  { %7724 = vrcp.f32 %v5408_v5 }
0x4359   :  { %v7725_v6 = vpop.eup %7724 }
0x435a   :  { %v5412_v9 = vmul.f32 %v7725_v6, %v5321_v54 }
0x43bd   :  { %v5415_v7 = vpop.permute.xlu0 %5414 }
0x43be   :  { %v5417_v8 = vmul.f32 %v7725_v6, %v5415_v7  ;;  %v5732_v7 = vld [vmem:[#allocation3 + $0xe] sm:$0x3] }
0x43c0   :  { %5419 = vrot.lane.b32.xlu1 %v5417_v8, %s7858_s2 }
0x4432   :  { %v5420_v10 = vpop.permute.xlu1 %5419 }
0x4433   :  { %v5422_v12 = vadd.f32 %v5420_v10, %v5412_v9 }
0x4435   :  { %7726 = vtanh.f32 %v5422_v12 }
0x443f   :  { %v7727_v13 = vpop.eup %7726 }
0x4440   :  { %5425 = vrot.lane.b32.xlu0 %v7727_v13, %s7864_s26 }
0x44b2   :  { %v5426_v14 = vpop.permute.xlu0 %5425 }
0x44b3   :  { %v5428_v16 = vmul.f32 %v7725_v6, %v5426_v14 }
0x44b5   :  { %5431 = vrot.lane.b32.xlu1 %v5428_v16, %s7858_s2 }
0x4527   :  { %v5432_v19 = vpop.permute.xlu1 %5431 }
0x4528   :  { %7056 = vmatmul.mubr.msk.f32.vlgmr.msra.gmra.mrb[60].mxu0 %vm700_vm3, %v5432_v19 }
0x4529   :  { %7476 = vmatpush3.bf16.msra.mxu0 %v8570_v27  ;;  %7077 = vmatprep.mubr.msk.f32.mxu0 %vm7862_vm0, %v7863_v1 }
0x452a   :  { %7477 = vmatprep.subr.bf16.mxu0 %v7861_v0 }
0x452d   :  { %7479 = vmatpush3.bf16.msra.mxu0 %v8577_v29 }
0x452e   :  { %7486 = vmatprep.subr.bf16.mxu0 %v7861_v0 }
0x45fb   :  { %v5501_v22 = vpop.f32.mrb[60].mxu0 }
0x45fc   :  { %v5505_v23 = vadd.f32 %v5501_v22, %v5429_v20  ;;  %v7057_v15 = vpop.f32.mrb[61].mxu0 }
0x45fe   :  { %7728 = vtanh.f32 %v5505_v23  ;;  %v6029_v25 = vmul.f32 -1.442695, %v5505_v23 }
0x4600   :  { %7730 = vpow2.f32 %v6029_v25  ;;  %v5833_v25 = vld [vmem:[%s8732_s5] sm:$0xff] }
0x4608   :  { %v7729_v47 = vpop.eup %7728 }
0x4609   :  { %5515 = vrot.lane.b32.xlu0 %v7729_v47, %s7864_s26 }
0x460a   :  { %v7731_v26 = vpop.eup %7730 }
0x460b   :  { %v5509_v18 = vadd.f32 1.0, %v7731_v26  ;;  %v5834_v26 = vld [vmem:[%s8732_s5 + $0x8] sm:$0xff] }
0x460d   :  { %7732 = vrcp.f32 %v5509_v18  ;;  %v5835_v18 = vld [vmem:[%s8732_s5 + $0x10] sm:$0xff] }
0x4617   :  { %v7733_v28 = vpop.eup %7732 }
0x4618   :  { %v5513_v30 = vmul.f32 %v7733_v28, %v5422_v12 }
0x467b   :  { %v5516_v11 = vpop.permute.xlu0 %5515 }
0x467c   :  { %v5518_v53 = vmul.f32 %v7733_v28, %v5516_v11  ;;  %v5836_v11 = vld [vmem:[%s8732_s5 + $0x18] sm:$0xff]  ;;  %s7865_s5 = smov [#allocation10]  }
0x467d   :  { %s5927_s3 = sshll.u32 %s7865_s5, 4  ;;  %s5928_s3 = int_to_ptr.vmem [resolvable:$true] %s5927_s3 }
0x467e   :  { %5520 = vrot.lane.b32.xlu1 %v5518_v53, %s7858_s2  ;;  %v7490_v53 = vpack.c.bf16 %v5836_v11, %v5835_v18  ;;  %s7826_s11 = scalar_lea.vmem %s5928_s3, 32  ;;  %p7831_p11 = scmp.lt.s32.totalorder %s5928_s3, %s5928_s3 }
0x467f   :  { %p7827_p10 = scmp.ne.s32.totalorder %s5928_s3, %s7826_s11  ;;  %p7832_p12 = scmp.lt.s32.totalorder %s7826_s11, %s7826_s11 }
0x4681   :  { %p7833_p13 = por %p7832_p12, %p7831_p11 }
0x4683   :  { %p7834_p0 = pnand %p7833_p13, %p7827_p10 }
0x46f0   :  { %v5521_v31 = vpop.permute.xlu1 %5520 }
0x46f1   :  { %v5523_v32 = vadd.f32 %v5521_v31, %v5513_v30 }
0x46f3   :  { %7734 = vtanh.f32 %v5523_v32 }
0x46fd   :  { %v7735_v17 = vpop.eup %7734 }
0x46fe   :  { %5526 = vrot.lane.b32.xlu0 %v7735_v17, %s7864_s26 }
0x4770   :  { %v5527_v33 = vpop.permute.xlu0 %5526 }
0x4771   :  { %v5529_v21 = vmul.f32 %v7733_v28, %v5527_v33  ;;  %v7487_v28 = vpack.c.bf16 %v5834_v26, %v5833_v25  ;;  %v6036_v33 = vld [vmem:[%s8733_s6] ss:$0 sm:$0xff] }
0x4773   :  { %5532 = vrot.lane.b32.xlu1 %v5529_v21, %s7858_s2 }
0x47e5   :  { %v5533_v59 = vpop.permute.xlu1 %5532 }
0x47e6   :  { %7067 = vmatmul.mubr.msk.f32.vlgmr.msra.gmra.mrb[60].mxu1 %vm700_vm3, %v5533_v59 }
0x47e7   :  { %7482 = vmatpush3.bf16.msra.mxu1 %v8570_v27  ;;  %7088 = vmatprep.mubr.msk.f32.mxu1 %vm7862_vm0, %v7863_v1 }
0x47e8   :  { %7483 = vmatprep.subr.bf16.mxu1 %v7861_v0 }
0x47eb   :  { %7485 = vmatpush3.bf16.msra.mxu1 %v8577_v29 }
0x48b9   :  { %v5602_v35 = vpop.f32.mrb[60].mxu1 }
0x48ba   :  { %v5606_v36 = vadd.f32 %v5602_v35, %v5530_v34  ;;  %v7068_v37 = vpop.f32.mrb[61].mxu1 }
0x48bc   :  { %7736 = vtanh.f32 %v5606_v36  ;;  %v6031_v38 = vmul.f32 -1.442695, %v5606_v36 }
0x48be   :  { %7738 = vpow2.f32 %v6031_v38 }
0x48c6   :  { %v7737_v24 = vpop.eup %7736 }
0x48c7   :  { %5616 = vrot.lane.b32.xlu0 %v7737_v24, %s7864_s26 }
0x48c8   :  { %v7739_v39 = vpop.eup %7738 }
0x48c9   :  { %v5610_v40 = vadd.f32 1.0, %v7739_v39 }
0x48cb   :  { %7740 = vrcp.f32 %v5610_v40 }
0x48d5   :  { %v7741_v27 = vpop.eup %7740 }
0x48d6   :  { %v5614_v43 = vmul.f32 %v7741_v27, %v5523_v32 }
0x4939   :  { %v5617_v41 = vpop.permute.xlu0 %5616 }
0x493a   :  { %v5619_v42 = vmul.f32 %v7741_v27, %v5617_v41 }
0x493c   :  { %5621 = vrot.lane.b32.xlu1 %v5619_v42, %s7858_s2 }
0x49ae   :  { %v5622_v29 = vpop.permute.xlu1 %5621 }
0x49af   :  { %v5624_v44 = vadd.f32 %v5622_v29, %v5614_v43 }
0x49b1   :  { %7742 = vtanh.f32 %v5624_v44 }
0x49bb   :  { %v7743_v45 = vpop.eup %7742 }
0x49bc   :  { %5627 = vrot.lane.b32.xlu0 %v7743_v45, %s7864_s26 }
0x4a2e   :  { %v5628_v46 = vpop.permute.xlu0 %5627 }
0x4a2f   :  { %v5630_v48 = vmul.f32 %v7741_v27, %v5628_v46 }
0x4a31   :  { %5633 = vrot.lane.b32.xlu1 %v5630_v48, %s7858_s2 }
0x4aa3   :  { %v5634_v49 = vpop.permute.xlu1 %5633 }
0x4aa4   :  { %7078 = vmatmul.mubr.msk.f32.vlgmr.msra.gmra.mrb[62].mxu0 %vm700_vm3, %v5634_v49 }
0x4aa5   :  { %7099 = vmatprep.mubr.msk.f32.mxu0 %vm7862_vm0, %v7863_v1  ;;  %7488 = vmatpush3.bf16.msra.mxu0 %v7487_v28 }
0x4aa6   :  { %7489 = vmatprep.subr.bf16.mxu0 %v7861_v0 }
0x4aa9   :  { %7491 = vmatpush3.bf16.msra.mxu0 %v7490_v53 }
0x4b77   :  { %v5703_v51 = vpop.f32.mrb[62].mxu0 }
0x4b78   :  { %v5707_v52 = vadd.f32 %v5703_v51, %v5631_v50  ;;  %v7079_v54 = vpop.f32.mrb[63].mxu0 }
0x4b7a   :  { %7744 = vtanh.f32 %v5707_v52  ;;  %v6033_v56 = vmul.f32 -1.442695, %v5707_v52 }
0x4b7c   :  { %7746 = vpow2.f32 %v6033_v56 }
0x4b84   :  { %v7745_v55 = vpop.eup %7744 }
0x4b85   :  { %5717 = vrot.lane.b32.xlu0 %v7745_v55, %s7864_s26 }
0x4b86   :  { %v7747_v57 = vpop.eup %7746 }
0x4b87   :  { %v5711_v58 = vadd.f32 1.0, %v7747_v57 }
0x4b89   :  { %7748 = vrcp.f32 %v5711_v58 }
0x4b93   :  { %v7749_v60 = vpop.eup %7748 }
0x4b94   :  { %v5715_v63 = vmul.f32 %v7749_v60, %v5624_v44 }
0x4bf7   :  { %v5718_v61 = vpop.permute.xlu0 %5717 }
0x4bf8   :  { %v5720_v62 = vmul.f32 %v7749_v60, %v5718_v61 }
0x4bfa   :  { %5722 = vrot.lane.b32.xlu1 %v5720_v62, %s7858_s2 }
0x4c6c   :  { %v5723_v1 = vpop.permute.xlu1 %5722 }
0x4c6d   :  { %v5725_v2 = vadd.f32 %v5723_v1, %v5715_v63 }
0x4c6f   :  { %7750 = vtanh.f32 %v5725_v2 }
0x4c79   :  { %v7751_v3 = vpop.eup %7750 }
0x4c7a   :  { %5728 = vrot.lane.b32.xlu0 %v7751_v3, %s7864_s26 }
0x4cec   :  { %v5729_v4 = vpop.permute.xlu0 %5728 }
0x4ced   :  { %v5731_v5 = vmul.f32 %v7749_v60, %v5729_v4 }
0x4cef   :  { %5734 = vrot.lane.b32.xlu1 %v5731_v5, %s7858_s2 }
0x4d61   :  { %v5735_v6 = vpop.permute.xlu1 %5734 }
0x4d62   :  { %7089 = vmatmul.mubr.msk.f32.vlgmr.msra.gmra.mrb[62].mxu1 %vm700_vm3, %v5735_v6 }
0x4e35   :  { %v5804_v8 = vpop.f32.mrb[62].mxu1 }
0x4e36   :  { %v5808_v9 = vadd.f32 %v5804_v8, %v5732_v7  ;;  %v7090_v10 = vpop.f32.mrb[63].mxu1 }
0x4e38   :  { %7752 = vtanh.f32 %v5808_v9  ;;  %v6035_v13 = vmul.f32 -1.442695, %v5808_v9 }
0x4e3a   :  { %7754 = vpow2.f32 %v6035_v13 }
0x4e42   :  { %v7753_v12 = vpop.eup %7752 }
0x4e43   :  { %5818 = vrot.lane.b32.xlu0 %v7753_v12, %s7864_s26 }
0x4e44   :  { %v7755_v14 = vpop.eup %7754 }
0x4e45   :  { %v5812_v16 = vadd.f32 1.0, %v7755_v14 }
0x4e47   :  { %7756 = vrcp.f32 %v5812_v16 }
0x4e51   :  { %v7757_v19 = vpop.eup %7756 }
0x4e52   :  { %v5816_v23 = vmul.f32 %v7757_v19, %v5725_v2 }
0x4eb5   :  { %v5819_v20 = vpop.permute.xlu0 %5818 }
0x4eb6   :  { %v5821_v22 = vmul.f32 %v7757_v19, %v5819_v20 }
0x4eb8   :  { %5823 = vrot.lane.b32.xlu1 %v5821_v22, %s7858_s2 }
0x4f2a   :  { %v5824_v15 = vpop.permute.xlu1 %5823 }
0x4f2b   :  { %v5826_v47 = vadd.f32 %v5824_v15, %v5816_v23 }
0x4f2d   :  { %7758 = vtanh.f32 %v5826_v47 }
0x4f37   :  { %v7759_v30 = vpop.eup %7758 }
0x4f38   :  { %5829 = vrot.lane.b32.xlu0 %v7759_v30, %s7864_s26 }
0x4faa   :  { %v5830_v31 = vpop.permute.xlu0 %5829 }
0x4fab   :  { %v5832_v32 = vmul.f32 %v7757_v19, %v5830_v31 }
0x4fad   :  { %5845 = vrot.lane.b32.xlu1 %v5832_v32, %s7858_s2 }
0x501f   :  { %v5846_v17 = vpop.permute.xlu1 %5845 }
0x5020   :  { %7100 = vmatmul.mubr.msk.f32.vlgmr.msra.gmra.mrb[64].mxu0 %vm700_vm3, %v5846_v17 }
0x50f3   :  { %v5915_v21 = vpop.f32.mrb[64].mxu0 }
0x50f4   :  { %v5916_v0 = vadd.f32 %v6036_v33, %v5915_v21  ;;  %v7101_v59 = vpop.f32.mrb[65].mxu0 }
0x50f6   :  { %5920 = vst.msk [vmem:[#allocation10] sm:$0x3] %vm5919_vm4, %v5916_v0 }
0x50f7   :  { %7837 = shalt.err (!%p7834_p0)
}
0x50f8   :  { %s7838_s20 = scalar_lea.hbm %s8734_s7, 32 }
0x50f9   :  { %p7839_p1 = scmp.ne.s32.totalorder %s8734_s7, %s7838_s20  ;;  %p7842_p2 = scmp.lt.u32.totalorder %s7838_s20, %s8734_s7 }
0x50fb   :  { %p7844_p3 = pnand %p7842_p2, %p7839_p1 }
0x50fd   :  { %7847 = shalt.err (!%p7844_p3)
}
0x50fe   :  { %5930 = dma.vmem_to_hbm [thread:$0]  %s5928_s3, 32, %s8734_s7, [#allocation6]  }
0x50ff   :  { %7852 = dma.done.wait [#allocation6], 32  }
0x5100   :  { %7853 = vsyncadd [#allocation6], 4294967264 }
0x5101   :  { %5934 = vsyncpa [#allocation5], 1 }
0x5102   :  { %5935 = vsyncpa [#allocation8], 1 }
0x5103   :  { %5936 = vsyncpa [#allocation6], 1 }

</bundles_post_ra>
